<compile_context>
chip_gen: v7x
topology: tpu7x:2x2x1
jax: 0.10.0
libtpu: 0.0.40
codegen_flags: <defaults>
</compile_context>

<pallas_src>
import math
import functools

import jax
import jax.numpy as jnp
from jax import lax
from jax.experimental import pallas as pl
from jax.experimental.pallas import tpu as pltpu


# ----------------------------------------------------------------------------
# helpers
# ----------------------------------------------------------------------------
def _layernorm(y, g, b, eps):
    # TF-style LayerNorm (biased variance, eps inside sqrt) -- matches module.
    u = jnp.mean(y, axis=-1, keepdims=True)
    d = y - u
    s = jnp.mean(d * d, axis=-1, keepdims=True)
    return g * (d * lax.rsqrt(s + eps)) + b


def _erf(x):
    # Abramowitz & Stegun 7.1.26 (max abs err ~1.5e-7): used instead of
    # lax.erf so the element-wise path is guaranteed to lower in Mosaic; the
    # error is far below the bf16 matmul noise already accepted.
    ax = jnp.abs(x)
    t = 1.0 / (1.0 + 0.3275911 * ax)
    poly = t * (0.254829592 + t * (-0.284496736 + t * (1.421413741
               + t * (-1.453152027 + t * 1.061405429))))
    y = 1.0 - poly * jnp.exp(-ax * ax)
    return jnp.where(x >= 0.0, y, -y)


def make_dft_constants(L, q_index):
    """Real-DFT matmul matrices (frequency mask folded into the masked irfft).

    ct/st (Lfp,L): rfft      -> X_re = ct @ x, X_im = -(st @ x)
    cm/sm (L,Lfp): masked irfft (coef * 0/1 freq-mask folded in)
    cu/su (L,Lfp): plain  irfft (coef folded in)
    Lf = L//2+1 is zero-padded to a multiple of 8.
    """
    Lf = L // 2 + 1
    Lfp = ((Lf + 7) // 8) * 8
    t = jnp.arange(L, dtype=jnp.float32)[:, None]
    f = jnp.arange(Lfp, dtype=jnp.float32)[None, :]
    ang = 2.0 * math.pi * t * f / L
    valid = (jnp.arange(Lfp) < Lf).astype(jnp.float32)[None, :]
    c_tf = jnp.cos(ang) * valid                                     # (L, Lfp)
    s_tf = jnp.sin(ang) * valid
    coef = jnp.where((jnp.arange(Lfp) == 0) | (jnp.arange(Lfp) == L // 2),
                     1.0 / L, 2.0 / L).astype(jnp.float32)[None, :] * valid
    fmask = jnp.zeros((Lfp,), jnp.float32).at[jnp.asarray(q_index)].set(1.0)[None, :]
    # NOTE: folding the mask relies on it being exactly 0/1 (mask**2 == mask).
    return dict(
        ct=c_tf.T, st=s_tf.T,                                       # (Lfp, L)
        cm=c_tf * coef * fmask, sm=s_tf * coef * fmask,             # (L, Lfp)
        cu=c_tf * coef, su=s_tf * coef,                             # (L, Lfp)
    )


# ----------------------------------------------------------------------------
# Fused FEARecBlock kernel (one batch element per grid step)
# ----------------------------------------------------------------------------
def _fearec_kernel(x_ref, mask_ref,
                   ct_ref, st_ref, cm_ref, sm_ref, cu_ref, su_ref,
                   wq_ref, wk_ref, wv_ref, bq_ref, bk_ref, bv_ref,
                   wd_ref, bd_ref, g1_ref, be1_ref,
                   w1_ref, bf1_ref, w2_ref, bf2_ref, g2_ref, be2_ref,
                   o_ref, *, H, E, K, ratio, eps):
    f32 = jnp.float32
    bf16 = jnp.bfloat16

    def mm(a, b):
        return jnp.dot(a, b, preferred_element_type=f32)

    x = x_ref[0]                                       # (L, D) f32
    L = x.shape[0]
    xb = x.astype(bf16)

    # ---- Q/K/V projections (bf16 MXU, f32 accumulate) ----
    q = mm(xb, wq_ref[...]) + bq_ref[...]
    k = mm(xb, wk_ref[...]) + bk_ref[...]
    v = mm(xb, wv_ref[...]) + bv_ref[...]

    # ---- rfft along time as DFT matmuls ----
    ct = ct_ref[...]
    st = st_ref[...]
    q_re = mm(ct, q.astype(bf16)); q_im = -mm(st, q.astype(bf16))   # (Lfp, D)
    k_re = mm(ct, k.astype(bf16)); k_im = -mm(st, k.astype(bf16))
    v_re = mm(ct, v.astype(bf16)); v_im = -mm(st, v.astype(bf16))

    # ---- autocorrelation: masked irfft(Q * conj(K)), mean over channels ----
    r_re = q_re * k_re + q_im * k_im
    r_im = q_im * k_re - q_re * k_im
    cm = cm_ref[...]
    sm = sm_ref[...]
    corr = mm(cm, r_re.astype(bf16)) - mm(sm, r_im.astype(bf16))    # (L, D)
    mv = jnp.mean(corr, axis=-1, keepdims=True)                     # (L, 1)

    # ---- in-kernel top-K selection + softmax -> circular delay weights ----
    # rank[i] = #{j : mv[j] > mv[i]} (distinct values => exact top-K set).
    ri = lax.broadcasted_iota(jnp.int32, (L, L), 0)
    ci = lax.broadcasted_iota(jnp.int32, (L, L), 1)
    mv_r = jnp.broadcast_to(mv, (L, L))                 # [i,j] = mv[i]
    ones_ll = jnp.ones((L, L), f32)
    mv_c = mm(ones_ll, jnp.where(ri == ci, mv_r, 0.0))  # [i,j] = mv[j] (MXU "transpose")
    gt = jnp.where(ri == ci, 0.0, (mv_c > mv_r).astype(f32))
    rank = jnp.sum(gt, axis=-1, keepdims=True)          # (L, 1)
    sel = rank < float(K)
    m = jnp.max(mv_c, axis=-1, keepdims=True)           # global max (softmax shift)
    e = jnp.where(sel, jnp.exp(mv - m), 0.0)
    denom = mm(ones_ll, e)                               # every row = sum(e)
    c_shift = e / denom                                  # (L, 1)

    # ---- time branch (time_delay_agg_inference) as circular correlation:
    #      ctx_time = irfft( conj(rfft(c_shift)) * rfft(v) ), all on the MXU ----
    ch_re = mm(ct, c_shift.astype(bf16))                 # (Lfp, 1)
    ch_im = -mm(st, c_shift.astype(bf16))
    p_re = ch_re * v_re + ch_im * v_im
    p_im = ch_re * v_im - ch_im * v_re
    ctx_time = (mm(cu_ref[...], p_re.astype(bf16))
                - mm(su_ref[...], p_im.astype(bf16)))    # (L, D)

    # ---- dual-domain branch: band-pass filtered q/k/v (reuses the spectra),
    #      heads folded into the row dim -> single attention matmul/softmax ----
    sq = mm(cm, q_re.astype(bf16)) - mm(sm, q_im.astype(bf16))
    sk = mm(cm, k_re.astype(bf16)) - mm(sm, k_im.astype(bf16))
    sv = mm(cm, v_re.astype(bf16)) - mm(sm, v_im.astype(bf16))

    def stack_heads(a):                                  # (L, D) -> (H*L, E)
        return jnp.concatenate([a[:, h * E:(h + 1) * E] for h in range(H)], axis=0)

    sq_s = stack_heads(sq).astype(bf16)
    sk_s = stack_heads(sk).astype(bf16)
    sv_s = stack_heads(sv).astype(bf16)

    mask = mask_ref[0]                                   # (L, L) f32
    neg = jnp.full((L, L), -1.0e9, f32)
    bmask = jnp.concatenate(
        [jnp.concatenate([mask if hi == hj else neg for hj in range(H)], axis=1)
         for hi in range(H)], axis=0)                    # (H*L, H*L)

    s = lax.dot_general(sq_s, sk_s, (((1,), (1,)), ((), ())),
                        preferred_element_type=f32)      # (H*L, H*L)
    s = s * (1.0 / math.sqrt(E)) + bmask
    s = s - jnp.max(s, axis=-1, keepdims=True)
    p = jnp.exp(s)
    p = p * pl.reciprocal(jnp.sum(p, axis=-1, keepdims=True), approx=True)
    ctx_s = mm(p.astype(bf16), sv_s)                     # (H*L, E)

    # ---- branch mix + output dense; head re-merge folded into row-sliced Wd ----
    wd = wd_ref[...]
    h1 = (1.0 - ratio) * mm(ctx_time.astype(bf16), wd)
    for h in range(H):
        h1 = h1 + ratio * mm(ctx_s[h * L:(h + 1) * L].astype(bf16),
                             wd[h * E:(h + 1) * E, :])
    h1 = h1 + bd_ref[...]
    ln1 = _layernorm(h1 + x, g1_ref[...], be1_ref[...], eps)

    # ---- FeedForward: dense1 -> erf-GELU -> dense2 -> +residual -> LayerNorm ----
    a = mm(ln1.astype(bf16), w1_ref[...]) + bf1_ref[...]
    a = a * 0.5 * (1.0 + _erf(a * (1.0 / math.sqrt(2.0))))
    f2 = mm(a.astype(bf16), w2_ref[...]) + bf2_ref[...]
    o_ref[0] = _layernorm(f2 + ln1, g2_ref[...], be2_ref[...], eps)


def fearec_block_forward(x, attention_mask, prep, *, H, K, spatial_ratio):
    B, L, D = x.shape
    assert D % H == 0 and 0 < K <= L
    E = D // H
    Lfp = prep["ct"].shape[0]
    I = prep["w1"].shape[1]
    mask = attention_mask.reshape(B, L, L)

    kern = functools.partial(_fearec_kernel, H=H, E=E, K=K,
                             ratio=float(spatial_ratio), eps=1e-12)

    def fixed(shape):
        return pl.BlockSpec(shape, lambda b: (0, 0))

    return pl.pallas_call(
        kern,
        out_shape=jax.ShapeDtypeStruct((B, L, D), jnp.float32),
        grid=(B,),
        in_specs=[
            pl.BlockSpec((1, L, D), lambda b: (b, 0, 0)),          # x
            pl.BlockSpec((1, L, L), lambda b: (b, 0, 0)),          # attention mask
            fixed((Lfp, L)), fixed((Lfp, L)),                      # ct, st
            fixed((L, Lfp)), fixed((L, Lfp)),                      # cm, sm (masked)
            fixed((L, Lfp)), fixed((L, Lfp)),                      # cu, su
            fixed((D, D)), fixed((D, D)), fixed((D, D)),           # Wq, Wk, Wv
            fixed((1, D)), fixed((1, D)), fixed((1, D)),           # bq, bk, bv
            fixed((D, D)), fixed((1, D)),                          # Wd, bd
            fixed((1, D)), fixed((1, D)),                          # LN1 gamma/beta
            fixed((D, I)), fixed((1, I)),                          # W1, b1
            fixed((I, D)), fixed((1, D)),                          # W2, b2
            fixed((1, D)), fixed((1, D)),                          # LN2 gamma/beta
        ],
        out_specs=pl.BlockSpec((1, L, D), lambda b: (b, 0, 0)),
        compiler_params=pltpu.CompilerParams(
            dimension_semantics=("parallel",)),
    )(x, mask,
      prep["ct"], prep["st"], prep["cm"], prep["sm"], prep["cu"], prep["su"],
      prep["wq"], prep["wk"], prep["wv"], prep["bq"], prep["bk"], prep["bv"],
      prep["wd"], prep["bd"], prep["g1"], prep["be1"],
      prep["w1"], prep["b1"], prep["w2"], prep["b2"],
      prep["g2"], prep["be2"])


# ----------------------------------------------------------------------------
# One-time parameter preparation (hoisted out of the per-call forward)
# ----------------------------------------------------------------------------
def prepare_fearec(params, consts):
    b16 = lambda a: a.astype(jnp.bfloat16)
    row = lambda a: a.reshape(1, -1).astype(jnp.float32)
    return dict(
        ct=b16(consts["ct"]), st=b16(consts["st"]),
        cm=b16(consts["cm"]), sm=b16(consts["sm"]),
        cu=b16(consts["cu"]), su=b16(consts["su"]),
        wq=b16(params["wq"]), wk=b16(params["wk"]), wv=b16(params["wv"]),
        bq=row(params["bq"]), bk=row(params["bk"]), bv=row(params["bv"]),
        wd=b16(params["wd"]), bd=row(params["bd"]),
        g1=row(params["ln1_g"]), be1=row(params["ln1_b"]),
        w1=b16(params["w1"]), b1=row(params["b1"]),
        w2=b16(params["w2"]), b2=row(params["b2"]),
        g2=row(params["ln2_g"]), be2=row(params["ln2_b"]),
    )


def make_config():
    cfg = dict(
        hidden_size=32,
        num_attention_heads=2,
        max_seq_length=64,
        num_hidden_layers=2,
        global_ratio=0.6,
        spatial_ratio=0.5,
        factor=10,
        fea_layer=0,
    )
    L = cfg["max_seq_length"]
    n_layers = cfg["num_hidden_layers"]
    global_ratio = cfg["global_ratio"]
    # replicate FEARecLayer.__init__ index computation exactly
    if global_ratio > 1.0 / n_layers:
        w = global_ratio
        s = (L // 2 + 1) * (1 - global_ratio) // (n_layers - 1)
    else:
        w = 1.0 / n_layers
        s = (1.0 / n_layers) * (L // 2 + 1)
    i = cfg["fea_layer"]
    left = int((L // 2 + 1) * (1 - w) - i * s)
    right = int(L // 2 + 1 - i * s)
    cfg["q_index"] = list(range(left, right))
    return cfg


def init_params(key, cfg):
    D = cfg["hidden_size"]
    I = 4 * D
    ks = jax.random.split(key, 8)

    def w(k, shape):
        return (0.02 * jax.random.normal(k, shape)).astype(jnp.float32)

    return dict(
        wq=w(ks[0], (D, D)), bq=jnp.zeros((D,), jnp.float32),
        wk=w(ks[1], (D, D)), bk=jnp.zeros((D,), jnp.float32),
        wv=w(ks[2], (D, D)), bv=jnp.zeros((D,), jnp.float32),
        wd=w(ks[3], (D, D)), bd=jnp.zeros((D,), jnp.float32),
        ln1_g=jnp.ones((D,), jnp.float32), ln1_b=jnp.zeros((D,), jnp.float32),
        w1=w(ks[4], (D, I)), b1=jnp.zeros((I,), jnp.float32),
        w2=w(ks[5], (I, D)), b2=jnp.zeros((D,), jnp.float32),
        ln2_g=jnp.ones((D,), jnp.float32), ln2_b=jnp.zeros((D,), jnp.float32),
    )


# ----------------------------------------------------------------------------
if __name__ == "__main__":
    cfg = make_config()
    B = 2
    L = cfg["max_seq_length"]
    D = cfg["hidden_size"]
    H = cfg["num_attention_heads"]
    K = int(cfg["factor"] * math.log(L))                # top-k delays (41)

    key = jax.random.PRNGKey(0)
    kx, kp = jax.random.split(key)
    x = jax.random.normal(kx, (B, L, D), dtype=jnp.float32)

    # causal "extended" attention mask: 0 where attended, -10000 otherwise
    causal = jnp.tril(jnp.ones((L, L), dtype=jnp.float32))
    attention_mask = jnp.broadcast_to(
        ((1.0 - causal) * -10000.0)[None, None, :, :], (B, 1, L, L))

    params = init_params(kp, cfg)
    consts = make_dft_constants(L, cfg["q_index"])
    prep = prepare_fearec(params, consts)               # one-time bf16 prep

    fwd = jax.jit(functools.partial(
        fearec_block_forward, H=H, K=K, spatial_ratio=cfg["spatial_ratio"]))
    out = fwd(x, attention_mask, prep)
    jax.block_until_ready(out)

    assert out.shape == (B, L, D)
    assert bool(jnp.all(jnp.isfinite(out)))
    print("KERNEL_OK")
</pallas_src>

<mosaic_0001>
module attributes {stable_mosaic.version = 11 : i64} {
  func.func @_fearec_kernel(%arg0: i32, %arg1: memref<1x64x32xf32, #tpu.memory_space<vmem>>, %arg2: memref<1x64x64xf32, #tpu.memory_space<vmem>>, %arg3: memref<40x64xbf16, #tpu.memory_space<vmem>>, %arg4: memref<40x64xbf16, #tpu.memory_space<vmem>>, %arg5: memref<64x40xbf16, #tpu.memory_space<vmem>>, %arg6: memref<64x40xbf16, #tpu.memory_space<vmem>>, %arg7: memref<64x40xbf16, #tpu.memory_space<vmem>>, %arg8: memref<64x40xbf16, #tpu.memory_space<vmem>>, %arg9: memref<32x32xbf16, #tpu.memory_space<vmem>>, %arg10: memref<32x32xbf16, #tpu.memory_space<vmem>>, %arg11: memref<32x32xbf16, #tpu.memory_space<vmem>>, %arg12: memref<1x32xf32, #tpu.memory_space<vmem>>, %arg13: memref<1x32xf32, #tpu.memory_space<vmem>>, %arg14: memref<1x32xf32, #tpu.memory_space<vmem>>, %arg15: memref<32x32xbf16, #tpu.memory_space<vmem>>, %arg16: memref<1x32xf32, #tpu.memory_space<vmem>>, %arg17: memref<1x32xf32, #tpu.memory_space<vmem>>, %arg18: memref<1x32xf32, #tpu.memory_space<vmem>>, %arg19: memref<32x128xbf16, #tpu.memory_space<vmem>>, %arg20: memref<1x128xf32, #tpu.memory_space<vmem>>, %arg21: memref<128x32xbf16, #tpu.memory_space<vmem>>, %arg22: memref<1x32xf32, #tpu.memory_space<vmem>>, %arg23: memref<1x32xf32, #tpu.memory_space<vmem>>, %arg24: memref<1x32xf32, #tpu.memory_space<vmem>>, %arg25: memref<1x64x32xf32, #tpu.memory_space<vmem>>) attributes {dimension_semantics = [#tpu.dimension_semantics<parallel>], iteration_bounds = array<i64: 2>, scalar_prefetch = 0 : i64, scratch_operands = 0 : i64, tpu.core_type = #tpu.core_type<tc>, window_params = [{transform_indices = @transform_0, window_bounds = array<i64: 1, 64, 32>}, {transform_indices = @transform_1, window_bounds = array<i64: 1, 64, 64>}, {pipeline_mode = #tpu.pipeline_mode<synchronous>, transform_indices = @transform_2, window_bounds = array<i64: 40, 64>}, {pipeline_mode = #tpu.pipeline_mode<synchronous>, transform_indices = @transform_3, window_bounds = array<i64: 40, 64>}, {pipeline_mode = #tpu.pipeline_mode<synchronous>, transform_indices = @transform_4, window_bounds = array<i64: 64, 40>}, {pipeline_mode = #tpu.pipeline_mode<synchronous>, transform_indices = @transform_5, window_bounds = array<i64: 64, 40>}, {pipeline_mode = #tpu.pipeline_mode<synchronous>, transform_indices = @transform_6, window_bounds = array<i64: 64, 40>}, {pipeline_mode = #tpu.pipeline_mode<synchronous>, transform_indices = @transform_7, window_bounds = array<i64: 64, 40>}, {pipeline_mode = #tpu.pipeline_mode<synchronous>, transform_indices = @transform_8, window_bounds = array<i64: 32, 32>}, {pipeline_mode = #tpu.pipeline_mode<synchronous>, transform_indices = @transform_9, window_bounds = array<i64: 32, 32>}, {pipeline_mode = #tpu.pipeline_mode<synchronous>, transform_indices = @transform_10, window_bounds = array<i64: 32, 32>}, {pipeline_mode = #tpu.pipeline_mode<synchronous>, transform_indices = @transform_11, window_bounds = array<i64: 1, 32>}, {pipeline_mode = #tpu.pipeline_mode<synchronous>, transform_indices = @transform_12, window_bounds = array<i64: 1, 32>}, {pipeline_mode = #tpu.pipeline_mode<synchronous>, transform_indices = @transform_13, window_bounds = array<i64: 1, 32>}, {pipeline_mode = #tpu.pipeline_mode<synchronous>, transform_indices = @transform_14, window_bounds = array<i64: 32, 32>}, {pipeline_mode = #tpu.pipeline_mode<synchronous>, transform_indices = @transform_15, window_bounds = array<i64: 1, 32>}, {pipeline_mode = #tpu.pipeline_mode<synchronous>, transform_indices = @transform_16, window_bounds = array<i64: 1, 32>}, {pipeline_mode = #tpu.pipeline_mode<synchronous>, transform_indices = @transform_17, window_bounds = array<i64: 1, 32>}, {pipeline_mode = #tpu.pipeline_mode<synchronous>, transform_indices = @transform_18, window_bounds = array<i64: 32, 128>}, {pipeline_mode = #tpu.pipeline_mode<synchronous>, transform_indices = @transform_19, window_bounds = array<i64: 1, 128>}, {pipeline_mode = #tpu.pipeline_mode<synchronous>, transform_indices = @transform_20, window_bounds = array<i64: 128, 32>}, {pipeline_mode = #tpu.pipeline_mode<synchronous>, transform_indices = @transform_21, window_bounds = array<i64: 1, 32>}, {pipeline_mode = #tpu.pipeline_mode<synchronous>, transform_indices = @transform_22, window_bounds = array<i64: 1, 32>}, {pipeline_mode = #tpu.pipeline_mode<synchronous>, transform_indices = @transform_23, window_bounds = array<i64: 1, 32>}, {transform_indices = @transform_24, window_bounds = array<i64: 1, 64, 32>}]} {
    %c0 = arith.constant 0 : index
    %c0_0 = arith.constant 0 : index
    %c0_1 = arith.constant 0 : index
    %0 = vector.load %arg1[%c0, %c0_0, %c0_1] : memref<1x64x32xf32, #tpu.memory_space<vmem>>, vector<1x64x32xf32>
    %1 = vector.shape_cast %0 : vector<1x64x32xf32> to vector<64x32xf32>
    %2 = arith.truncf %1 : vector<64x32xf32> to vector<64x32xbf16>
    %c0_2 = arith.constant 0 : index
    %c0_3 = arith.constant 0 : index
    %3 = vector.load %arg9[%c0_2, %c0_3] : memref<32x32xbf16, #tpu.memory_space<vmem>>, vector<32x32xbf16>
    %cst = arith.constant dense<0.000000e+00> : vector<64x32xf32>
    %4 = tpu.matmul %2, %3, %cst {dimension_numbers = #tpu.dot_dimension_numbers<[1], [0], [0], [1], [0, 0, 1, 1], [], []>} : vector<64x32xbf16>, vector<32x32xbf16>, vector<64x32xf32> -> vector<64x32xf32>
    %c0_4 = arith.constant 0 : index
    %c0_5 = arith.constant 0 : index
    %5 = vector.load %arg12[%c0_4, %c0_5] : memref<1x32xf32, #tpu.memory_space<vmem>>, vector<1x32xf32>
    %6 = vector.broadcast %5 : vector<1x32xf32> to vector<64x32xf32>
    %7 = arith.addf %4, %6 : vector<64x32xf32>
    %c0_6 = arith.constant 0 : index
    %c0_7 = arith.constant 0 : index
    %8 = vector.load %arg10[%c0_6, %c0_7] : memref<32x32xbf16, #tpu.memory_space<vmem>>, vector<32x32xbf16>
    %cst_8 = arith.constant dense<0.000000e+00> : vector<64x32xf32>
    %9 = tpu.matmul %2, %8, %cst_8 {dimension_numbers = #tpu.dot_dimension_numbers<[1], [0], [0], [1], [0, 0, 1, 1], [], []>} : vector<64x32xbf16>, vector<32x32xbf16>, vector<64x32xf32> -> vector<64x32xf32>
    %c0_9 = arith.constant 0 : index
    %c0_10 = arith.constant 0 : index
    %10 = vector.load %arg13[%c0_9, %c0_10] : memref<1x32xf32, #tpu.memory_space<vmem>>, vector<1x32xf32>
    %11 = vector.broadcast %10 : vector<1x32xf32> to vector<64x32xf32>
    %12 = arith.addf %9, %11 : vector<64x32xf32>
    %c0_11 = arith.constant 0 : index
    %c0_12 = arith.constant 0 : index
    %13 = vector.load %arg11[%c0_11, %c0_12] : memref<32x32xbf16, #tpu.memory_space<vmem>>, vector<32x32xbf16>
    %cst_13 = arith.constant dense<0.000000e+00> : vector<64x32xf32>
    %14 = tpu.matmul %2, %13, %cst_13 {dimension_numbers = #tpu.dot_dimension_numbers<[1], [0], [0], [1], [0, 0, 1, 1], [], []>} : vector<64x32xbf16>, vector<32x32xbf16>, vector<64x32xf32> -> vector<64x32xf32>
    %c0_14 = arith.constant 0 : index
    %c0_15 = arith.constant 0 : index
    %15 = vector.load %arg14[%c0_14, %c0_15] : memref<1x32xf32, #tpu.memory_space<vmem>>, vector<1x32xf32>
    %16 = vector.broadcast %15 : vector<1x32xf32> to vector<64x32xf32>
    %17 = arith.addf %14, %16 : vector<64x32xf32>
    %c0_16 = arith.constant 0 : index
    %c0_17 = arith.constant 0 : index
    %18 = vector.load %arg3[%c0_16, %c0_17] : memref<40x64xbf16, #tpu.memory_space<vmem>>, vector<40x64xbf16>
    %c0_18 = arith.constant 0 : index
    %c0_19 = arith.constant 0 : index
    %19 = vector.load %arg4[%c0_18, %c0_19] : memref<40x64xbf16, #tpu.memory_space<vmem>>, vector<40x64xbf16>
    %20 = arith.truncf %7 : vector<64x32xf32> to vector<64x32xbf16>
    %cst_20 = arith.constant dense<0.000000e+00> : vector<40x32xf32>
    %21 = tpu.matmul %18, %20, %cst_20 {dimension_numbers = #tpu.dot_dimension_numbers<[1], [0], [0], [1], [0, 0, 1, 1], [], []>} : vector<40x64xbf16>, vector<64x32xbf16>, vector<40x32xf32> -> vector<40x32xf32>
    %22 = arith.truncf %7 : vector<64x32xf32> to vector<64x32xbf16>
    %cst_21 = arith.constant dense<0.000000e+00> : vector<40x32xf32>
    %23 = tpu.matmul %19, %22, %cst_21 {dimension_numbers = #tpu.dot_dimension_numbers<[1], [0], [0], [1], [0, 0, 1, 1], [], []>} : vector<40x64xbf16>, vector<64x32xbf16>, vector<40x32xf32> -> vector<40x32xf32>
    %cst_22 = arith.constant 0.000000e+00 : f32
    %24 = vector.broadcast %cst_22 : f32 to vector<40x32xf32>
    %25 = arith.subf %24, %23 : vector<40x32xf32>
    %26 = arith.truncf %12 : vector<64x32xf32> to vector<64x32xbf16>
    %cst_23 = arith.constant dense<0.000000e+00> : vector<40x32xf32>
    %27 = tpu.matmul %18, %26, %cst_23 {dimension_numbers = #tpu.dot_dimension_numbers<[1], [0], [0], [1], [0, 0, 1, 1], [], []>} : vector<40x64xbf16>, vector<64x32xbf16>, vector<40x32xf32> -> vector<40x32xf32>
    %28 = arith.truncf %12 : vector<64x32xf32> to vector<64x32xbf16>
    %cst_24 = arith.constant dense<0.000000e+00> : vector<40x32xf32>
    %29 = tpu.matmul %19, %28, %cst_24 {dimension_numbers = #tpu.dot_dimension_numbers<[1], [0], [0], [1], [0, 0, 1, 1], [], []>} : vector<40x64xbf16>, vector<64x32xbf16>, vector<40x32xf32> -> vector<40x32xf32>
    %cst_25 = arith.constant 0.000000e+00 : f32
    %30 = vector.broadcast %cst_25 : f32 to vector<40x32xf32>
    %31 = arith.subf %30, %29 : vector<40x32xf32>
    %32 = arith.truncf %17 : vector<64x32xf32> to vector<64x32xbf16>
    %cst_26 = arith.constant dense<0.000000e+00> : vector<40x32xf32>
    %33 = tpu.matmul %18, %32, %cst_26 {dimension_numbers = #tpu.dot_dimension_numbers<[1], [0], [0], [1], [0, 0, 1, 1], [], []>} : vector<40x64xbf16>, vector<64x32xbf16>, vector<40x32xf32> -> vector<40x32xf32>
    %34 = arith.truncf %17 : vector<64x32xf32> to vector<64x32xbf16>
    %cst_27 = arith.constant dense<0.000000e+00> : vector<40x32xf32>
    %35 = tpu.matmul %19, %34, %cst_27 {dimension_numbers = #tpu.dot_dimension_numbers<[1], [0], [0], [1], [0, 0, 1, 1], [], []>} : vector<40x64xbf16>, vector<64x32xbf16>, vector<40x32xf32> -> vector<40x32xf32>
    %cst_28 = arith.constant 0.000000e+00 : f32
    %36 = vector.broadcast %cst_28 : f32 to vector<40x32xf32>
    %37 = arith.subf %36, %35 : vector<40x32xf32>
    %38 = arith.mulf %21, %27 : vector<40x32xf32>
    %39 = arith.mulf %25, %31 : vector<40x32xf32>
    %40 = arith.addf %38, %39 : vector<40x32xf32>
    %41 = arith.mulf %25, %27 : vector<40x32xf32>
    %42 = arith.mulf %21, %31 : vector<40x32xf32>
    %43 = arith.subf %41, %42 : vector<40x32xf32>
    %c0_29 = arith.constant 0 : index
    %c0_30 = arith.constant 0 : index
    %44 = vector.load %arg5[%c0_29, %c0_30] : memref<64x40xbf16, #tpu.memory_space<vmem>>, vector<64x40xbf16>
    %c0_31 = arith.constant 0 : index
    %c0_32 = arith.constant 0 : index
    %45 = vector.load %arg6[%c0_31, %c0_32] : memref<64x40xbf16, #tpu.memory_space<vmem>>, vector<64x40xbf16>
    %46 = arith.truncf %40 : vector<40x32xf32> to vector<40x32xbf16>
    %cst_33 = arith.constant dense<0.000000e+00> : vector<64x32xf32>
    %47 = tpu.matmul %44, %46, %cst_33 {dimension_numbers = #tpu.dot_dimension_numbers<[1], [0], [0], [1], [0, 0, 1, 1], [], []>} : vector<64x40xbf16>, vector<40x32xbf16>, vector<64x32xf32> -> vector<64x32xf32>
    %48 = arith.truncf %43 : vector<40x32xf32> to vector<40x32xbf16>
    %cst_34 = arith.constant dense<0.000000e+00> : vector<64x32xf32>
    %49 = tpu.matmul %45, %48, %cst_34 {dimension_numbers = #tpu.dot_dimension_numbers<[1], [0], [0], [1], [0, 0, 1, 1], [], []>} : vector<64x40xbf16>, vector<40x32xbf16>, vector<64x32xf32> -> vector<64x32xf32>
    %50 = arith.subf %47, %49 : vector<64x32xf32>
    %cst_35 = arith.constant dense<0.000000e+00> : vector<64xf32>
    %51 = vector.multi_reduction <add>, %50, %cst_35 [1] : vector<64x32xf32> to vector<64xf32>
    %52 = vector.shape_cast %51 : vector<64xf32> to vector<64x1xf32>
    %cst_36 = arith.constant 3.200000e+01 : f32
    %53 = vector.broadcast %cst_36 : f32 to vector<64x1xf32>
    %54 = arith.divf %52, %53 : vector<64x1xf32>
    %55 = tpu.iota {dimensions = array<i32: 0>} : vector<64x64xi32>
    %56 = tpu.iota {dimensions = array<i32: 1>} : vector<64x64xi32>
    %57 = vector.shape_cast %54 : vector<64x1xf32> to vector<64x1xf32>
    %58 = vector.broadcast %57 : vector<64x1xf32> to vector<64x64xf32>
    %cst_37 = arith.constant 1.000000e+00 : f32
    %59 = vector.broadcast %cst_37 : f32 to vector<64x64xf32>
    %60 = arith.cmpi eq, %55, %56 : vector<64x64xi32>
    %cst_38 = arith.constant 0.000000e+00 : f32
    %61 = vector.broadcast %cst_38 : f32 to vector<64x64xf32>
    %62 = arith.select %60, %58, %61 : vector<64x64xi1>, vector<64x64xf32>
    %cst_39 = arith.constant dense<0.000000e+00> : vector<64x64xf32>
    %63 = tpu.matmul %59, %62, %cst_39 {dimension_numbers = #tpu.dot_dimension_numbers<[1], [0], [0], [1], [0, 0, 1, 1], [], []>} : vector<64x64xf32>, vector<64x64xf32>, vector<64x64xf32> -> vector<64x64xf32>
    %64 = arith.cmpi eq, %55, %56 : vector<64x64xi32>
    %65 = arith.cmpf ogt, %63, %58 : vector<64x64xf32>
    %66 = arith.extui %65 : vector<64x64xi1> to vector<64x64xi32>
    %67 = arith.sitofp %66 : vector<64x64xi32> to vector<64x64xf32>
    %cst_40 = arith.constant 0.000000e+00 : f32
    %68 = vector.broadcast %cst_40 : f32 to vector<64x64xf32>
    %69 = arith.select %64, %68, %67 : vector<64x64xi1>, vector<64x64xf32>
    %cst_41 = arith.constant dense<0.000000e+00> : vector<64xf32>
    %70 = vector.multi_reduction <add>, %69, %cst_41 [1] : vector<64x64xf32> to vector<64xf32>
    %71 = vector.shape_cast %70 : vector<64xf32> to vector<64x1xf32>
    %cst_42 = arith.constant 4.100000e+01 : f32
    %72 = vector.broadcast %cst_42 : f32 to vector<64x1xf32>
    %73 = arith.cmpf olt, %71, %72 : vector<64x1xf32>
    %cst_43 = arith.constant dense<0xFF800000> : vector<64xf32>
    %74 = vector.multi_reduction <maximumf>, %63, %cst_43 [1] : vector<64x64xf32> to vector<64xf32>
    %75 = vector.shape_cast %74 : vector<64xf32> to vector<64x1xf32>
    %76 = arith.subf %54, %75 : vector<64x1xf32>
    %77 = math.exp %76 : vector<64x1xf32>
    %cst_44 = arith.constant 0.000000e+00 : f32
    %78 = vector.broadcast %cst_44 : f32 to vector<64x1xf32>
    %79 = arith.select %73, %77, %78 : vector<64x1xi1>, vector<64x1xf32>
    %cst_45 = arith.constant dense<0.000000e+00> : vector<64x1xf32>
    %80 = tpu.matmul %59, %79, %cst_45 {dimension_numbers = #tpu.dot_dimension_numbers<[1], [0], [0], [1], [0, 0, 1, 1], [], []>} : vector<64x64xf32>, vector<64x1xf32>, vector<64x1xf32> -> vector<64x1xf32>
    %81 = arith.divf %79, %80 : vector<64x1xf32>
    %82 = arith.truncf %81 : vector<64x1xf32> to vector<64x1xbf16>
    %cst_46 = arith.constant dense<0.000000e+00> : vector<40x1xf32>
    %83 = tpu.matmul %18, %82, %cst_46 {dimension_numbers = #tpu.dot_dimension_numbers<[1], [0], [0], [1], [0, 0, 1, 1], [], []>} : vector<40x64xbf16>, vector<64x1xbf16>, vector<40x1xf32> -> vector<40x1xf32>
    %84 = arith.truncf %81 : vector<64x1xf32> to vector<64x1xbf16>
    %cst_47 = arith.constant dense<0.000000e+00> : vector<40x1xf32>
    %85 = tpu.matmul %19, %84, %cst_47 {dimension_numbers = #tpu.dot_dimension_numbers<[1], [0], [0], [1], [0, 0, 1, 1], [], []>} : vector<40x64xbf16>, vector<64x1xbf16>, vector<40x1xf32> -> vector<40x1xf32>
    %cst_48 = arith.constant 0.000000e+00 : f32
    %86 = vector.broadcast %cst_48 : f32 to vector<40x1xf32>
    %87 = arith.subf %86, %85 : vector<40x1xf32>
    %88 = vector.broadcast %83 : vector<40x1xf32> to vector<40x32xf32>
    %89 = arith.mulf %88, %33 : vector<40x32xf32>
    %90 = vector.broadcast %87 : vector<40x1xf32> to vector<40x32xf32>
    %91 = arith.mulf %90, %37 : vector<40x32xf32>
    %92 = arith.addf %89, %91 : vector<40x32xf32>
    %93 = vector.broadcast %83 : vector<40x1xf32> to vector<40x32xf32>
    %94 = arith.mulf %93, %37 : vector<40x32xf32>
    %95 = vector.broadcast %87 : vector<40x1xf32> to vector<40x32xf32>
    %96 = arith.mulf %95, %33 : vector<40x32xf32>
    %97 = arith.subf %94, %96 : vector<40x32xf32>
    %c0_49 = arith.constant 0 : index
    %c0_50 = arith.constant 0 : index
    %98 = vector.load %arg7[%c0_49, %c0_50] : memref<64x40xbf16, #tpu.memory_space<vmem>>, vector<64x40xbf16>
    %99 = arith.truncf %92 : vector<40x32xf32> to vector<40x32xbf16>
    %cst_51 = arith.constant dense<0.000000e+00> : vector<64x32xf32>
    %100 = tpu.matmul %98, %99, %cst_51 {dimension_numbers = #tpu.dot_dimension_numbers<[1], [0], [0], [1], [0, 0, 1, 1], [], []>} : vector<64x40xbf16>, vector<40x32xbf16>, vector<64x32xf32> -> vector<64x32xf32>
    %c0_52 = arith.constant 0 : index
    %c0_53 = arith.constant 0 : index
    %101 = vector.load %arg8[%c0_52, %c0_53] : memref<64x40xbf16, #tpu.memory_space<vmem>>, vector<64x40xbf16>
    %102 = arith.truncf %97 : vector<40x32xf32> to vector<40x32xbf16>
    %cst_54 = arith.constant dense<0.000000e+00> : vector<64x32xf32>
    %103 = tpu.matmul %101, %102, %cst_54 {dimension_numbers = #tpu.dot_dimension_numbers<[1], [0], [0], [1], [0, 0, 1, 1], [], []>} : vector<64x40xbf16>, vector<40x32xbf16>, vector<64x32xf32> -> vector<64x32xf32>
    %104 = arith.subf %100, %103 : vector<64x32xf32>
    %105 = arith.truncf %21 : vector<40x32xf32> to vector<40x32xbf16>
    %cst_55 = arith.constant dense<0.000000e+00> : vector<64x32xf32>
    %106 = tpu.matmul %44, %105, %cst_55 {dimension_numbers = #tpu.dot_dimension_numbers<[1], [0], [0], [1], [0, 0, 1, 1], [], []>} : vector<64x40xbf16>, vector<40x32xbf16>, vector<64x32xf32> -> vector<64x32xf32>
    %107 = arith.truncf %25 : vector<40x32xf32> to vector<40x32xbf16>
    %cst_56 = arith.constant dense<0.000000e+00> : vector<64x32xf32>
    %108 = tpu.matmul %45, %107, %cst_56 {dimension_numbers = #tpu.dot_dimension_numbers<[1], [0], [0], [1], [0, 0, 1, 1], [], []>} : vector<64x40xbf16>, vector<40x32xbf16>, vector<64x32xf32> -> vector<64x32xf32>
    %109 = arith.subf %106, %108 : vector<64x32xf32>
    %110 = arith.truncf %27 : vector<40x32xf32> to vector<40x32xbf16>
    %cst_57 = arith.constant dense<0.000000e+00> : vector<64x32xf32>
    %111 = tpu.matmul %44, %110, %cst_57 {dimension_numbers = #tpu.dot_dimension_numbers<[1], [0], [0], [1], [0, 0, 1, 1], [], []>} : vector<64x40xbf16>, vector<40x32xbf16>, vector<64x32xf32> -> vector<64x32xf32>
    %112 = arith.truncf %31 : vector<40x32xf32> to vector<40x32xbf16>
    %cst_58 = arith.constant dense<0.000000e+00> : vector<64x32xf32>
    %113 = tpu.matmul %45, %112, %cst_58 {dimension_numbers = #tpu.dot_dimension_numbers<[1], [0], [0], [1], [0, 0, 1, 1], [], []>} : vector<64x40xbf16>, vector<40x32xbf16>, vector<64x32xf32> -> vector<64x32xf32>
    %114 = arith.subf %111, %113 : vector<64x32xf32>
    %115 = arith.truncf %33 : vector<40x32xf32> to vector<40x32xbf16>
    %cst_59 = arith.constant dense<0.000000e+00> : vector<64x32xf32>
    %116 = tpu.matmul %44, %115, %cst_59 {dimension_numbers = #tpu.dot_dimension_numbers<[1], [0], [0], [1], [0, 0, 1, 1], [], []>} : vector<64x40xbf16>, vector<40x32xbf16>, vector<64x32xf32> -> vector<64x32xf32>
    %117 = arith.truncf %37 : vector<40x32xf32> to vector<40x32xbf16>
    %cst_60 = arith.constant dense<0.000000e+00> : vector<64x32xf32>
    %118 = tpu.matmul %45, %117, %cst_60 {dimension_numbers = #tpu.dot_dimension_numbers<[1], [0], [0], [1], [0, 0, 1, 1], [], []>} : vector<64x40xbf16>, vector<40x32xbf16>, vector<64x32xf32> -> vector<64x32xf32>
    %119 = arith.subf %116, %118 : vector<64x32xf32>
    %120 = vector.extract_strided_slice %109 {offsets = [0, 0], sizes = [64, 16], strides = [1, 1]} : vector<64x32xf32> to vector<64x16xf32>
    %121 = vector.extract_strided_slice %109 {offsets = [0, 16], sizes = [64, 16], strides = [1, 1]} : vector<64x32xf32> to vector<64x16xf32>
    %122 = tpu.concatenate %120, %121 in 0 : vector<64x16xf32>, vector<64x16xf32> -> vector<128x16xf32>
    %123 = arith.truncf %122 : vector<128x16xf32> to vector<128x16xbf16>
    %124 = vector.extract_strided_slice %114 {offsets = [0, 0], sizes = [64, 16], strides = [1, 1]} : vector<64x32xf32> to vector<64x16xf32>
    %125 = vector.extract_strided_slice %114 {offsets = [0, 16], sizes = [64, 16], strides = [1, 1]} : vector<64x32xf32> to vector<64x16xf32>
    %126 = tpu.concatenate %124, %125 in 0 : vector<64x16xf32>, vector<64x16xf32> -> vector<128x16xf32>
    %127 = arith.truncf %126 : vector<128x16xf32> to vector<128x16xbf16>
    %128 = vector.extract_strided_slice %119 {offsets = [0, 0], sizes = [64, 16], strides = [1, 1]} : vector<64x32xf32> to vector<64x16xf32>
    %129 = vector.extract_strided_slice %119 {offsets = [0, 16], sizes = [64, 16], strides = [1, 1]} : vector<64x32xf32> to vector<64x16xf32>
    %130 = tpu.concatenate %128, %129 in 0 : vector<64x16xf32>, vector<64x16xf32> -> vector<128x16xf32>
    %131 = arith.truncf %130 : vector<128x16xf32> to vector<128x16xbf16>
    %c0_61 = arith.constant 0 : index
    %c0_62 = arith.constant 0 : index
    %c0_63 = arith.constant 0 : index
    %132 = vector.load %arg2[%c0_61, %c0_62, %c0_63] : memref<1x64x64xf32, #tpu.memory_space<vmem>>, vector<1x64x64xf32>
    %133 = vector.shape_cast %132 : vector<1x64x64xf32> to vector<64x64xf32>
    %cst_64 = arith.constant -1.000000e+09 : f32
    %134 = vector.broadcast %cst_64 : f32 to vector<64x64xf32>
    %135 = tpu.concatenate %133, %134 in 1 : vector<64x64xf32>, vector<64x64xf32> -> vector<64x128xf32>
    %136 = tpu.concatenate %134, %133 in 1 : vector<64x64xf32>, vector<64x64xf32> -> vector<64x128xf32>
    %137 = tpu.concatenate %135, %136 in 0 : vector<64x128xf32>, vector<64x128xf32> -> vector<128x128xf32>
    %cst_65 = arith.constant dense<0.000000e+00> : vector<128x128xf32>
    %138 = tpu.matmul %123, %127, %cst_65 {dimension_numbers = #tpu.dot_dimension_numbers<[1], [1], [0], [0], [0, 0, 1, 0], [], []>} : vector<128x16xbf16>, vector<128x16xbf16>, vector<128x128xf32> -> vector<128x128xf32>
    %cst_66 = arith.constant 2.500000e-01 : f32
    %139 = vector.broadcast %cst_66 : f32 to vector<128x128xf32>
    %140 = arith.mulf %138, %139 : vector<128x128xf32>
    %141 = arith.addf %140, %137 : vector<128x128xf32>
    %cst_67 = arith.constant dense<0xFF800000> : vector<128xf32>
    %142 = vector.multi_reduction <maximumf>, %141, %cst_67 [1] : vector<128x128xf32> to vector<128xf32>
    %143 = vector.shape_cast %142 : vector<128xf32> to vector<128x1xf32>
    %144 = vector.broadcast %143 : vector<128x1xf32> to vector<128x128xf32>
    %145 = arith.subf %141, %144 : vector<128x128xf32>
    %146 = math.exp %145 : vector<128x128xf32>
    %cst_68 = arith.constant dense<0.000000e+00> : vector<128xf32>
    %147 = vector.multi_reduction <add>, %146, %cst_68 [1] : vector<128x128xf32> to vector<128xf32>
    %148 = vector.shape_cast %147 : vector<128xf32> to vector<128x1xf32>
    %149 = tpu.reciprocal %148 {approx = true} : vector<128x1xf32> -> vector<128x1xf32>
    %150 = vector.broadcast %149 : vector<128x1xf32> to vector<128x128xf32>
    %151 = arith.mulf %146, %150 : vector<128x128xf32>
    %152 = arith.truncf %151 : vector<128x128xf32> to vector<128x128xbf16>
    %cst_69 = arith.constant dense<0.000000e+00> : vector<128x16xf32>
    %153 = tpu.matmul %152, %131, %cst_69 {dimension_numbers = #tpu.dot_dimension_numbers<[1], [0], [0], [1], [0, 0, 1, 1], [], []>} : vector<128x128xbf16>, vector<128x16xbf16>, vector<128x16xf32> -> vector<128x16xf32>
    %c0_70 = arith.constant 0 : index
    %c0_71 = arith.constant 0 : index
    %154 = vector.load %arg15[%c0_70, %c0_71] : memref<32x32xbf16, #tpu.memory_space<vmem>>, vector<32x32xbf16>
    %155 = arith.truncf %104 : vector<64x32xf32> to vector<64x32xbf16>
    %cst_72 = arith.constant dense<0.000000e+00> : vector<64x32xf32>
    %156 = tpu.matmul %155, %154, %cst_72 {dimension_numbers = #tpu.dot_dimension_numbers<[1], [0], [0], [1], [0, 0, 1, 1], [], []>} : vector<64x32xbf16>, vector<32x32xbf16>, vector<64x32xf32> -> vector<64x32xf32>
    %cst_73 = arith.constant 5.000000e-01 : f32
    %157 = vector.broadcast %cst_73 : f32 to vector<64x32xf32>
    %158 = arith.mulf %157, %156 : vector<64x32xf32>
    %159 = vector.extract_strided_slice %153 {offsets = [0, 0], sizes = [64, 16], strides = [1, 1]} : vector<128x16xf32> to vector<64x16xf32>
    %160 = arith.truncf %159 : vector<64x16xf32> to vector<64x16xbf16>
    %161 = vector.extract_strided_slice %154 {offsets = [0, 0], sizes = [16, 32], strides = [1, 1]} : vector<32x32xbf16> to vector<16x32xbf16>
    %cst_74 = arith.constant dense<0.000000e+00> : vector<64x32xf32>
    %162 = tpu.matmul %160, %161, %cst_74 {dimension_numbers = #tpu.dot_dimension_numbers<[1], [0], [0], [1], [0, 0, 1, 1], [], []>} : vector<64x16xbf16>, vector<16x32xbf16>, vector<64x32xf32> -> vector<64x32xf32>
    %cst_75 = arith.constant 5.000000e-01 : f32
    %163 = vector.broadcast %cst_75 : f32 to vector<64x32xf32>
    %164 = arith.mulf %163, %162 : vector<64x32xf32>
    %165 = arith.addf %158, %164 : vector<64x32xf32>
    %166 = vector.extract_strided_slice %153 {offsets = [64, 0], sizes = [64, 16], strides = [1, 1]} : vector<128x16xf32> to vector<64x16xf32>
    %167 = arith.truncf %166 : vector<64x16xf32> to vector<64x16xbf16>
    %168 = vector.extract_strided_slice %154 {offsets = [16, 0], sizes = [16, 32], strides = [1, 1]} : vector<32x32xbf16> to vector<16x32xbf16>
    %cst_76 = arith.constant dense<0.000000e+00> : vector<64x32xf32>
    %169 = tpu.matmul %167, %168, %cst_76 {dimension_numbers = #tpu.dot_dimension_numbers<[1], [0], [0], [1], [0, 0, 1, 1], [], []>} : vector<64x16xbf16>, vector<16x32xbf16>, vector<64x32xf32> -> vector<64x32xf32>
    %cst_77 = arith.constant 5.000000e-01 : f32
    %170 = vector.broadcast %cst_77 : f32 to vector<64x32xf32>
    %171 = arith.mulf %170, %169 : vector<64x32xf32>
    %172 = arith.addf %165, %171 : vector<64x32xf32>
    %c0_78 = arith.constant 0 : index
    %c0_79 = arith.constant 0 : index
    %173 = vector.load %arg16[%c0_78, %c0_79] : memref<1x32xf32, #tpu.memory_space<vmem>>, vector<1x32xf32>
    %174 = vector.broadcast %173 : vector<1x32xf32> to vector<64x32xf32>
    %175 = arith.addf %172, %174 : vector<64x32xf32>
    %176 = arith.addf %175, %1 : vector<64x32xf32>
    %c0_80 = arith.constant 0 : index
    %c0_81 = arith.constant 0 : index
    %177 = vector.load %arg17[%c0_80, %c0_81] : memref<1x32xf32, #tpu.memory_space<vmem>>, vector<1x32xf32>
    %c0_82 = arith.constant 0 : index
    %c0_83 = arith.constant 0 : index
    %178 = vector.load %arg18[%c0_82, %c0_83] : memref<1x32xf32, #tpu.memory_space<vmem>>, vector<1x32xf32>
    %cst_84 = arith.constant dense<0.000000e+00> : vector<64xf32>
    %179 = vector.multi_reduction <add>, %176, %cst_84 [1] : vector<64x32xf32> to vector<64xf32>
    %180 = vector.shape_cast %179 : vector<64xf32> to vector<64x1xf32>
    %cst_85 = arith.constant 3.200000e+01 : f32
    %181 = vector.broadcast %cst_85 : f32 to vector<64x1xf32>
    %182 = arith.divf %180, %181 : vector<64x1xf32>
    %183 = vector.broadcast %182 : vector<64x1xf32> to vector<64x32xf32>
    %184 = arith.subf %176, %183 : vector<64x32xf32>
    %185 = arith.mulf %184, %184 : vector<64x32xf32>
    %cst_86 = arith.constant dense<0.000000e+00> : vector<64xf32>
    %186 = vector.multi_reduction <add>, %185, %cst_86 [1] : vector<64x32xf32> to vector<64xf32>
    %187 = vector.shape_cast %186 : vector<64xf32> to vector<64x1xf32>
    %cst_87 = arith.constant 3.200000e+01 : f32
    %188 = vector.broadcast %cst_87 : f32 to vector<64x1xf32>
    %189 = arith.divf %187, %188 : vector<64x1xf32>
    %cst_88 = arith.constant 9.99999996E-13 : f32
    %190 = vector.broadcast %cst_88 : f32 to vector<64x1xf32>
    %191 = arith.addf %189, %190 : vector<64x1xf32>
    %192 = math.rsqrt %191 : vector<64x1xf32>
    %193 = vector.broadcast %192 : vector<64x1xf32> to vector<64x32xf32>
    %194 = arith.mulf %184, %193 : vector<64x32xf32>
    %195 = vector.broadcast %177 : vector<1x32xf32> to vector<64x32xf32>
    %196 = arith.mulf %195, %194 : vector<64x32xf32>
    %197 = vector.broadcast %178 : vector<1x32xf32> to vector<64x32xf32>
    %198 = arith.addf %196, %197 : vector<64x32xf32>
    %199 = arith.truncf %198 : vector<64x32xf32> to vector<64x32xbf16>
    %c0_89 = arith.constant 0 : index
    %c0_90 = arith.constant 0 : index
    %200 = vector.load %arg19[%c0_89, %c0_90] : memref<32x128xbf16, #tpu.memory_space<vmem>>, vector<32x128xbf16>
    %cst_91 = arith.constant dense<0.000000e+00> : vector<64x128xf32>
    %201 = tpu.matmul %199, %200, %cst_91 {dimension_numbers = #tpu.dot_dimension_numbers<[1], [0], [0], [1], [0, 0, 1, 1], [], []>} : vector<64x32xbf16>, vector<32x128xbf16>, vector<64x128xf32> -> vector<64x128xf32>
    %c0_92 = arith.constant 0 : index
    %c0_93 = arith.constant 0 : index
    %202 = vector.load %arg20[%c0_92, %c0_93] : memref<1x128xf32, #tpu.memory_space<vmem>>, vector<1x128xf32>
    %203 = vector.broadcast %202 : vector<1x128xf32> to vector<64x128xf32>
    %204 = arith.addf %201, %203 : vector<64x128xf32>
    %cst_94 = arith.constant 5.000000e-01 : f32
    %205 = vector.broadcast %cst_94 : f32 to vector<64x128xf32>
    %206 = arith.mulf %204, %205 : vector<64x128xf32>
    %cst_95 = arith.constant 0.707106769 : f32
    %207 = vector.broadcast %cst_95 : f32 to vector<64x128xf32>
    %208 = arith.mulf %204, %207 : vector<64x128xf32>
    %209 = math.absf %208 : vector<64x128xf32>
    %cst_96 = arith.constant 0.327591091 : f32
    %210 = vector.broadcast %cst_96 : f32 to vector<64x128xf32>
    %211 = arith.mulf %210, %209 : vector<64x128xf32>
    %cst_97 = arith.constant 1.000000e+00 : f32
    %212 = vector.broadcast %cst_97 : f32 to vector<64x128xf32>
    %213 = arith.addf %212, %211 : vector<64x128xf32>
    %cst_98 = arith.constant 1.000000e+00 : f32
    %214 = vector.broadcast %cst_98 : f32 to vector<64x128xf32>
    %215 = arith.divf %214, %213 : vector<64x128xf32>
    %cst_99 = arith.constant 1.06140542 : f32
    %216 = vector.broadcast %cst_99 : f32 to vector<64x128xf32>
    %217 = arith.mulf %215, %216 : vector<64x128xf32>
    %cst_100 = arith.constant -1.45315206 : f32
    %218 = vector.broadcast %cst_100 : f32 to vector<64x128xf32>
    %219 = arith.addf %218, %217 : vector<64x128xf32>
    %220 = arith.mulf %215, %219 : vector<64x128xf32>
    %cst_101 = arith.constant 1.42141378 : f32
    %221 = vector.broadcast %cst_101 : f32 to vector<64x128xf32>
    %222 = arith.addf %221, %220 : vector<64x128xf32>
    %223 = arith.mulf %215, %222 : vector<64x128xf32>
    %cst_102 = arith.constant -0.284496725 : f32
    %224 = vector.broadcast %cst_102 : f32 to vector<64x128xf32>
    %225 = arith.addf %224, %223 : vector<64x128xf32>
    %226 = arith.mulf %215, %225 : vector<64x128xf32>
    %cst_103 = arith.constant 0.254829586 : f32
    %227 = vector.broadcast %cst_103 : f32 to vector<64x128xf32>
    %228 = arith.addf %227, %226 : vector<64x128xf32>
    %229 = arith.mulf %215, %228 : vector<64x128xf32>
    %cst_104 = arith.constant 0.000000e+00 : f32
    %230 = vector.broadcast %cst_104 : f32 to vector<64x128xf32>
    %231 = arith.subf %230, %209 : vector<64x128xf32>
    %232 = arith.mulf %231, %209 : vector<64x128xf32>
    %233 = math.exp %232 : vector<64x128xf32>
    %234 = arith.mulf %229, %233 : vector<64x128xf32>
    %cst_105 = arith.constant 1.000000e+00 : f32
    %235 = vector.broadcast %cst_105 : f32 to vector<64x128xf32>
    %236 = arith.subf %235, %234 : vector<64x128xf32>
    %cst_106 = arith.constant 0.000000e+00 : f32
    %237 = vector.broadcast %cst_106 : f32 to vector<64x128xf32>
    %238 = arith.cmpf oge, %208, %237 : vector<64x128xf32>
    %cst_107 = arith.constant 0.000000e+00 : f32
    %239 = vector.broadcast %cst_107 : f32 to vector<64x128xf32>
    %240 = arith.subf %239, %236 : vector<64x128xf32>
    %241 = arith.select %238, %236, %240 : vector<64x128xi1>, vector<64x128xf32>
    %cst_108 = arith.constant 1.000000e+00 : f32
    %242 = vector.broadcast %cst_108 : f32 to vector<64x128xf32>
    %243 = arith.addf %242, %241 : vector<64x128xf32>
    %244 = arith.mulf %206, %243 : vector<64x128xf32>
    %245 = arith.truncf %244 : vector<64x128xf32> to vector<64x128xbf16>
    %c0_109 = arith.constant 0 : index
    %c0_110 = arith.constant 0 : index
    %246 = vector.load %arg21[%c0_109, %c0_110] : memref<128x32xbf16, #tpu.memory_space<vmem>>, vector<128x32xbf16>
    %cst_111 = arith.constant dense<0.000000e+00> : vector<64x32xf32>
    %247 = tpu.matmul %245, %246, %cst_111 {dimension_numbers = #tpu.dot_dimension_numbers<[1], [0], [0], [1], [0, 0, 1, 1], [], []>} : vector<64x128xbf16>, vector<128x32xbf16>, vector<64x32xf32> -> vector<64x32xf32>
    %c0_112 = arith.constant 0 : index
    %c0_113 = arith.constant 0 : index
    %248 = vector.load %arg22[%c0_112, %c0_113] : memref<1x32xf32, #tpu.memory_space<vmem>>, vector<1x32xf32>
    %249 = vector.broadcast %248 : vector<1x32xf32> to vector<64x32xf32>
    %250 = arith.addf %247, %249 : vector<64x32xf32>
    %251 = arith.addf %250, %198 : vector<64x32xf32>
    %c0_114 = arith.constant 0 : index
    %c0_115 = arith.constant 0 : index
    %252 = vector.load %arg23[%c0_114, %c0_115] : memref<1x32xf32, #tpu.memory_space<vmem>>, vector<1x32xf32>
    %c0_116 = arith.constant 0 : index
    %c0_117 = arith.constant 0 : index
    %253 = vector.load %arg24[%c0_116, %c0_117] : memref<1x32xf32, #tpu.memory_space<vmem>>, vector<1x32xf32>
    %cst_118 = arith.constant dense<0.000000e+00> : vector<64xf32>
    %254 = vector.multi_reduction <add>, %251, %cst_118 [1] : vector<64x32xf32> to vector<64xf32>
    %255 = vector.shape_cast %254 : vector<64xf32> to vector<64x1xf32>
    %cst_119 = arith.constant 3.200000e+01 : f32
    %256 = vector.broadcast %cst_119 : f32 to vector<64x1xf32>
    %257 = arith.divf %255, %256 : vector<64x1xf32>
    %258 = vector.broadcast %257 : vector<64x1xf32> to vector<64x32xf32>
    %259 = arith.subf %251, %258 : vector<64x32xf32>
    %260 = arith.mulf %259, %259 : vector<64x32xf32>
    %cst_120 = arith.constant dense<0.000000e+00> : vector<64xf32>
    %261 = vector.multi_reduction <add>, %260, %cst_120 [1] : vector<64x32xf32> to vector<64xf32>
    %262 = vector.shape_cast %261 : vector<64xf32> to vector<64x1xf32>
    %cst_121 = arith.constant 3.200000e+01 : f32
    %263 = vector.broadcast %cst_121 : f32 to vector<64x1xf32>
    %264 = arith.divf %262, %263 : vector<64x1xf32>
    %cst_122 = arith.constant 9.99999996E-13 : f32
    %265 = vector.broadcast %cst_122 : f32 to vector<64x1xf32>
    %266 = arith.addf %264, %265 : vector<64x1xf32>
    %267 = math.rsqrt %266 : vector<64x1xf32>
    %268 = vector.broadcast %267 : vector<64x1xf32> to vector<64x32xf32>
    %269 = arith.mulf %259, %268 : vector<64x32xf32>
    %270 = vector.broadcast %252 : vector<1x32xf32> to vector<64x32xf32>
    %271 = arith.mulf %270, %269 : vector<64x32xf32>
    %272 = vector.broadcast %253 : vector<1x32xf32> to vector<64x32xf32>
    %273 = arith.addf %271, %272 : vector<64x32xf32>
    %c0_123 = arith.constant 0 : index
    %c0_124 = arith.constant 0 : index
    %c0_125 = arith.constant 0 : index
    %274 = vector.load %arg25[%c0_123, %c0_124, %c0_125] : memref<1x64x32xf32, #tpu.memory_space<vmem>>, vector<1x64x32xf32>
    %275 = vector.shape_cast %274 : vector<1x64x32xf32> to vector<64x32xf32>
    %276 = vector.shape_cast %273 : vector<64x32xf32> to vector<1x64x32xf32>
    tpu.vector_store %arg25[%c0_123, %c0_124, %c0_125], %276 {strides = array<i32>} : memref<1x64x32xf32, #tpu.memory_space<vmem>>, vector<1x64x32xf32>,
    return
  }
  func.func @transform_0(%arg0: i32) -> (i32, i32, i32) {
    %c0_i32 = arith.constant 0 : i32
    %c0_i32_0 = arith.constant 0 : i32
    %c0_i32_1 = arith.constant 0 : i32
    return %arg0, %c0_i32, %c0_i32_0 : i32, i32, i32
  }
  func.func @transform_1(%arg0: i32) -> (i32, i32, i32) {
    %c0_i32 = arith.constant 0 : i32
    %c0_i32_0 = arith.constant 0 : i32
    %c0_i32_1 = arith.constant 0 : i32
    return %arg0, %c0_i32, %c0_i32_0 : i32, i32, i32
  }
  func.func @transform_2(%arg0: i32) -> (i32, i32) {
    %c0_i32 = arith.constant 0 : i32
    %c0_i32_0 = arith.constant 0 : i32
    %c0_i32_1 = arith.constant 0 : i32
    return %c0_i32, %c0_i32_0 : i32, i32
  }
  func.func @transform_3(%arg0: i32) -> (i32, i32) {
    %c0_i32 = arith.constant 0 : i32
    %c0_i32_0 = arith.constant 0 : i32
    %c0_i32_1 = arith.constant 0 : i32
    return %c0_i32, %c0_i32_0 : i32, i32
  }
  func.func @transform_4(%arg0: i32) -> (i32, i32) {
    %c0_i32 = arith.constant 0 : i32
    %c0_i32_0 = arith.constant 0 : i32
    %c0_i32_1 = arith.constant 0 : i32
    return %c0_i32, %c0_i32_0 : i32, i32
  }
  func.func @transform_5(%arg0: i32) -> (i32, i32) {
    %c0_i32 = arith.constant 0 : i32
    %c0_i32_0 = arith.constant 0 : i32
    %c0_i32_1 = arith.constant 0 : i32
    return %c0_i32, %c0_i32_0 : i32, i32
  }
  func.func @transform_6(%arg0: i32) -> (i32, i32) {
    %c0_i32 = arith.constant 0 : i32
    %c0_i32_0 = arith.constant 0 : i32
    %c0_i32_1 = arith.constant 0 : i32
    return %c0_i32, %c0_i32_0 : i32, i32
  }
  func.func @transform_7(%arg0: i32) -> (i32, i32) {
    %c0_i32 = arith.constant 0 : i32
    %c0_i32_0 = arith.constant 0 : i32
    %c0_i32_1 = arith.constant 0 : i32
    return %c0_i32, %c0_i32_0 : i32, i32
  }
  func.func @transform_8(%arg0: i32) -> (i32, i32) {
    %c0_i32 = arith.constant 0 : i32
    %c0_i32_0 = arith.constant 0 : i32
    %c0_i32_1 = arith.constant 0 : i32
    return %c0_i32, %c0_i32_0 : i32, i32
  }
  func.func @transform_9(%arg0: i32) -> (i32, i32) {
    %c0_i32 = arith.constant 0 : i32
    %c0_i32_0 = arith.constant 0 : i32
    %c0_i32_1 = arith.constant 0 : i32
    return %c0_i32, %c0_i32_0 : i32, i32
  }
  func.func @transform_10(%arg0: i32) -> (i32, i32) {
    %c0_i32 = arith.constant 0 : i32
    %c0_i32_0 = arith.constant 0 : i32
    %c0_i32_1 = arith.constant 0 : i32
    return %c0_i32, %c0_i32_0 : i32, i32
  }
  func.func @transform_11(%arg0: i32) -> (i32, i32) {
    %c0_i32 = arith.constant 0 : i32
    %c0_i32_0 = arith.constant 0 : i32
    %c0_i32_1 = arith.constant 0 : i32
    return %c0_i32, %c0_i32_0 : i32, i32
  }
  func.func @transform_12(%arg0: i32) -> (i32, i32) {
    %c0_i32 = arith.constant 0 : i32
    %c0_i32_0 = arith.constant 0 : i32
    %c0_i32_1 = arith.constant 0 : i32
    return %c0_i32, %c0_i32_0 : i32, i32
  }
  func.func @transform_13(%arg0: i32) -> (i32, i32) {
    %c0_i32 = arith.constant 0 : i32
    %c0_i32_0 = arith.constant 0 : i32
    %c0_i32_1 = arith.constant 0 : i32
    return %c0_i32, %c0_i32_0 : i32, i32
  }
  func.func @transform_14(%arg0: i32) -> (i32, i32) {
    %c0_i32 = arith.constant 0 : i32
    %c0_i32_0 = arith.constant 0 : i32
    %c0_i32_1 = arith.constant 0 : i32
    return %c0_i32, %c0_i32_0 : i32, i32
  }
  func.func @transform_15(%arg0: i32) -> (i32, i32) {
    %c0_i32 = arith.constant 0 : i32
    %c0_i32_0 = arith.constant 0 : i32
    %c0_i32_1 = arith.constant 0 : i32
    return %c0_i32, %c0_i32_0 : i32, i32
  }
  func.func @transform_16(%arg0: i32) -> (i32, i32) {
    %c0_i32 = arith.constant 0 : i32
    %c0_i32_0 = arith.constant 0 : i32
    %c0_i32_1 = arith.constant 0 : i32
    return %c0_i32, %c0_i32_0 : i32, i32
  }
  func.func @transform_17(%arg0: i32) -> (i32, i32) {
    %c0_i32 = arith.constant 0 : i32
    %c0_i32_0 = arith.constant 0 : i32
    %c0_i32_1 = arith.constant 0 : i32
    return %c0_i32, %c0_i32_0 : i32, i32
  }
  func.func @transform_18(%arg0: i32) -> (i32, i32) {
    %c0_i32 = arith.constant 0 : i32
    %c0_i32_0 = arith.constant 0 : i32
    %c0_i32_1 = arith.constant 0 : i32
    return %c0_i32, %c0_i32_0 : i32, i32
  }
  func.func @transform_19(%arg0: i32) -> (i32, i32) {
    %c0_i32 = arith.constant 0 : i32
    %c0_i32_0 = arith.constant 0 : i32
    %c0_i32_1 = arith.constant 0 : i32
    return %c0_i32, %c0_i32_0 : i32, i32
  }
  func.func @transform_20(%arg0: i32) -> (i32, i32) {
    %c0_i32 = arith.constant 0 : i32
    %c0_i32_0 = arith.constant 0 : i32
    %c0_i32_1 = arith.constant 0 : i32
    return %c0_i32, %c0_i32_0 : i32, i32
  }
  func.func @transform_21(%arg0: i32) -> (i32, i32) {
    %c0_i32 = arith.constant 0 : i32
    %c0_i32_0 = arith.constant 0 : i32
    %c0_i32_1 = arith.constant 0 : i32
    return %c0_i32, %c0_i32_0 : i32, i32
  }
  func.func @transform_22(%arg0: i32) -> (i32, i32) {
    %c0_i32 = arith.constant 0 : i32
    %c0_i32_0 = arith.constant 0 : i32
    %c0_i32_1 = arith.constant 0 : i32
    return %c0_i32, %c0_i32_0 : i32, i32
  }
  func.func @transform_23(%arg0: i32) -> (i32, i32) {
    %c0_i32 = arith.constant 0 : i32
    %c0_i32_0 = arith.constant 0 : i32
    %c0_i32_1 = arith.constant 0 : i32
    return %c0_i32, %c0_i32_0 : i32, i32
  }
  func.func @transform_24(%arg0: i32) -> (i32, i32, i32) {
    %c0_i32 = arith.constant 0 : i32
    %c0_i32_0 = arith.constant 0 : i32
    %c0_i32_1 = arith.constant 0 : i32
    return %arg0, %c0_i32, %c0_i32_0 : i32, i32, i32
  }
}

</mosaic_0001>

<bundles_post_ra>
// kernel: fearec_block_forward.1
= control target key start
LH: loop header
LB: loop body
LE: loop exit
PB: predicated region body
PF: predicated region fallthrough
CT: control target
= control target key end

     0   :  { %s7614_s0 = inlined_call_operand.vmem [shape: f32[2,64,32], index: 0, kind: input, shape index: {}]   ;;  %s7615_s1 = inlined_call_operand.vmem [shape: f32[2,64,64], index: 1, kind: input, shape index: {}]   ;;  %s7616_s2 = inlined_call_operand.vmem [shape: bf16[40,64], index: 2, kind: input, shape index: {}]   ;;  %s7617_s3 = inlined_call_operand.vmem [shape: bf16[40,64], index: 3, kind: input, shape index: {}]   ;;  %s7618_s4 = inlined_call_operand.vmem [shape: bf16[64,40], index: 4, kind: input, shape index: {}]   ;;  %s7619_s5 = inlined_call_operand.vmem [shape: bf16[64,40], index: 5, kind: input, shape index: {}]   ;;  %s7620_s6 = inlined_call_operand.vmem [shape: bf16[64,40], index: 6, kind: input, shape index: {}]   ;;  %s7621_s7 = inlined_call_operand.vmem [shape: bf16[64,40], index: 7, kind: input, shape index: {}]   ;;  %s7622_s8 = inlined_call_operand.vmem [shape: bf16[32,32], index: 8, kind: input, shape index: {}]   ;;  %s7623_s9 = inlined_call_operand.vmem [shape: bf16[32,32], index: 9, kind: input, shape index: {}]   ;;  %s7624_s10 = inlined_call_operand.vmem [shape: bf16[32,32], index: 10, kind: input, shape index: {}]   ;;  %s7625_s11 = inlined_call_operand.vmem [shape: f32[1,32], index: 11, kind: input, shape index: {}]   ;;  %s7626_s12 = inlined_call_operand.vmem [shape: f32[1,32], index: 12, kind: input, shape index: {}]   ;;  %s7627_s13 = inlined_call_operand.vmem [shape: f32[1,32], index: 13, kind: input, shape index: {}]   ;;  %s7628_s14 = inlined_call_operand.vmem [shape: bf16[32,32], index: 14, kind: input, shape index: {}]   ;;  %s7629_s15 = inlined_call_operand.vmem [shape: f32[1,32], index: 15, kind: input, shape index: {}]   ;;  %s7630_s16 = inlined_call_operand.vmem [shape: f32[1,32], index: 16, kind: input, shape index: {}]   ;;  %s7631_s17 = inlined_call_operand.vmem [shape: f32[1,32], index: 17, kind: input, shape index: {}]   ;;  %s7632_s18 = inlined_call_operand.vmem [shape: bf16[32,128], index: 18, kind: input, shape index: {}]   ;;  %s7633_s19 = inlined_call_operand.vmem [shape: f32[1,128], index: 19, kind: input, shape index: {}]   ;;  %s7634_s20 = inlined_call_operand.vmem [shape: bf16[128,32], index: 20, kind: input, shape index: {}]   ;;  %s7635_s21 = inlined_call_operand.vmem [shape: f32[1,32], index: 21, kind: input, shape index: {}]   ;;  %s7636_s22 = inlined_call_operand.vmem [shape: f32[1,32], index: 22, kind: input, shape index: {}]   ;;  %s7637_s23 = inlined_call_operand.vmem [shape: f32[1,32], index: 23, kind: input, shape index: {}]   ;;  %s7638_s24 = inlined_call_operand.vmem [shape: f32[2,64,32], index: 24, kind: output, shape index: {}]  }
   0x1   :  { %7649 = sst [smem:[#allocation2_spill]] %s7614_s0 }
   0x2   :  { %7650 = sst [smem:[#allocation3_spill]] %s7615_s1 }
   0x3   :  { %7651 = sst [smem:[#allocation4_spill]] %s7616_s2 }
   0x4   :  { %7652 = sst [smem:[#allocation5_spill]] %s7617_s3 }
   0x5   :  { %7653 = sst [smem:[#allocation6_spill]] %s7618_s4 }
   0x6   :  { %7654 = sst [smem:[#allocation7_spill]] %s7619_s5  ;;  %s6229_s5 = smov 0  }
   0x7   :  { %7655 = sst [smem:[#allocation8_spill]] %s7620_s6 }
   0x8   :  { %7656 = sst [smem:[#allocation9_spill]] %s7621_s7 }
   0x9   :  { %7657 = sst [smem:[#allocation10_spill]] %s7622_s8 }
   0xa   :  { %7658 = sst [smem:[#allocation11_spill]] %s7623_s9 }
   0xb LB: > { %s4754_s26 = sadd.s32 4294967295, %s6096_s5   ;;  %p4758_p0 = scmp.ge.s32.totalorder %s6096_s5, 1  ;;  %s6096_s5 = sphi %s6229_s5, %s34_s5  }
   0xc   : > { %p672_p1 = scmp.lt.s32.totalorder %s6096_s5, 3 }
   0xe   : > { %p673_p2 = pnand %p4758_p0, %p672_p1 }
   0xf   : > { %s7659_s6 = sld [smem:[#allocation10_spill]] (!%p673_p2)  ;;  %p743_p3 = scmp.lt.s32.totalorder (!%p673_p2), %s4754_s26, 1  ;;  %v5872_v4 = vld [vmem:[%s7624_s10] sm:$0xff] (!%p673_p2)   ;;  %vm7647_vm0 = vcmask (!%p673_p2), 261120   ;;  %v5873_v14 = vld [vmem:[%s7624_s10 + $0x8] sm:$0xff] (!%p673_p2)   ;;  %v6098_v18 = vmov (!%p673_p2), 0.0  }
  0x10   : > { %676 = sbr.rel (%p673_p2) target bundleno = 4505 (0x1199), region = 116  ;;  %s7660_s9 = sld [smem:[#allocation11_spill]] (!%p673_p2)  ;;  %vm6099_vm1 = vmmov (!%p673_p2), 0   ;;  %v4765_v20 = vld [vmem:[%s7625_s11] ss:$0 sm:$0xff] (!%p673_p2)  ;;  %vm1075_vm2 = vcmask (!%p673_p2), 523264  }
  0x11   : > { %s7661_s28 = sld [smem:[#allocation2_spill]] (!%p673_p2)  ;;  %v4772_v22 = vld [vmem:[%s7626_s12] ss:$0 sm:$0xff] (!%p673_p2)  ;;  %s7663_s0 = sld [smem:[#allocation5_spill]] (!%p673_p2)  ;;  %vm1535_vm3 = vcmask (!%p673_p2), 326656   ;;  %vm1548_vm4 = vcmask (!%p673_p2), 1043456  }
  0x12   : > { %v4779_v60 = vld [vmem:[%s7627_s13] ss:$0 sm:$0xff] (!%p673_p2)  ;;  %s7664_s30 = sld [smem:[#allocation6_spill]] (!%p673_p2)  ;;  %s7665_s4 = sld [smem:[#allocation7_spill]] (!%p673_p2) }
  0x13   : > { %s7668_s27 = sld [smem:[#allocation8_spill]] (!%p673_p2)  ;;  %s7669_s7 = sld [smem:[#allocation9_spill]] (!%p673_p2) }
  0x14   : > { %s7670_s29 = sld [smem:[#allocation3_spill]] (!%p673_p2) }
  0x15   : > { %v5868_v0 = vld [vmem:[%s7659_s6] sm:$0xff] (!%p673_p2)   ;;  %v5869_v1 = vld [vmem:[%s7659_s6 + $0x8] sm:$0xff] (!%p673_p2)   ;;  %s6102_s6 = smov (!%p673_p2), 112  }
  0x16   : > { %5202 = vmatprep.subr.bf16.mxu0 (!%p673_p2), %v5868_v0  ;;  %v5870_v2 = vld [vmem:[%s7660_s9] sm:$0xff] (!%p673_p2)   ;;  %v5871_v3 = vld [vmem:[%s7660_s9 + $0x8] sm:$0xff] (!%p673_p2)  }
  0x17   : > { %s7719_s26 = smov (!%p743_p3, %s4754_s26), 1  ;;  %5203 = vmatpush3.bf16.msra.mxu0 %v5868_v0  ;;  %5214 = vmatprep.subr.bf16.mxu1 %v5870_v2 }
  0x18   : > { %5204 = vmatprep.subr.bf16.mxu0 %v5869_v1  ;;  %s6249_s25 = sshll.u32 %s7719_s26, 6  ;;  %5215 = vmatpush3.bf16.msra.mxu1 %v5870_v2 }
  0x19   : > { %s6258_s2 = scalar_lea.vmem %s7661_s28, %s6249_s25  ;;  %5216 = vmatprep.subr.bf16.mxu1 %v5871_v3  ;;  %s7662_s28 = sld [smem:[#allocation4_spill]] }
  0x1a   : > { %v759_v5 = vld [vmem:[%s6258_s2] sm:$0xff]  ;;  %v760_v6 = vld [vmem:[%s6258_s2 + $0x8] sm:$0xff]  ;;  %v761_v7 = vld [vmem:[%s6258_s2 + $0x10] sm:$0xff]  ;;  %s7014_s9 = scalar_lea.vmem %s7670_s29, %s6249_s25  ;;  %s7587_s26 = scalar_lea.vmem %s7638_s24, %s6249_s25 }
  0x1b   : > { %5205 = vmatpush3.bf16.msra.mxu0 %v5869_v1  ;;  %v767_v8 = vpack.c.bf16 %v760_v6, %v759_v5  ;;  %v762_v9 = vld [vmem:[%s6258_s2 + $0x18] sm:$0xff]  ;;  %v763_v10 = vld [vmem:[%s6258_s2 + $0x20] sm:$0xff]  ;;  %v764_v11 = vld [vmem:[%s6258_s2 + $0x28] sm:$0xff] }
  0x1c   : > { %v768_v12 = vpack.c.bf16 %v762_v9, %v761_v7  ;;  %v769_v13 = vpack.c.bf16 %v764_v11, %v763_v10  ;;  %5226 = vmatprep.subr.bf16.mxu0 %v5872_v4  ;;  %v765_v15 = vld [vmem:[%s6258_s2 + $0x30] sm:$0xff]  ;;  %v766_v16 = vld [vmem:[%s6258_s2 + $0x38] sm:$0xff]  ;;  %5217 = vmatpush3.bf16.msra.mxu1 %v5871_v3 }
  0x1d   : > { %5206 = vmatprep.mubr.msk.bf16.mxu0 %vm7647_vm0, %v767_v8  ;;  %5218 = vmatprep.mubr.msk.bf16.mxu1 %vm7647_vm0, %v767_v8  ;;  %v770_v17 = vpack.c.bf16 %v766_v16, %v765_v15  ;;  %v5877_v16 = vld [vmem:[%s7663_s0 + $0x8] sm:$0xff]  }
  0x1e   : > { %5207 = vmatmul.mubr.msk.bf16.vlgmr.msra.gmra.mrb[0].mxu0 %vm7647_vm0, %v768_v12  ;;  %5238 = vmatprep.subr.bf16.mxu1 %v6098_v18 }
  0x1f   : > { %5210 = vmatprep.mubr.msk.bf16.mxu0 %vm7647_vm0, %v769_v13  ;;  %5227 = vmatpush3.bf16.msra.mxu0 %v5872_v4  ;;  %v6309_v3 = vld [vmem:[%s7662_s28] sm:$0xff]   ;;  %v5876_v15 = vld [vmem:[%s7662_s28 + $0x8] sm:$0xff]  }
  0x20   : > { %5219 = vmatmul.mubr.msk.bf16.vlgmr.msra.gmra.mrb[0].mxu1 %vm7647_vm0, %v768_v12  ;;  %5228 = vmatprep.subr.bf16.mxu0 %v5873_v14  ;;  %v6314_v4 = vld [vmem:[%s7663_s0] sm:$0xff]  }
  0x21   : > { %5222 = vmatprep.mubr.msk.bf16.mxu1 %vm7647_vm0, %v769_v13 }
  0x23   : > { %5229 = vmatpush3.bf16.msra.mxu0 %v5873_v14 }
  0x24   : > { %5258 = vmatprep.subr.bf16.mxu0 %v6098_v18 }
  0x26   : > { %5211 = vmatmul.mubr.msk.bf16.gmra.mrb[4].mxu0 %vm7647_vm0, %v770_v17 }
  0x27   : > { %5230 = vmatprep.mubr.msk.bf16.mxu0 %vm7647_vm0, %v767_v8 }
  0x28   : > { %5223 = vmatmul.mubr.msk.bf16.gmra.mrb[4].mxu1 %vm7647_vm0, %v770_v17 }
  0x29   : > { %5246 = vmatprep.mubr.msk.bf16.mxu1 %vm6099_vm1, %v6098_v18 }
  0x2e   : > { %5231 = vmatmul.mubr.msk.bf16.vlgmr.msra.gmra.mrb[8].mxu0 %vm7647_vm0, %v768_v12 }
  0x2f   : > { %5234 = vmatprep.mubr.msk.bf16.mxu0 %vm7647_vm0, %v769_v13 }
  0x36   : > { %5235 = vmatmul.mubr.msk.bf16.gmra.mrb[12].mxu0 %vm7647_vm0, %v770_v17 }
  0x37   : > { %5266 = vmatprep.mubr.msk.bf16.mxu0 %vm6099_vm1, %v6098_v18 }
  0xf1   : > { %v5208_v19 = vpop.f32.mrb[0].mxu0 }
  0xf2   : > { %v841_v21 = vpop.f32.mrb[1].mxu0  ;;  %v850_v25 = vadd.f32 %v5208_v19, %v4765_v20 }
  0xf3   : > { %v5209_v23 = vpop.f32.mrb[2].mxu0  ;;  %v5220_v24 = vpop.f32.mrb[0].mxu1  ;;  %v842_v30 = vadd.f32 %v4765_v20, %v841_v21 }
  0xf4   : > { %v853_v26 = vadd.f32 %v5209_v23, %v4765_v20  ;;  %v844_v27 = vpop.f32.mrb[3].mxu0  ;;  %v938_v28 = vadd.f32 %v5220_v24, %v4772_v22  ;;  %v929_v29 = vpop.f32.mrb[1].mxu1  ;;  %v5878_v23 = vld [vmem:[%s7662_s28 + $0x10] ss:$0 sps:$4 sm:$0xff]  }
  0xf5   : > { %v845_v31 = vadd.f32 %v4765_v20, %v844_v27  ;;  %v930_v32 = vadd.f32 %v4772_v22, %v929_v29  ;;  %v5221_v33 = vpop.f32.mrb[2].mxu1  ;;  %v5879_v24 = vld [vmem:[%s7663_s0 + $0x10] ss:$0 sps:$4 sm:$0xff]  }
  0xf6   : > { %v1059_v34 = vpack.c.bf16 %v853_v26, %v850_v25  ;;  %v941_v35 = vadd.f32 %v5221_v33, %v4772_v22  ;;  %v932_v36 = vpop.f32.mrb[3].mxu1  ;;  %v5880_v25 = vld [vmem:[%s7664_s30] sm:$0xff]  }
  0xf7   : > { %v1058_v37 = vpack.c.bf16 %v845_v31, %v842_v30  ;;  %v933_v38 = vadd.f32 %v4772_v22, %v932_v36  ;;  %v5881_v26 = vld [vmem:[%s7665_s4] sm:$0xff]  }
  0xf8   : > { %v6295_v39 = vpack.c.bf16 %v941_v35, %v938_v28 }
  0xf9   : > { %v5212_v40 = vpop.f32.mrb[4].mxu0  ;;  %5239 = vmatpush3.bf16.msra.mxu1 %v1058_v37  ;;  %5259 = vmatpush3.bf16.msra.mxu0 %v1058_v37  ;;  %v1224_v41 = vpack.c.bf16 %v933_v38, %v930_v32 }
  0xfa   : > { %v857_v42 = vpop.f32.mrb[5].mxu0  ;;  %5240 = vmatprep.subr.bf16.mxu1 %v6098_v18  ;;  %5260 = vmatprep.subr.bf16.mxu0 %v6098_v18  ;;  %v866_v45 = vadd.f32 %v5212_v40, %v4765_v20 }
  0xfb   : > { %v5213_v43 = vpop.f32.mrb[6].mxu0  ;;  %v5224_v44 = vpop.f32.mrb[4].mxu1  ;;  %v858_v50 = vadd.f32 %v4765_v20, %v857_v42 }
  0xfc   : > { %v869_v46 = vadd.f32 %v5213_v43, %v4765_v20  ;;  %v860_v47 = vpop.f32.mrb[7].mxu0  ;;  %v954_v48 = vadd.f32 %v5224_v44, %v4772_v22  ;;  %v945_v49 = vpop.f32.mrb[5].mxu1 }
  0xfd   : > { %v861_v51 = vadd.f32 %v4765_v20, %v860_v47  ;;  %5241 = vmatpush3.bf16.msra.mxu1 %v1059_v34  ;;  %5261 = vmatpush3.bf16.msra.mxu0 %v1059_v34  ;;  %v946_v52 = vadd.f32 %v4772_v22, %v945_v49  ;;  %v5225_v53 = vpop.f32.mrb[6].mxu1 }
  0xfe   : > { %v1061_v54 = vpack.c.bf16 %v869_v46, %v866_v45  ;;  %5242 = vmatprep.subr.bf16.mxu1 %v6098_v18  ;;  %5262 = vmatprep.subr.bf16.mxu0 %v6098_v18  ;;  %v957_v55 = vadd.f32 %v5225_v53, %v4772_v22  ;;  %v948_v56 = vpop.f32.mrb[7].mxu1 }
  0xff   : > { %v1060_v57 = vpack.c.bf16 %v861_v51, %v858_v50  ;;  %v949_v58 = vadd.f32 %v4772_v22, %v948_v56 }
 0x100   : > { %v1227_v59 = vpack.c.bf16 %v957_v55, %v954_v48 }
 0x101   : > { %5243 = vmatpush3.bf16.msra.mxu1 %v1060_v57  ;;  %5263 = vmatpush3.bf16.msra.mxu0 %v1060_v57  ;;  %v1226_v61 = vpack.c.bf16 %v949_v58, %v946_v52  ;;  %v5232_v62 = vpop.f32.mrb[8].mxu0 }
 0x102   : > { %5244 = vmatprep.subr.bf16.mxu1 %v6098_v18  ;;  %5264 = vmatprep.subr.bf16.mxu0 %v6098_v18  ;;  %v1026_v63 = vadd.f32 %v5232_v62, %v4779_v60  ;;  %v1017_v0 = vpop.f32.mrb[9].mxu0 }
 0x103   : > { %v1018_v1 = vadd.f32 %v4779_v60, %v1017_v0  ;;  %v5233_v2 = vpop.f32.mrb[10].mxu0 }
 0x104   : > { %v1029_v5 = vadd.f32 %v5233_v2, %v4779_v60  ;;  %v1020_v6 = vpop.f32.mrb[11].mxu0 }
 0x105   : > { %5245 = vmatpush3.bf16.msra.mxu1 %v1061_v54  ;;  %5265 = vmatpush3.bf16.msra.mxu0 %v1061_v54  ;;  %v1021_v7 = vadd.f32 %v4779_v60, %v1020_v6 }
 0x106   : > { %5278 = vmatprep.subr.bf16.mxu1 %v6098_v18  ;;  %5298 = vmatprep.subr.bf16.mxu0 %v6098_v18  ;;  %v1346_v8 = vpack.c.bf16 %v1029_v5, %v1026_v63 }
 0x107   : > { %v1345_v9 = vpack.c.bf16 %v1021_v7, %v1018_v1 }
 0x108   : > { %5247 = vmatmul.mubr.msk.bf16.vlgmr.msra.gmra.mrb[8].mxu1 %vm1075_vm2, %v6309_v3  ;;  %5267 = vmatmul.mubr.msk.bf16.vlgmr.msra.gmra.mrb[16].mxu0 %vm1075_vm2, %v6314_v4 }
 0x109   : > { %5279 = vmatpush3.bf16.msra.mxu1 %v1224_v41  ;;  %5299 = vmatpush3.bf16.msra.mxu0 %v1224_v41  ;;  %v5236_v10 = vpop.f32.mrb[12].mxu0 }
 0x10a   : > { %5280 = vmatprep.subr.bf16.mxu1 %v6098_v18  ;;  %5300 = vmatprep.subr.bf16.mxu0 %v6098_v18  ;;  %v1042_v11 = vadd.f32 %v5236_v10, %v4779_v60  ;;  %v1033_v12 = vpop.f32.mrb[13].mxu0 }
 0x10b   : > { %5250 = vmatprep.mubr.msk.bf16.mxu1 %vm6099_vm1, %v6098_v18  ;;  %5270 = vmatprep.mubr.msk.bf16.mxu0 %vm6099_vm1, %v6098_v18  ;;  %v1034_v13 = vadd.f32 %v4779_v60, %v1033_v12  ;;  %v5237_v14 = vpop.f32.mrb[14].mxu0 }
 0x10c   : > { %v1045_v17 = vadd.f32 %v5237_v14, %v4779_v60  ;;  %v1036_v19 = vpop.f32.mrb[15].mxu0 }
 0x10d   : > { %5281 = vmatpush3.bf16.msra.mxu1 %v6295_v39  ;;  %5301 = vmatpush3.bf16.msra.mxu0 %v6295_v39  ;;  %v1037_v20 = vadd.f32 %v4779_v60, %v1036_v19 }
 0x10e   : > { %5282 = vmatprep.subr.bf16.mxu1 %v6098_v18  ;;  %5302 = vmatprep.subr.bf16.mxu0 %v6098_v18  ;;  %v1348_v21 = vpack.c.bf16 %v1045_v17, %v1042_v11 }
 0x10f   : > { %v1347_v22 = vpack.c.bf16 %v1037_v20, %v1034_v13 }
 0x110   : > { %5251 = vmatmul.mubr.msk.bf16.gmra.mrb[12].mxu1 %vm1075_vm2, %v5876_v15  ;;  %5271 = vmatmul.mubr.msk.bf16.gmra.mrb[20].mxu0 %vm1075_vm2, %v5877_v16 }
 0x111   : > { %5283 = vmatpush3.bf16.msra.mxu1 %v1226_v61  ;;  %5303 = vmatpush3.bf16.msra.mxu0 %v1226_v61 }
 0x112   : > { %5284 = vmatprep.subr.bf16.mxu1 %v6098_v18  ;;  %5304 = vmatprep.subr.bf16.mxu0 %v6098_v18 }
 0x113   : > { %5254 = vmatprep.mubr.msk.bf16.mxu1 %vm6099_vm1, %v6098_v18  ;;  %5274 = vmatprep.mubr.msk.bf16.mxu0 %vm6099_vm1, %v6098_v18 }
 0x115   : > { %5285 = vmatpush3.bf16.msra.mxu1 %v1227_v59  ;;  %5305 = vmatpush3.bf16.msra.mxu0 %v1227_v59 }
 0x116   : > { %5318 = vmatprep.subr.bf16.mxu1 %v6098_v18  ;;  %5338 = vmatprep.subr.bf16.mxu0 %v6098_v18 }
 0x118   : > { %5255 = vmatmul.mubr.msk.bf16.gmra.mrb[16].mxu1 %vm1075_vm2, %v5878_v23  ;;  %5275 = vmatmul.mubr.msk.bf16.gmra.mrb[24].mxu0 %vm1075_vm2, %v5879_v24 }
 0x119   : > { %5286 = vmatprep.mubr.msk.bf16.mxu1 %vm6099_vm1, %v6098_v18  ;;  %5306 = vmatprep.mubr.msk.bf16.mxu0 %vm6099_vm1, %v6098_v18 }
 0x120   : > { %5287 = vmatmul.mubr.msk.bf16.vlgmr.msra.gmra.mrb[20].mxu1 %vm1075_vm2, %v6309_v3  ;;  %5307 = vmatmul.mubr.msk.bf16.vlgmr.msra.gmra.mrb[28].mxu0 %vm1075_vm2, %v6314_v4 }
 0x121   : > { %5290 = vmatprep.mubr.msk.bf16.mxu1 %vm6099_vm1, %v6098_v18  ;;  %5310 = vmatprep.mubr.msk.bf16.mxu0 %vm6099_vm1, %v6098_v18 }
 0x122   : > { %5319 = vmatpush3.bf16.msra.mxu1 %v1345_v9  ;;  %5339 = vmatpush3.bf16.msra.mxu0 %v1345_v9 }
 0x123   : > { %5320 = vmatprep.subr.bf16.mxu1 %v6098_v18  ;;  %5340 = vmatprep.subr.bf16.mxu0 %v6098_v18 }
 0x126   : > { %5321 = vmatpush3.bf16.msra.mxu1 %v1346_v8  ;;  %5341 = vmatpush3.bf16.msra.mxu0 %v1346_v8 }
 0x127   : > { %5322 = vmatprep.subr.bf16.mxu1 %v6098_v18  ;;  %5342 = vmatprep.subr.bf16.mxu0 %v6098_v18 }
 0x128   : > { %5291 = vmatmul.mubr.msk.bf16.gmra.mrb[24].mxu1 %vm1075_vm2, %v5876_v15  ;;  %5311 = vmatmul.mubr.msk.bf16.gmra.mrb[32].mxu0 %vm1075_vm2, %v5877_v16 }
 0x129   : > { %5294 = vmatprep.mubr.msk.bf16.mxu1 %vm6099_vm1, %v6098_v18  ;;  %5314 = vmatprep.mubr.msk.bf16.mxu0 %vm6099_vm1, %v6098_v18 }
 0x12a   : > { %5323 = vmatpush3.bf16.msra.mxu1 %v1347_v22  ;;  %5343 = vmatpush3.bf16.msra.mxu0 %v1347_v22 }
 0x12b   : > { %5324 = vmatprep.subr.bf16.mxu1 %v6098_v18  ;;  %5344 = vmatprep.subr.bf16.mxu0 %v6098_v18 }
 0x12e   : > { %5325 = vmatpush3.bf16.msra.mxu1 %v1348_v21  ;;  %5345 = vmatpush3.bf16.msra.mxu0 %v1348_v21 }
 0x130   : > { %5295 = vmatmul.mubr.msk.bf16.gmra.mrb[28].mxu1 %vm1075_vm2, %v5878_v23  ;;  %5315 = vmatmul.mubr.msk.bf16.gmra.mrb[36].mxu0 %vm1075_vm2, %v5879_v24 }
 0x131   : > { %5326 = vmatprep.mubr.msk.bf16.mxu1 %vm6099_vm1, %v6098_v18  ;;  %5346 = vmatprep.mubr.msk.bf16.mxu0 %vm6099_vm1, %v6098_v18 }
 0x138   : > { %5327 = vmatmul.mubr.msk.bf16.vlgmr.msra.gmra.mrb[32].mxu1 %vm1075_vm2, %v6309_v3  ;;  %5347 = vmatmul.mubr.msk.bf16.vlgmr.msra.gmra.mrb[40].mxu0 %vm1075_vm2, %v6314_v4 }
 0x139   : > { %5330 = vmatprep.mubr.msk.bf16.mxu1 %vm6099_vm1, %v6098_v18  ;;  %5350 = vmatprep.mubr.msk.bf16.mxu0 %vm6099_vm1, %v6098_v18 }
 0x140   : > { %5331 = vmatmul.mubr.msk.bf16.gmra.mrb[36].mxu1 %vm1075_vm2, %v5876_v15  ;;  %5351 = vmatmul.mubr.msk.bf16.gmra.mrb[44].mxu0 %vm1075_vm2, %v5877_v16 }
 0x141   : > { %5334 = vmatprep.mubr.msk.bf16.mxu1 %vm6099_vm1, %v6098_v18  ;;  %5354 = vmatprep.mubr.msk.bf16.mxu0 %vm6099_vm1, %v6098_v18 }
 0x148   : > { %5335 = vmatmul.mubr.msk.bf16.gmra.mrb[40].mxu1 %vm1075_vm2, %v5878_v23  ;;  %5355 = vmatmul.mubr.msk.bf16.gmra.mrb[48].mxu0 %vm1075_vm2, %v5879_v24 }
 0x149   : > { %5364 = vmatprep.mubr.msk.bf16.mxu1 %vm1535_vm3, %v5880_v25  ;;  %5378 = vmatprep.mubr.msk.bf16.mxu0 %vm1535_vm3, %v5881_v26 }
 0x1db   : > { %v1119_v27 = vpop.f32.mrb[8].mxu1  ;;  %v1197_v28 = vpop.f32.mrb[16].mxu0 }
 0x1dc   : > { %v5248_v29 = vpop.f32.mrb[9].mxu1  ;;  %v5268_v30 = vpop.f32.mrb[17].mxu0  ;;  %v1219_v33 = vsub.f32 0.0, %v1197_v28 }
 0x1dd   : > { %v1122_v31 = vpop.f32.mrb[10].mxu1  ;;  %v1200_v32 = vpop.f32.mrb[18].mxu0 }
 0x1de   : > { %v6410_v34 = vpack.c.bf16 %v1122_v31, %v1119_v27  ;;  %v1220_v35 = vsub.f32 0.0, %v1200_v32  ;;  %v5249_v36 = vpop.f32.mrb[11].mxu1  ;;  %v5269_v37 = vpop.f32.mrb[19].mxu0 }
 0x1e0   : > { %v6412_v38 = vpack.c.bf16 %v1220_v35, %v1219_v33 }
 0x1e3   : > { %v1127_v39 = vpop.f32.mrb[12].mxu1  ;;  %v1205_v40 = vpop.f32.mrb[20].mxu0 }
 0x1e4   : > { %v5252_v41 = vpop.f32.mrb[13].mxu1  ;;  %v5272_v42 = vpop.f32.mrb[21].mxu0  ;;  %v1221_v45 = vsub.f32 0.0, %v1205_v40 }
 0x1e5   : > { %v6414_v43 = vpop.f32.mrb[14].mxu1  ;;  %v1208_v44 = vpop.f32.mrb[22].mxu0 }
 0x1e6   : > { %v6417_v46 = vpack.c.bf16 %v6414_v43, %v1127_v39  ;;  %v1222_v47 = vsub.f32 0.0, %v1208_v44  ;;  %v5253_v48 = vpop.f32.mrb[15].mxu1  ;;  %v5273_v49 = vpop.f32.mrb[23].mxu0 }
 0x1e8   : > { %v6419_v50 = vpack.c.bf16 %v1222_v47, %v1221_v45 }
 0x1eb   : > { %v6421_v51 = vpop.f32.mrb[16].mxu1  ;;  %v1213_v52 = vpop.f32.mrb[24].mxu0 }
 0x1ec   : > { %v5256_v53 = vpop.f32.mrb[17].mxu1  ;;  %v5276_v54 = vpop.f32.mrb[25].mxu0 }
 0x1ed   : > { %v1138_v55 = vpop.f32.mrb[18].mxu1  ;;  %v1216_v56 = vpop.f32.mrb[26].mxu0 }
 0x1ee   : > { %v5257_v57 = vpop.f32.mrb[19].mxu1  ;;  %v5277_v58 = vpop.f32.mrb[27].mxu0 }
 0x1f3   : > { %v1262_v59 = vpop.f32.mrb[20].mxu1  ;;  %v1318_v60 = vpop.f32.mrb[28].mxu0 }
 0x1f4   : > { %v1466_v61 = vmul.f32 %v1262_v59, %v1119_v27  ;;  %v1481_v62 = vmul.f32 %v1262_v59, %v1219_v33  ;;  %v1340_v63 = vsub.f32 0.0, %v1318_v60  ;;  %v5288_v0 = vpop.f32.mrb[21].mxu1  ;;  %v5308_v1 = vpop.f32.mrb[29].mxu0 }
 0x1f5   : > { %v1265_v2 = vpop.f32.mrb[22].mxu1  ;;  %v1321_v3 = vpop.f32.mrb[30].mxu0 }
 0x1f6   : > { %v1471_v4 = vmul.f32 %v1340_v63, %v1219_v33  ;;  %v1486_v5 = vmul.f32 %v1340_v63, %v1119_v27  ;;  %v1467_v6 = vmul.f32 %v1265_v2, %v1122_v31  ;;  %v1482_v7 = vmul.f32 %v1265_v2, %v1220_v35  ;;  %v5289_v8 = vpop.f32.mrb[23].mxu1  ;;  %v5309_v9 = vpop.f32.mrb[31].mxu0 }
 0x1f7   : > { %v6423_v10 = vpack.c.bf16 %v1265_v2, %v1262_v59  ;;  %v1341_v11 = vsub.f32 0.0, %v1321_v3 }
 0x1f8   : > { %v1476_v12 = vadd.f32 %v1471_v4, %v1466_v61  ;;  %v1491_v13 = vsub.f32 %v1481_v62, %v1486_v5 }
 0x1f9   : > { %v1472_v14 = vmul.f32 %v1341_v11, %v1220_v35  ;;  %v1487_v15 = vmul.f32 %v1341_v11, %v1122_v31  ;;  %v6425_v16 = vpack.c.bf16 %v1341_v11, %v1340_v63 }
 0x1fb   : > { %v1270_v17 = vpop.f32.mrb[24].mxu1  ;;  %v1326_v19 = vpop.f32.mrb[32].mxu0  ;;  %v1477_v20 = vadd.f32 %v1472_v14, %v1467_v6  ;;  %v1492_v21 = vsub.f32 %v1482_v7, %v1487_v15 }
 0x1fc   : > { %v1468_v22 = vmul.f32 %v1270_v17, %v1127_v39  ;;  %v1483_v23 = vmul.f32 %v1270_v17, %v1221_v45  ;;  %v1342_v24 = vsub.f32 0.0, %v1326_v19  ;;  %v5292_v25 = vpop.f32.mrb[25].mxu1  ;;  %v5312_v26 = vpop.f32.mrb[33].mxu0  ;;  %v6471_v19 = vld [vmem:[%s7665_s4 + $0x10] sm:$0xff]  }
 0x1fd   : > { %v1273_v27 = vpop.f32.mrb[26].mxu1  ;;  %v1329_v28 = vpop.f32.mrb[34].mxu0  ;;  %v1512_v29 = vpack.c.bf16 %v1477_v20, %v1476_v12  ;;  %v1617_v30 = vpack.c.bf16 %v1492_v21, %v1491_v13  ;;  %v6456_v12 = vld [vmem:[%s7664_s30 + $0x8] sm:$0xff]  }
 0x1fe   : > { %v1473_v32 = vmul.f32 %v1342_v24, %v1221_v45  ;;  %v1488_v33 = vmul.f32 %v1342_v24, %v1127_v39  ;;  %v1469_v35 = vmul.f32 %v1273_v27, %v6414_v43  ;;  %v1484_v31 = vmul.f32 %v1273_v27, %v1222_v47  ;;  %v5293_v36 = vpop.f32.mrb[27].mxu1  ;;  %v5313_v37 = vpop.f32.mrb[35].mxu0  ;;  %v6461_v13 = vld [vmem:[%s7665_s4 + $0x8] sm:$0xff]  }
 0x1ff   : > { %v6428_v40 = vpack.c.bf16 %v1273_v27, %v1270_v17  ;;  %v1343_v41 = vsub.f32 0.0, %v1329_v28  ;;  %5358 = vmatprep.subr.bf16.mxu1 %v1512_v29  ;;  %5372 = vmatprep.subr.bf16.mxu0 %v1617_v30  ;;  %v6433_v39 = vsub.f32 0.0, %v1213_v52  ;;  %v6466_v17 = vld [vmem:[%s7664_s30 + $0x10] sm:$0xff]   ;;  %v6492_v27 = vld [vmem:[%s7664_s30 + $0x18] sm:$0xff]  }
 0x200   : > { %5359 = vmatpush3.bf16.msra.mxu1 %v1512_v29  ;;  %5373 = vmatpush3.bf16.msra.mxu0 %v1617_v30  ;;  %v1478_v42 = vadd.f32 %v1473_v32, %v1468_v22  ;;  %v1493_v44 = vsub.f32 %v1483_v23, %v1488_v33  ;;  %v6497_v28 = vld [vmem:[%s7665_s4 + $0x18] sm:$0xff]  }
 0x201   : > { %v1474_v48 = vmul.f32 %v1343_v41, %v1222_v47  ;;  %v1489_v49 = vmul.f32 %v1343_v41, %v6414_v43  ;;  %v6431_v53 = vpack.c.bf16 %v1343_v41, %v1342_v24 }
 0x203   : > { %v6435_v45 = vpop.f32.mrb[28].mxu1  ;;  %v1334_v54 = vpop.f32.mrb[36].mxu0  ;;  %v1479_v55 = vadd.f32 %v1474_v48, %v1469_v35  ;;  %v1494_v56 = vsub.f32 %v1484_v31, %v1489_v49 }
 0x204   : > { %v1470_v57 = vmul.f32 %v6435_v45, %v6421_v51  ;;  %v1485_v58 = vmul.f32 %v6435_v45, %v6433_v39  ;;  %v6441_v59 = vsub.f32 0.0, %v1334_v54  ;;  %v5296_v47 = vpop.f32.mrb[29].mxu1  ;;  %v5316_v60 = vpop.f32.mrb[37].mxu0 }
 0x205   : > { %v1281_v43 = vpop.f32.mrb[30].mxu1  ;;  %v1337_v61 = vpop.f32.mrb[38].mxu0  ;;  %v1513_v62 = vpack.c.bf16 %v1479_v55, %v1478_v42  ;;  %v1618_v52 = vpack.c.bf16 %v1494_v56, %v1493_v44 }
 0x206   : > { %v1475_v63 = vmul.f32 %v6441_v59, %v6433_v39  ;;  %v1490_v0 = vmul.f32 %v6441_v59, %v6421_v51  ;;  %v5297_v1 = vpop.f32.mrb[31].mxu1  ;;  %v5317_v2 = vpop.f32.mrb[39].mxu0 }
 0x207   : > { %5360 = vmatprep.subr.bf16.mxu1 %v1513_v62  ;;  %5374 = vmatprep.subr.bf16.mxu0 %v1618_v52 }
 0x208   : > { %v1480_v3 = vadd.f32 %v1475_v63, %v1470_v57  ;;  %v1495_v4 = vsub.f32 %v1485_v58, %v1490_v0  ;;  %5361 = vmatpush3.bf16.msra.mxu1 %v1513_v62  ;;  %5375 = vmatpush3.bf16.msra.mxu0 %v1618_v52 }
 0x20a   : > { %v1514_v5 = vpack.c.bf16 %v1480_v3, %v1480_v3  ;;  %v1619_v6 = vpack.c.bf16 %v1495_v4, %v1495_v4 }
 0x20b   : > { %v6447_v7 = vpop.f32.mrb[32].mxu1  ;;  %v1439_v8 = vpop.f32.mrb[40].mxu0 }
 0x20c   : > { %5774 = vmatprep.subr.msk.bf16.mxu1 %vm1548_vm4, %v1514_v5  ;;  %5775 = vmatprep.subr.msk.bf16.mxu0 %vm1548_vm4, %v1619_v6  ;;  %v1550_v9 = vsel %vm1548_vm4, %v1514_v5, 0  ;;  %v1653_v11 = vsel %vm1548_vm4, %v1619_v6, 0  ;;  %v5328_v14 = vpop.f32.mrb[33].mxu1  ;;  %v5348_v15 = vpop.f32.mrb[41].mxu0  ;;  %v6513_v56 = vsub.f32 0.0, %v1439_v8 }
 0x20d   : > { %5363 = vmatpush3.bf16.msra.mxu1 %v1550_v9  ;;  %5377 = vmatpush3.bf16.msra.mxu0 %v1653_v11  ;;  %v6473_v20 = vpop.f32.mrb[34].mxu1  ;;  %v1442_v21 = vpop.f32.mrb[42].mxu0 }
 0x20e   : > { %v6477_v22 = vpack.c.bf16 %v6473_v20, %v6447_v7  ;;  %v5329_v23 = vpop.f32.mrb[35].mxu1  ;;  %v5349_v24 = vpop.f32.mrb[43].mxu0  ;;  %v6515_v57 = vsub.f32 0.0, %v1442_v21 }
 0x210   : > { %5365 = vmatmul.mubr.msk.bf16.vlgmr.msra.gmra.mrb[44].mxu1 %vm1535_vm3, %v6456_v12  ;;  %5379 = vmatmul.mubr.msk.bf16.vlgmr.msra.gmra.mrb[52].mxu0 %vm1535_vm3, %v6461_v13  ;;  %v6519_v58 = vpack.c.bf16 %v6515_v57, %v6513_v56 }
 0x211   : > { %5368 = vmatprep.mubr.msk.bf16.mxu1 %vm1535_vm3, %v6466_v17  ;;  %5382 = vmatprep.mubr.msk.bf16.mxu0 %vm1535_vm3, %v6471_v19 }
 0x213   : > { %v6487_v25 = vpop.f32.mrb[36].mxu1  ;;  %v1447_v26 = vpop.f32.mrb[44].mxu0 }
 0x214   : > { %v5332_v29 = vpop.f32.mrb[37].mxu1  ;;  %v5352_v30 = vpop.f32.mrb[45].mxu0  ;;  %v6521_v47 = vsub.f32 0.0, %v1447_v26 }
 0x215   : > { %v6499_v32 = vpop.f32.mrb[38].mxu1  ;;  %v1450_v33 = vpop.f32.mrb[46].mxu0 }
 0x216   : > { %v6503_v35 = vpack.c.bf16 %v6499_v32, %v6487_v25  ;;  %v5333_v31 = vpop.f32.mrb[39].mxu1  ;;  %v5353_v36 = vpop.f32.mrb[47].mxu0  ;;  %v6523_v60 = vsub.f32 0.0, %v1450_v33 }
 0x218   : > { %5369 = vmatmul.mubr.msk.bf16.gmra.mrb[48].mxu1 %vm1535_vm3, %v6492_v27  ;;  %5383 = vmatmul.mubr.msk.bf16.gmra.mrb[56].mxu0 %vm1535_vm3, %v6497_v28  ;;  %v6527_v43 = vpack.c.bf16 %v6523_v60, %v6521_v47 }
 0x21b   : > { %v6509_v37 = vpop.f32.mrb[40].mxu1  ;;  %v6511_v41 = vpop.f32.mrb[48].mxu0 }
 0x21c   : > { %v5336_v42 = vpop.f32.mrb[41].mxu1  ;;  %v5356_v44 = vpop.f32.mrb[49].mxu0 }
 0x21d   : > { %v1402_v48 = vpop.f32.mrb[42].mxu1  ;;  %v1458_v49 = vpop.f32.mrb[50].mxu0 }
 0x21e   : > { %v5337_v54 = vpop.f32.mrb[43].mxu1  ;;  %v5357_v55 = vpop.f32.mrb[51].mxu0 }
 0x2e3   : > { %v5366_v61 = vpop.f32.mrb[44].mxu1  ;;  %v5380_v62 = vpop.f32.mrb[52].mxu0 }
 0x2e4   : > { %v1722_v52 = vsub.f32 %v5366_v61, %v5380_v62  ;;  %v1586_v63 = vpop.f32.mrb[45].mxu1  ;;  %v1689_v0 = vpop.f32.mrb[53].mxu0  ;;  %v6100_v62 = vmov 1.0  }
 0x2e5   : > { %v1720_v1 = vsub.f32 %v1586_v63, %v1689_v0  ;;  %v5367_v2 = vpop.f32.mrb[46].mxu1  ;;  %v5381_v3 = vpop.f32.mrb[54].mxu0  ;;  %5402 = vmatprep.mubr.msk.f32.mxu1 %vm1075_vm2, %v6100_v62  ;;  %5430 = vmatprep.mubr.msk.f32.mxu0 %vm1075_vm2, %v6100_v62 }
 0x2e6   : > { %v1723_v4 = vsub.f32 %v5367_v2, %v5381_v3  ;;  %v1589_v5 = vpop.f32.mrb[47].mxu1  ;;  %v1692_v6 = vpop.f32.mrb[55].mxu0  ;;  %v1734_v8 = vsel %vm7647_vm0, %v1722_v52, 0.0  ;;  %v1761_v52 = vlaneseq }
 0x2e7   : > { %v1721_v9 = vsub.f32 %v1589_v5, %v1692_v6  ;;  %1735 = vadd.xlane.f32.xlu1 %v1734_v8  ;;  %v1728_v11 = vsel %vm7647_vm0, %v1720_v1, 0.0 }
 0x2e8   : > { %1729 = vadd.xlane.f32.xlu0 %v1728_v11  ;;  %v1737_v14 = vsel %vm7647_vm0, %v1723_v4, 0.0  ;;  %v6541_v63 = vshrl.u32 %v1761_v52, 7  ;;  %v6546_v2 = vand.u32 127, %v1761_v52 }
 0x2e9   : > { %v1731_v23 = vsel %vm7647_vm0, %v1721_v9, 0.0 }
 0x2ea   : > { %v6544_v1 = vadd.s32 8, %v6541_v63  ;;  %v6549_v4 = vadd.s32 16, %v6541_v63  ;;  %v6552_v5 = vadd.s32 24, %v6541_v63  ;;  %vm1772_vm5 = vcmp.eq.s32.totalorder %v6541_v63, %v6546_v2 }
 0x2eb   : > { %v5384_v15 = vpop.f32.mrb[56].mxu0  ;;  %1738 = vadd.xlane.f32.xlu1 %v1737_v14  ;;  %v5370_v21 = vpop.f32.mrb[48].mxu1  ;;  %v6561_v9 = vadd.s32 32, %v6541_v63  ;;  %v6564_v11 = vadd.s32 40, %v6541_v63 }
 0x2ec   : > { %v1726_v24 = vsub.f32 %v5370_v21, %v5384_v15  ;;  %v1705_v26 = vpop.f32.mrb[57].mxu0  ;;  %1732 = vadd.xlane.f32.xlu0 %v1731_v23  ;;  %v1602_v29 = vpop.f32.mrb[49].mxu1  ;;  %vm1773_vm6 = vcmp.eq.s32.totalorder %v6544_v1, %v6546_v2  ;;  %vm1774_vm7 = vcmp.eq.s32.totalorder %v6549_v4, %v6546_v2  ;;  %vm1775_vm8 = vcmp.eq.s32.totalorder %v6552_v5, %v6546_v2 }
 0x2ed   : > { %v1724_v30 = vsub.f32 %v1602_v29, %v1705_v26  ;;  %v5371_v33 = vpop.f32.mrb[50].mxu1  ;;  %v5385_v31 = vpop.f32.mrb[58].mxu0  ;;  %vm5727_vm9 = vmpackc.low %vm1773_vm6, %vm1772_vm5  ;;  %vm1776_vm11 = vcmp.eq.s32.totalorder %v6561_v9, %v6546_v2  ;;  %vm1777_vm12 = vcmp.eq.s32.totalorder %v6564_v11, %v6546_v2 }
 0x2ee   : > { %v1727_v36 = vsub.f32 %v5371_v33, %v5385_v31  ;;  %v1605_v42 = vpop.f32.mrb[51].mxu1  ;;  %v1708_v44 = vpop.f32.mrb[59].mxu0  ;;  %v1746_v55 = vsel %vm7647_vm0, %v1726_v24, 0.0  ;;  %vm6590_vm10 = vmpackc.low %vm1775_vm8, %vm1774_vm7  ;;  %v6603_v31 = vadd.s32 48, %v6541_v63 }
 0x2ef   : > { %v1725_v48 = vsub.f32 %v1605_v42, %v1708_v44  ;;  %v1740_v49 = vsel %vm7647_vm0, %v1724_v30, 0.0  ;;  %vm5739_vm13 = vmpackc.low %vm1777_vm12, %vm1776_vm11 }
 0x2f0   : > { %1741 = vadd.xlane.f32.xlu0 %v1740_v49  ;;  %v1749_v61 = vsel %vm7647_vm0, %v1727_v36, 0.0  ;;  %v6606_v36 = vadd.s32 56, %v6541_v63  ;;  %vm1778_vm14 = vcmp.eq.s32.totalorder %v6603_v31, %v6546_v2 }
 0x2f1   : > { %v1743_v54 = vsel %vm7647_vm0, %v1725_v48, 0.0 }
 0x2f2   : > { %1744 = vadd.xlane.f32.xlu1 %v1743_v54  ;;  %vm1779_vm15 = vcmp.eq.s32.totalorder %v6606_v36, %v6546_v2 }
 0x2f4   : > { %1747 = vadd.xlane.f32.xlu0 %v1746_v55 }
 0x2f6   : > { %1750 = vadd.xlane.f32.xlu1 %v1749_v61 }
 0x374   : > { %v1736_v0 = vpop.xlane.xlu1 %1735 }
 0x375   : > { %v1730_v3 = vpop.xlane.xlu0 %1729  ;;  %v6580_v23 = vmul.f32 0.03125, %v1736_v0 }
 0x376   : > { %v6566_v14 = vmul.f32 0.03125, %v1730_v3 }
 0x378   : > { %v1739_v6 = vpop.xlane.xlu1 %1738 }
 0x379   : > { %v1733_v8 = vpop.xlane.xlu0 %1732  ;;  %v6568_v15 = vmul.f32 0.03125, %v1739_v6 }
 0x37a   : > { %v6570_v21 = vmul.f32 0.03125, %v1733_v8 }
 0x37b   : > { %v5732_v30 = vpack.c.bf16 %v6568_v15, %v6580_v23 }
 0x37c   : > { %v5726_v24 = vpack.c.bf16 %v6570_v21, %v6566_v14 }
 0x37d   : > { %v1742_v26 = vpop.xlane.xlu0 %1741 }
 0x37e   : > { %v6600_v33 = vmul.f32 0.03125, %v1742_v26  ;;  %5728 = vmatprep.subr.msk.bf16.mxu1 %vm5727_vm9, %v5726_v24 }
 0x37f   : > { %5731 = vmatpush3.bf16.msk.msra.mxu1 %vm5727_vm9, %v5726_v24  ;;  %v1745_v42 = vpop.xlane.xlu1 %1744  ;;  %vm5745_vm9 = vmpackc.low %vm1779_vm15, %vm1778_vm14 }
 0x380   : > { %v6608_v44 = vmul.f32 0.03125, %v1745_v42  ;;  %5734 = vmatprep.subr.msk.bf16.mxu1 %vm6590_vm10, %v5732_v30 }
 0x381   : > { %v1748_v48 = vpop.xlane.xlu0 %1747 }
 0x382   : > { %v5738_v49 = vpack.c.bf16 %v6608_v44, %v6600_v33  ;;  %v6626_v55 = vmul.f32 0.03125, %v1748_v48 }
 0x383   : > { %5737 = vmatpush3.bf16.msk.msra.mxu1 %vm6590_vm10, %v5732_v30  ;;  %v1751_v54 = vpop.xlane.xlu1 %1750 }
 0x384   : > { %v6628_v61 = vmul.f32 0.03125, %v1751_v54  ;;  %5740 = vmatprep.subr.msk.bf16.mxu1 %vm5739_vm13, %v5738_v49 }
 0x386   : > { %v5744_v52 = vpack.c.bf16 %v6628_v61, %v6626_v55 }
 0x387   : > { %5743 = vmatpush3.bf16.msk.msra.mxu1 %vm5739_vm13, %v5738_v49 }
 0x388   : > { %5746 = vmatprep.subr.msk.bf16.mxu1 %vm5745_vm9, %v5744_v52 }
 0x38b   : > { %5749 = vmatpush3.bf16.msk.msra.mxu1 %vm5745_vm9, %v5744_v52 }
 0x38c   : > { %5442 = vmatprep.subr.bf16.mxu1 %v6098_v18 }
 0x38e   : > { %5403 = vmatmul.mubr.msk.f32.vlgmr.msra.gmra.mrb[52].mxu1 %vm1075_vm2, %v6100_v62 }
 0x38f   : > { %5405 = vmatprep.mubr.msk.f32.mxu1 %vm1075_vm2, %v6100_v62 }
 0x392   : > { %5406 = vmatmul.mubr.msk.f32.gmra.mrb[54].mxu1 %vm1075_vm2, %v6100_v62 }
 0x393   : > { %5408 = vmatprep.mubr.msk.f32.mxu1 %vm1075_vm2, %v6100_v62 }
 0x396   : > { %5409 = vmatmul.mubr.msk.f32.gmra.mrb[56].mxu1 %vm1075_vm2, %v6100_v62 }
 0x397   : > { %5411 = vmatprep.mubr.msk.f32.mxu1 %vm1075_vm2, %v6100_v62 }
 0x39a   : > { %5412 = vmatmul.mubr.msk.f32.gmra.mrb[58].mxu1 %vm1075_vm2, %v6100_v62 }
 0x39b   : > { %5450 = vmatprep.mubr.msk.bf16.mxu1 %vm6099_vm1, %v6098_v18 }
 0x461   : > { %v5404_v0 = vpop.f32.mrb[52].mxu1 }
 0x462   : > { %v1857_v3 = vpop.f32.mrb[53].mxu1  ;;  %v1963_v6 = vsel %vm1075_vm2, %v5404_v0, -inf  ;;  %vm1897_vm10 = vcmp.gt.f32.partialorder %v5404_v0, %v6570_v21 }
 0x463   : > { %1964 = vmax.xlane.f32.xlu1 %v1963_v6  ;;  %v1960_v8 = vsel %vm1075_vm2, %v1857_v3, -inf  ;;  %vm1896_vm13 = vcmp.gt.f32.partialorder %v1857_v3, %v6566_v14  ;;  %v4843_v52 = vsel %vm1897_vm10, 1.0, %v6098_v18 }
 0x464   : > { %1961 = vmax.xlane.f32.xlu0 %v1960_v8  ;;  %v4842_v8 = vsel %vm1896_vm13, 1.0, %v6098_v18 }
 0x465   : > { %v5407_v24 = vpop.f32.mrb[54].mxu1 }
 0x466   : > { %v1867_v26 = vpop.f32.mrb[55].mxu1  ;;  %v1969_v29 = vsel %vm1075_vm2, %v5407_v24, -inf  ;;  %vm1899_vm9 = vcmp.gt.f32.partialorder %v5407_v24, %v6568_v15  ;;  %v1920_v24 = vsel %vm1772_vm5, 0.0, %v4842_v8 }
 0x467   : > { %1970 = vmax.xlane.f32.xlu1 %v1969_v29  ;;  %v1966_v30 = vsel %vm1075_vm2, %v1867_v26, -inf  ;;  %vm1898_vm0 = vcmp.gt.f32.partialorder %v1867_v26, %v6580_v23 }
 0x468   : > { %1967 = vmax.xlane.f32.xlu0 %v1966_v30  ;;  %v1921_v30 = vsel %vm1773_vm6, 0.0, %v4843_v52  ;;  %v4844_v26 = vsel %vm1898_vm0, 1.0, %v6098_v18 }
 0x469   : > { %v5410_v42 = vpop.f32.mrb[56].mxu1  ;;  %v1922_v63 = vsel %vm1774_vm7, 0.0, %v4844_v26 }
 0x46a   : > { %v1877_v48 = vpop.f32.mrb[57].mxu1  ;;  %v1975_v49 = vsel %vm1075_vm2, %v5410_v42, -inf  ;;  %vm1901_vm10 = vcmp.gt.f32.partialorder %v5410_v42, %v6608_v44  ;;  %v1934_v8 = vsel %vm1075_vm2, %v1922_v63, 0.0 }
 0x46b   : > { %1976 = vmax.xlane.f32.xlu1 %v1975_v49  ;;  %v1972_v54 = vsel %vm1075_vm2, %v1877_v48, -inf  ;;  %v4845_v49 = vsel %vm1899_vm9, 1.0, %v6098_v18  ;;  %vm1900_vm13 = vcmp.gt.f32.partialorder %v1877_v48, %v6600_v33  ;;  %v4847_v42 = vsel %vm1901_vm10, 1.0, %v6098_v18 }
 0x46c   : > { %1973 = vmax.xlane.f32.xlu0 %v1972_v54  ;;  %v1931_v54 = vsel %vm1075_vm2, %v1921_v30, 0.0  ;;  %v1923_v1 = vsel %vm1775_vm8, 0.0, %v4845_v49  ;;  %v4846_v48 = vsel %vm1900_vm13, 1.0, %v6098_v18  ;;  %v1925_v5 = vsel %vm1777_vm12, 0.0, %v4847_v42 }
 0x46d   : > { %v5413_v6 = vpop.f32.mrb[58].mxu1  ;;  %v1937_v52 = vsel %vm1075_vm2, %v1923_v1, 0.0  ;;  %v1924_v4 = vsel %vm1776_vm11, 0.0, %v4846_v48 }
 0x46e   : > { %v1887_v0 = vpop.f32.mrb[59].mxu1  ;;  %v1981_v29 = vsel %vm1075_vm2, %v5413_v6, -inf  ;;  %vm1903_vm0 = vcmp.gt.f32.partialorder %v5413_v6, %v6628_v61  ;;  %v1940_v30 = vsel %vm1075_vm2, %v1924_v4, 0.0 }
 0x46f   : > { %1982 = vmax.xlane.f32.xlu1 %v1981_v29  ;;  %v1978_v3 = vsel %vm1075_vm2, %v1887_v0, -inf  ;;  %v1928_v29 = vsel %vm1075_vm2, %v1920_v24, 0.0  ;;  %vm1902_vm5 = vcmp.gt.f32.partialorder %v1887_v0, %v6626_v55  ;;  %v4849_v6 = vsel %vm1903_vm0, 1.0, %v6098_v18 }
 0x470   : > { %1979 = vmax.xlane.f32.xlu0 %v1978_v3  ;;  %v4848_v3 = vsel %vm1902_vm5, 1.0, %v6098_v18  ;;  %v1943_v0 = vsel %vm1075_vm2, %v1925_v5, 0.0  ;;  %v1927_v24 = vsel %vm1779_vm15, 0.0, %v4849_v6 }
 0x471   : > { %v1926_v11 = vsel %vm1778_vm14, 0.0, %v4848_v3  ;;  %v1949_v9 = vsel %vm1075_vm2, %v1927_v24, 0.0 }
 0x472   : > { %v1946_v49 = vsel %vm1075_vm2, %v1926_v11, 0.0 }
 0x473   : > { %1932 = vadd.xlane.f32.xlu1 %v1931_v54 }
 0x474   : > { %1929 = vadd.xlane.f32.xlu0 %v1928_v29 }
 0x477   : > { %1938 = vadd.xlane.f32.xlu1 %v1937_v52 }
 0x478   : > { %1935 = vadd.xlane.f32.xlu0 %v1934_v8 }
 0x47b   : > { %1944 = vadd.xlane.f32.xlu1 %v1943_v0 }
 0x47c   : > { %1941 = vadd.xlane.f32.xlu0 %v1940_v30 }
 0x47f   : > { %1950 = vadd.xlane.f32.xlu1 %v1949_v9 }
 0x480   : > { %1947 = vadd.xlane.f32.xlu0 %v1946_v49 }
 0x4f0   : > { %v1965_v26 = vpop.xlane.xlu1 %1964 }
 0x4f1   : > { %v1985_v54 = vsub.f32 %v6570_v21, %v1965_v26  ;;  %v1962_v29 = vpop.xlane.xlu0 %1961 }
 0x4f2   : > { %v1984_v1 = vsub.f32 %v6566_v14, %v1962_v29 }
 0x4f3   : > { %v1994_v63 = vmul.f32 1.442695, %v1985_v54 }
 0x4f4   : > { %v1992_v36 = vmul.f32 1.442695, %v1984_v1  ;;  %v1971_v42 = vpop.xlane.xlu1 %1970 }
 0x4f5   : > { %5908 = vpow2.f32 %v1994_v63  ;;  %v1987_v48 = vsub.f32 %v6568_v15, %v1971_v42  ;;  %v1968_v2 = vpop.xlane.xlu0 %1967 }
 0x4f6   : > { %5910 = vpow2.f32 %v1992_v36  ;;  %v1986_v31 = vsub.f32 %v6580_v23, %v1968_v2 }
 0x4f7   : > { %v1998_v52 = vmul.f32 1.442695, %v1987_v48 }
 0x4f8   : > { %v1996_v8 = vmul.f32 1.442695, %v1986_v31  ;;  %v1977_v5 = vpop.xlane.xlu1 %1976 }
 0x4f9   : > { %5912 = vpow2.f32 %v1998_v52  ;;  %v1989_v4 = vsub.f32 %v6608_v44, %v1977_v5  ;;  %v1974_v21 = vpop.xlane.xlu0 %1973 }
 0x4fa   : > { %5914 = vpow2.f32 %v1996_v8  ;;  %v1988_v14 = vsub.f32 %v6600_v33, %v1974_v21 }
 0x4fb   : > { %v2002_v6 = vmul.f32 1.442695, %v1989_v4 }
 0x4fc   : > { %v2000_v3 = vmul.f32 1.442695, %v1988_v14  ;;  %v1983_v0 = vpop.xlane.xlu1 %1982 }
 0x4fd   : > { %5916 = vpow2.f32 %v2002_v6  ;;  %v1991_v15 = vsub.f32 %v6628_v61, %v1983_v0  ;;  %v1980_v30 = vpop.xlane.xlu0 %1979 }
 0x4fe   : > { %5918 = vpow2.f32 %v2000_v3  ;;  %v1990_v23 = vsub.f32 %v6626_v55, %v1980_v30 }
 0x4ff   : > { %v5909_v24 = vpop.eup %5908  ;;  %v2006_v11 = vmul.f32 1.442695, %v1991_v15 }
 0x500   : > { %v5911_v9 = vpop.eup %5910  ;;  %v2004_v49 = vmul.f32 1.442695, %v1990_v23  ;;  %v1933_v26 = vpop.xlane.xlu1 %1932 }
 0x501   : > { %5920 = vpow2.f32 %v2006_v11  ;;  %vm1953_vm6 = vcmp.lt.f32.partialorder %v1933_v26, 41.0  ;;  %v1930_v44 = vpop.xlane.xlu0 %1929  ;;  %v5750_v54 = vpack.c.bf16 %v5909_v24, %v5911_v9 }
 0x502   : > { %5922 = vpow2.f32 %v2004_v49  ;;  %v6719_v33 = vsel %vm1953_vm6, %v5909_v24, 0.0  ;;  %vm1952_vm7 = vcmp.lt.f32.partialorder %v1930_v44, 41.0  ;;  %v6101_v24 = vmov 0  }
 0x503   : > { %v5913_v29 = vpop.eup %5912  ;;  %v6721_v1 = vsel %vm1952_vm7, %v5911_v9, 0.0  ;;  %vm5751_vm8 = vmpackc.low %vm1953_vm6, %vm1952_vm7  ;;  %5806 = vset.pattern.permute.xlu0 %v6101_v24  ;;  %5807 = vset.pattern.permute.xlu1 %v6101_v24 }
 0x504   : > { %v5915_v61 = vpop.eup %5914  ;;  %v1939_v63 = vpop.xlane.xlu1 %1938  ;;  %5752 = vmatprep.subr.msk.bf16.mxu0 %vm5751_vm8, %v5750_v54 }
 0x505   : > { %vm1955_vm11 = vcmp.lt.f32.partialorder %v1939_v63, 41.0  ;;  %5755 = vmatpush3.bf16.msk.msra.mxu0 %vm5751_vm8, %v5750_v54  ;;  %v1936_v55 = vpop.xlane.xlu0 %1935  ;;  %v5756_v36 = vpack.c.bf16 %v5913_v29, %v5915_v61 }
 0x506   : > { %v6723_v42 = vsel %vm1955_vm11, %v5913_v29, 0.0  ;;  %vm1954_vm12 = vcmp.lt.f32.partialorder %v1936_v55, 41.0 }
 0x507   : > { %v5917_v48 = vpop.eup %5916  ;;  %v6725_v2 = vsel %vm1954_vm12, %v5915_v61, 0.0  ;;  %vm5757_vm14 = vmpackc.low %vm1955_vm11, %vm1954_vm12 }
 0x508   : > { %v5919_v31 = vpop.eup %5918  ;;  %v1945_v52 = vpop.xlane.xlu1 %1944  ;;  %5758 = vmatprep.subr.msk.bf16.mxu0 %vm5757_vm14, %v5756_v36 }
 0x509   : > { %vm1957_vm15 = vcmp.lt.f32.partialorder %v1945_v52, 41.0  ;;  %5761 = vmatpush3.bf16.msk.msra.mxu0 %vm5757_vm14, %v5756_v36  ;;  %v1942_v8 = vpop.xlane.xlu0 %1941  ;;  %v5762_v5 = vpack.c.bf16 %v5917_v48, %v5919_v31 }
 0x50a   : > { %v2013_v4 = vsel %vm1957_vm15, %v5917_v48, 0.0  ;;  %vm1956_vm9 = vcmp.lt.f32.partialorder %v1942_v8, 41.0 }
 0x50b   : > { %v5921_v21 = vpop.eup %5920  ;;  %v2012_v14 = vsel %vm1956_vm9, %v5919_v31, 0.0  ;;  %vm5763_vm10 = vmpackc.low %vm1957_vm15, %vm1956_vm9 }
 0x50c   : > { %v5923_v6 = vpop.eup %5922  ;;  %v1951_v3 = vpop.xlane.xlu1 %1950  ;;  %5764 = vmatprep.subr.msk.bf16.mxu0 %vm5763_vm10, %v5762_v5 }
 0x50d   : > { %vm1959_vm13 = vcmp.lt.f32.partialorder %v1951_v3, 41.0  ;;  %5767 = vmatpush3.bf16.msk.msra.mxu0 %vm5763_vm10, %v5762_v5  ;;  %v1948_v0 = vpop.xlane.xlu0 %1947  ;;  %v5768_v15 = vpack.c.bf16 %v5921_v21, %v5923_v6 }
 0x50e   : > { %v2015_v30 = vsel %vm1959_vm13, %v5921_v21, 0.0  ;;  %vm1958_vm0 = vcmp.lt.f32.partialorder %v1948_v0, 41.0 }
 0x50f   : > { %v2014_v23 = vsel %vm1958_vm0, %v5923_v6, 0.0  ;;  %vm5769_vm5 = vmpackc.low %vm1959_vm13, %vm1958_vm0 }
 0x510   : > { %5770 = vmatprep.subr.msk.bf16.mxu0 %vm5769_vm5, %v5768_v15 }
 0x511   : > { %5773 = vmatpush3.bf16.msk.msra.mxu0 %vm5769_vm5, %v5768_v15 }
 0x512   : > { %5462 = vmatprep.subr.bf16.mxu0 %v6098_v18 }
 0x514   : > { %5431 = vmatmul.mubr.msk.f32.vlgmr.msra.gmra.mrb[60].mxu0 %vm1075_vm2, %v6100_v62 }
 0x515   : > { %5433 = vmatprep.mubr.msk.f32.mxu0 %vm1075_vm2, %v6100_v62 }
 0x518   : > { %5434 = vmatmul.mubr.msk.f32.gmra.mrb[62].mxu0 %vm1075_vm2, %v6100_v62 }
 0x519   : > { %5436 = vmatprep.mubr.msk.f32.mxu0 %vm1075_vm2, %v6100_v62 }
 0x51c   : > { %5437 = vmatmul.mubr.msk.f32.gmra.mrb[64].mxu0 %vm1075_vm2, %v6100_v62 }
 0x51d   : > { %5439 = vmatprep.mubr.msk.f32.mxu0 %vm1075_vm2, %v6100_v62 }
 0x520   : > { %5440 = vmatmul.mubr.msk.f32.gmra.mrb[66].mxu0 %vm1075_vm2, %v6100_v62 }
 0x521   : > { %5470 = vmatprep.mubr.msk.bf16.mxu0 %vm6099_vm1, %v6098_v18 }
 0x5e7   : > { %v5432_v11 = vpop.f32.mrb[60].mxu0 }
 0x5e8   : > { %5924 = vrcp.f32 %v5432_v11  ;;  %v2082_v9 = vpop.f32.mrb[61].mxu0 }
 0x5e9   : > { %5926 = vrcp.f32 %v2082_v9  ;;  %v6072_v9 = vld [vmem:[%s7663_s0 + $0x10] ss:$0 sps:$4 sm:$0xff]  }
 0x5eb   : > { %v5435_v49 = vpop.f32.mrb[62].mxu0 }
 0x5ec   : > { %5928 = vrcp.f32 %v5435_v49  ;;  %v2092_v26 = vpop.f32.mrb[63].mxu0  ;;  %v6073_v49 = vld [vmem:[%s7662_s28 + $0x10] ss:$0 sps:$4 sm:$0xff]  }
 0x5ed   : > { %5930 = vrcp.f32 %v2092_v26 }
 0x5ef   : > { %v5438_v44 = vpop.f32.mrb[64].mxu0 }
 0x5f0   : > { %5932 = vrcp.f32 %v5438_v44  ;;  %v2102_v54 = vpop.f32.mrb[65].mxu0 }
 0x5f1   : > { %5934 = vrcp.f32 %v2102_v54 }
 0x5f2   : > { %v5925_v29 = vpop.eup %5924 }
 0x5f3   : > { %v5927_v62 = vpop.eup %5926  ;;  %v5441_v61 = vpop.f32.mrb[66].mxu0  ;;  %v2124_v63 = vmul.f32 %v5925_v29, %v6719_v33 }
 0x5f4   : > { %5936 = vrcp.f32 %v5441_v61  ;;  %v2112_v55 = vpop.f32.mrb[67].mxu0  ;;  %v2122_v36 = vmul.f32 %v5927_v62, %v6721_v1 }
 0x5f5   : > { %5938 = vrcp.f32 %v2112_v55 }
 0x5f6   : > { %v5929_v48 = vpop.eup %5928  ;;  %v2137_v31 = vpack.c.bf16 %v2124_v63, %v2122_v36 }
 0x5f7   : > { %v5931_v52 = vpop.eup %5930  ;;  %v2128_v8 = vmul.f32 %v5929_v48, %v6723_v42 }
 0x5f8   : > { %5443 = vmatpush3.bf16.msra.mxu1 %v2137_v31  ;;  %5463 = vmatpush3.bf16.msra.mxu0 %v2137_v31  ;;  %v2126_v5 = vmul.f32 %v5931_v52, %v6725_v2 }
 0x5f9   : > { %5444 = vmatprep.subr.bf16.mxu1 %v6098_v18  ;;  %5464 = vmatprep.subr.bf16.mxu0 %v6098_v18 }
 0x5fa   : > { %v5933_v21 = vpop.eup %5932  ;;  %v2138_v33 = vpack.c.bf16 %v2128_v8, %v2126_v5 }
 0x5fb   : > { %v5935_v6 = vpop.eup %5934  ;;  %v2132_v3 = vmul.f32 %v5933_v21, %v2013_v4  ;;  %v6068_v4 = vld [vmem:[%s7662_s28] sm:$0xff]  }
 0x5fc   : > { %5445 = vmatpush3.bf16.msra.mxu1 %v2138_v33  ;;  %5465 = vmatpush3.bf16.msra.mxu0 %v2138_v33  ;;  %v2130_v1 = vmul.f32 %v5935_v6, %v2012_v14  ;;  %v6069_v14 = vld [vmem:[%s7663_s0] sm:$0xff]  }
 0x5fd   : > { %5446 = vmatprep.subr.bf16.mxu1 %v6098_v18  ;;  %5466 = vmatprep.subr.bf16.mxu0 %v6098_v18 }
 0x5fe   : > { %v5937_v42 = vpop.eup %5936  ;;  %v2139_v0 = vpack.c.bf16 %v2132_v3, %v2130_v1 }
 0x5ff   : > { %v5939_v15 = vpop.eup %5938  ;;  %v2136_v24 = vmul.f32 %v5937_v42, %v2015_v30  ;;  %v6070_v30 = vld [vmem:[%s7663_s0 + $0x8] sm:$0xff]   ;;  %s6103_s0 = smov 64  }
 0x600   : > { %5447 = vmatpush3.bf16.msra.mxu1 %v2139_v0  ;;  %5467 = vmatpush3.bf16.msra.mxu0 %v2139_v0  ;;  %v2134_v2 = vmul.f32 %v5939_v15, %v2014_v23  ;;  %v6071_v23 = vld [vmem:[%s7662_s28 + $0x8] sm:$0xff]  }
 0x601   : > { %5448 = vmatprep.subr.bf16.mxu1 %v6098_v18  ;;  %5468 = vmatprep.subr.bf16.mxu0 %v6098_v18 }
 0x602   : > { %v2140_v11 = vpack.c.bf16 %v2136_v24, %v2134_v2 }
 0x604   : > { %5449 = vmatpush3.bf16.msra.mxu1 %v2140_v11  ;;  %5469 = vmatpush3.bf16.msra.mxu0 %v2140_v11 }
 0x607   : > { %5451 = vmatmul.mubr.msk.bf16.vlgmr.msra.gmra.mrb[60].mxu1 %vm1075_vm2, %v6068_v4  ;;  %5471 = vmatmul.mubr.msk.bf16.vlgmr.msra.gmra.mrb[68].mxu0 %vm1075_vm2, %v6069_v14 }
 0x608   : > { %5474 = vmatprep.mubr.msk.bf16.mxu0 %vm6099_vm1, %v6098_v18  ;;  %5454 = vmatprep.mubr.msk.bf16.mxu1 %vm6099_vm1, %v6098_v18 }
 0x60f   : > { %5475 = vmatmul.mubr.msk.bf16.gmra.mrb[72].mxu0 %vm1075_vm2, %v6070_v30  ;;  %5455 = vmatmul.mubr.msk.bf16.gmra.mrb[64].mxu1 %vm1075_vm2, %v6071_v23  ;;  %v5888_v23 = vld [vmem:[%s7668_s27] sm:$0xff]  }
 0x610   : > { %5478 = vmatprep.mubr.msk.bf16.mxu0 %vm6099_vm1, %v6098_v18  ;;  %5458 = vmatprep.mubr.msk.bf16.mxu1 %vm6099_vm1, %v6098_v18  ;;  %vm3194_vm1 = vcmask 130048  }
 0x617   : > { %5479 = vmatmul.mubr.msk.bf16.gmra.mrb[76].mxu0 %vm1075_vm2, %v6072_v9  ;;  %5459 = vmatmul.mubr.msk.bf16.gmra.mrb[68].mxu1 %vm1075_vm2, %v6073_v49  ;;  %v5889_v9 = vld [vmem:[%s7669_s7] sm:$0xff]  }
 0x618   : > { %5488 = vmatprep.mubr.msk.bf16.mxu1 %vm1535_vm3, %v5888_v23  ;;  %5502 = vmatprep.mubr.msk.bf16.mxu0 %vm1535_vm3, %v5889_v9 }
 0x6da   : > { %v2175_v26 = vpop.f32.mrb[60].mxu1  ;;  %v2231_v44 = vpop.f32.mrb[68].mxu0 }
 0x6db   : > { %2260 = vperm.xlu0 %5806, %v2175_v26   ;;  %v5452_v54 = vpop.f32.mrb[61].mxu1  ;;  %v5472_v29 = vpop.f32.mrb[69].mxu0  ;;  %v2253_v18 = vsub.f32 0.0, %v2231_v44 }
 0x6dc   : > { %v2178_v62 = vpop.f32.mrb[62].mxu1  ;;  %v2234_v61 = vpop.f32.mrb[70].mxu0 }
 0x6dd   : > { %2265 = vperm.xlu1 %5807, %v2178_v62   ;;  %v5453_v63 = vpop.f32.mrb[63].mxu1  ;;  %v5473_v55 = vpop.f32.mrb[71].mxu0  ;;  %v2254_v31 = vsub.f32 0.0, %v2234_v61 }
 0x6e1   : > { %2290 = vperm.xlu1 %5807, %v2253_v18  }
 0x6e2   : > { %v2183_v36 = vpop.f32.mrb[64].mxu1  ;;  %v2239_v48 = vpop.f32.mrb[72].mxu0 }
 0x6e3   : > { %v5456_v52 = vpop.f32.mrb[65].mxu1  ;;  %v5476_v8 = vpop.f32.mrb[73].mxu0  ;;  %v2255_v11 = vsub.f32 0.0, %v2239_v48 }
 0x6e4   : > { %v2186_v5 = vpop.f32.mrb[66].mxu1  ;;  %v2242_v21 = vpop.f32.mrb[74].mxu0 }
 0x6e5   : > { %2295 = vperm.xlu1 %5807, %v2254_v31   ;;  %v5457_v33 = vpop.f32.mrb[67].mxu1  ;;  %v5477_v6 = vpop.f32.mrb[75].mxu0  ;;  %v2256_v30 = vsub.f32 0.0, %v2242_v21 }
 0x6e9   : > { %2270 = vperm.xlu1 %5807, %v2183_v36  }
 0x6ea   : > { %v2247_v3 = vpop.f32.mrb[76].mxu0  ;;  %v2191_v1 = vpop.f32.mrb[68].mxu1 }
 0x6eb   : > { %v2257_v42 = vsub.f32 0.0, %v2247_v3  ;;  %v5480_v0 = vpop.f32.mrb[77].mxu0  ;;  %v5460_v15 = vpop.f32.mrb[69].mxu1 }
 0x6ec   : > { %v2250_v24 = vpop.f32.mrb[78].mxu0  ;;  %v2194_v2 = vpop.f32.mrb[70].mxu1 }
 0x6ed   : > { %2310 = vperm.xlu0 %5806, %v2257_v42   ;;  %2275 = vperm.xlu1 %5807, %v2186_v5   ;;  %v5481_v4 = vpop.f32.mrb[79].mxu0  ;;  %v5461_v14 = vpop.f32.mrb[71].mxu1 }
 0x6f1   : > { %2300 = vperm.xlu1 %5807, %v2255_v11  }
 0x6f5   : > { %2305 = vperm.xlu1 %5807, %v2256_v30   ;;  %v6811_v30 = vsub.f32 0.0, %v6511_v41 }
 0x6f9   : > { %2280 = vperm.xlu1 %5807, %v2191_v1  }
 0x75a   : > { %v2261_v26 = vpop.permute.xlu0 %2260 }
 0x75b   : > { %v2283_v54 = vmul.f32 %v2261_v26, %v6447_v7  ;;  %v2323_v29 = vmul.f32 %v2261_v26, %v6513_v56 }
 0x75c   : > { %v2266_v49 = vpop.permute.xlu1 %2265 }
 0x75d   : > { %v2284_v36 = vmul.f32 %v2266_v49, %v6473_v20  ;;  %v2324_v48 = vmul.f32 %v2266_v49, %v6515_v57 }
 0x760   : > { %v2291_v44 = vpop.permute.xlu1 %2290 }
 0x761   : > { %v2313_v62 = vmul.f32 %v2291_v44, %v6513_v56  ;;  %v2328_v61 = vmul.f32 %v2291_v44, %v6447_v7 }
 0x763   : > { %v2318_v18 = vadd.f32 %v2313_v62, %v2283_v54  ;;  %v2333_v63 = vsub.f32 %v2323_v29, %v2328_v61 }
 0x764   : > { %v2296_v55 = vpop.permute.xlu1 %2295 }
 0x765   : > { %v2314_v31 = vmul.f32 %v2296_v55, %v6515_v57  ;;  %v2329_v52 = vmul.f32 %v2296_v55, %v6473_v20  ;;  %v5891_v55 = vld [vmem:[%s7669_s7 + $0x8] sm:$0xff]  }
 0x767   : > { %v2319_v8 = vadd.f32 %v2314_v31, %v2284_v36  ;;  %v2334_v5 = vsub.f32 %v2324_v48, %v2329_v52  ;;  %v5892_v36 = vld [vmem:[%s7668_s27 + $0x10] sm:$0xff]   ;;  %v2570_v31 = vpack.c.bf16 %v6421_v51, %v6421_v51  ;;  %v2641_v52 = vpack.c.bf16 %v6433_v39, %v6433_v39 }
 0x768   : > { %v2271_v21 = vpop.permute.xlu1 %2270  ;;  %v5893_v48 = vld [vmem:[%s7669_s7 + $0x10] sm:$0xff]  }
 0x769   : > { %v2346_v33 = vpack.c.bf16 %v2319_v8, %v2318_v18  ;;  %v2457_v6 = vpack.c.bf16 %v2334_v5, %v2333_v63  ;;  %v2285_v3 = vmul.f32 %v2271_v21, %v6487_v25  ;;  %v2325_v1 = vmul.f32 %v2271_v21, %v6521_v47  ;;  %v5890_v63 = vld [vmem:[%s7668_s27 + $0x8] sm:$0xff]  }
 0x76a   : > { %v2572_v51 = vsel %vm1548_vm4, %v2570_v31, 0  ;;  %v2643_v39 = vsel %vm1548_vm4, %v2641_v52, 0 }
 0x76b   : > { %5482 = vmatprep.subr.bf16.mxu1 %v2346_v33  ;;  %5496 = vmatprep.subr.bf16.mxu0 %v2457_v6 }
 0x76c   : > { %5483 = vmatpush3.bf16.msra.mxu1 %v2346_v33  ;;  %5497 = vmatpush3.bf16.msra.mxu0 %v2457_v6  ;;  %v2276_v7 = vpop.permute.xlu1 %2275  ;;  %v2311_v24 = vpop.permute.xlu0 %2310 }
 0x76d   : > { %v2286_v2 = vmul.f32 %v2276_v7, %v6499_v32  ;;  %v2326_v11 = vmul.f32 %v2276_v7, %v6523_v60 }
 0x770   : > { %v2301_v56 = vpop.permute.xlu1 %2300 }
 0x771   : > { %v2315_v42 = vmul.f32 %v2301_v56, %v6521_v47  ;;  %v2330_v57 = vmul.f32 %v2301_v56, %v6487_v25  ;;  %v2317_v47 = vmul.f32 %v2311_v24, %v6811_v30  ;;  %v2332_v25 = vmul.f32 %v2311_v24, %v6509_v37 }
 0x773   : > { %v2320_v20 = vadd.f32 %v2315_v42, %v2285_v3  ;;  %v2335_v0 = vsub.f32 %v2325_v1, %v2330_v57 }
 0x774   : > { %v2306_v15 = vpop.permute.xlu1 %2305 }
 0x775   : > { %v2316_v4 = vmul.f32 %v2306_v15, %v6523_v60  ;;  %v2331_v14 = vmul.f32 %v2306_v15, %v6499_v32 }
 0x777   : > { %v2321_v23 = vadd.f32 %v2316_v4, %v2286_v2  ;;  %v2336_v9 = vsub.f32 %v2326_v11, %v2331_v14 }
 0x778   : > { %v2281_v49 = vpop.permute.xlu1 %2280 }
 0x779   : > { %v2287_v26 = vmul.f32 %v2281_v49, %v6509_v37  ;;  %v2327_v44 = vmul.f32 %v2281_v49, %v6811_v30  ;;  %v2347_v54 = vpack.c.bf16 %v2321_v23, %v2320_v20  ;;  %v2458_v29 = vpack.c.bf16 %v2336_v9, %v2335_v0 }
 0x77b   : > { %v2322_v62 = vadd.f32 %v2317_v47, %v2287_v26  ;;  %v2337_v60 = vsub.f32 %v2327_v44, %v2332_v25  ;;  %5484 = vmatprep.subr.bf16.mxu1 %v2347_v54  ;;  %5498 = vmatprep.subr.bf16.mxu0 %v2458_v29 }
 0x77c   : > { %5485 = vmatpush3.bf16.msra.mxu1 %v2347_v54  ;;  %5499 = vmatpush3.bf16.msra.mxu0 %v2458_v29 }
 0x77d   : > { %v2348_v32 = vpack.c.bf16 %v2322_v62, %v2322_v62  ;;  %v2459_v41 = vpack.c.bf16 %v2337_v60, %v2337_v60 }
 0x77f   : > { %5776 = vmatprep.subr.msk.bf16.mxu1 %vm1548_vm4, %v2348_v32  ;;  %5777 = vmatprep.subr.msk.bf16.mxu0 %vm1548_vm4, %v2459_v41  ;;  %v2382_v61 = vsel %vm1548_vm4, %v2348_v32, 0  ;;  %v2493_v18 = vsel %vm1548_vm4, %v2459_v41, 0 }
 0x780   : > { %5487 = vmatpush3.bf16.msra.mxu1 %v2382_v61  ;;  %5501 = vmatpush3.bf16.msra.mxu0 %v2493_v18 }
 0x781   : > { %5510 = vmatprep.subr.bf16.mxu1 %v6410_v34  ;;  %5524 = vmatprep.subr.bf16.mxu0 %v6412_v38 }
 0x783   : > { %5489 = vmatmul.mubr.msk.bf16.vlgmr.msra.gmra.mrb[72].mxu1 %vm1535_vm3, %v5890_v63  ;;  %5503 = vmatmul.mubr.msk.bf16.vlgmr.msra.gmra.mrb[80].mxu0 %vm1535_vm3, %v5891_v55 }
 0x784   : > { %5511 = vmatpush3.bf16.msra.mxu1 %v6410_v34  ;;  %5525 = vmatpush3.bf16.msra.mxu0 %v6412_v38  ;;  %v5894_v34 = vld [vmem:[%s7668_s27 + $0x18] sm:$0xff]  }
 0x785   : > { %5512 = vmatprep.subr.bf16.mxu1 %v6417_v46  ;;  %5526 = vmatprep.subr.bf16.mxu0 %v6419_v50  ;;  %v5895_v38 = vld [vmem:[%s7669_s7 + $0x18] sm:$0xff]  }
 0x786   : > { %5492 = vmatprep.mubr.msk.bf16.mxu1 %vm1535_vm3, %v5892_v36  ;;  %5506 = vmatprep.mubr.msk.bf16.mxu0 %vm1535_vm3, %v5893_v48 }
 0x788   : > { %5513 = vmatpush3.bf16.msra.mxu1 %v6417_v46  ;;  %5527 = vmatpush3.bf16.msra.mxu0 %v6419_v50  ;;  %v6074_v46 = vld [vmem:[%s7664_s30] sm:$0xff]  }
 0x789   : > { %5778 = vmatprep.subr.msk.bf16.mxu1 %vm1548_vm4, %v2570_v31  ;;  %5779 = vmatprep.subr.msk.bf16.mxu0 %vm1548_vm4, %v2641_v52  ;;  %v6075_v50 = vld [vmem:[%s7665_s4] sm:$0xff]  }
 0x78b   : > { %5493 = vmatmul.mubr.msk.bf16.gmra.mrb[76].mxu1 %vm1535_vm3, %v5894_v34  ;;  %5507 = vmatmul.mubr.msk.bf16.gmra.mrb[84].mxu0 %vm1535_vm3, %v5895_v38 }
 0x78c   : > { %5515 = vmatpush3.bf16.msra.mxu1 %v2572_v51  ;;  %5529 = vmatpush3.bf16.msra.mxu0 %v2643_v39 }
 0x78d   : > { %5538 = vmatprep.subr.bf16.mxu1 %v6423_v10  ;;  %5552 = vmatprep.subr.bf16.mxu0 %v6425_v16 }
 0x78e   : > { %5516 = vmatprep.mubr.msk.bf16.mxu1 %vm1535_vm3, %v6074_v46  ;;  %5530 = vmatprep.mubr.msk.bf16.mxu0 %vm1535_vm3, %v6075_v50 }
 0x793   : > { %5517 = vmatmul.mubr.msk.bf16.vlgmr.msra.gmra.mrb[80].mxu1 %vm1535_vm3, %v6456_v12  ;;  %5531 = vmatmul.mubr.msk.bf16.vlgmr.msra.gmra.mrb[88].mxu0 %vm1535_vm3, %v6461_v13  ;;  %v2720_v12 = vpack.c.bf16 %v6435_v45, %v6435_v45  ;;  %v2791_v13 = vpack.c.bf16 %v6441_v59, %v6441_v59  ;;  %v6078_v45 = vld [vmem:[%s7664_s30 + $0x10] sm:$0xff]  }
 0x794   : > { %5539 = vmatpush3.bf16.msra.mxu1 %v6423_v10  ;;  %5553 = vmatpush3.bf16.msra.mxu0 %v6425_v16  ;;  %v6079_v59 = vld [vmem:[%s7665_s4 + $0x10] sm:$0xff]  }
 0x795   : > { %5540 = vmatprep.subr.bf16.mxu1 %v6428_v40  ;;  %5554 = vmatprep.subr.bf16.mxu0 %v6431_v53  ;;  %v2722_v10 = vsel %vm1548_vm4, %v2720_v12, 0  ;;  %v2793_v16 = vsel %vm1548_vm4, %v2791_v13, 0 }
 0x796   : > { %5520 = vmatprep.mubr.msk.bf16.mxu1 %vm1535_vm3, %v6466_v17  ;;  %5534 = vmatprep.mubr.msk.bf16.mxu0 %vm1535_vm3, %v6471_v19  ;;  %v2870_v17 = vpack.c.bf16 %v6509_v37, %v6509_v37  ;;  %v2941_v19 = vpack.c.bf16 %v6811_v30, %v6811_v30 }
 0x798   : > { %5541 = vmatpush3.bf16.msra.mxu1 %v6428_v40  ;;  %5555 = vmatpush3.bf16.msra.mxu0 %v6431_v53  ;;  %v6076_v40 = vld [vmem:[%s7664_s30 + $0x8] sm:$0xff]  }
 0x799   : > { %5780 = vmatprep.subr.msk.bf16.mxu1 %vm1548_vm4, %v2720_v12  ;;  %5781 = vmatprep.subr.msk.bf16.mxu0 %vm1548_vm4, %v2791_v13  ;;  %v6077_v53 = vld [vmem:[%s7665_s4 + $0x8] sm:$0xff]  }
 0x79b   : > { %5521 = vmatmul.mubr.msk.bf16.gmra.mrb[84].mxu1 %vm1535_vm3, %v6492_v27  ;;  %5535 = vmatmul.mubr.msk.bf16.gmra.mrb[92].mxu0 %vm1535_vm3, %v6497_v28  ;;  %v6081_v27 = vld [vmem:[%s7665_s4 + $0x18] sm:$0xff]   ;;  %v2872_v28 = vsel %vm1548_vm4, %v2870_v17, 0 }
 0x79c   : > { %5543 = vmatpush3.bf16.msra.mxu1 %v2722_v10  ;;  %5557 = vmatpush3.bf16.msra.mxu0 %v2793_v16 }
 0x79d   : > { %5566 = vmatprep.subr.bf16.mxu1 %v6477_v22  ;;  %5580 = vmatprep.subr.bf16.mxu0 %v6519_v58 }
 0x79e   : > { %5544 = vmatprep.mubr.msk.bf16.mxu1 %vm1535_vm3, %v6074_v46  ;;  %5558 = vmatprep.mubr.msk.bf16.mxu0 %vm1535_vm3, %v6075_v50 }
 0x7a3   : > { %5545 = vmatmul.mubr.msk.bf16.vlgmr.msra.gmra.mrb[88].mxu1 %vm1535_vm3, %v6076_v40  ;;  %5559 = vmatmul.mubr.msk.bf16.vlgmr.msra.gmra.mrb[96].mxu0 %vm1535_vm3, %v6077_v53 }
 0x7a4   : > { %5567 = vmatpush3.bf16.msra.mxu1 %v6477_v22  ;;  %5581 = vmatpush3.bf16.msra.mxu0 %v6519_v58  ;;  %v6080_v22 = vld [vmem:[%s7664_s30 + $0x18] sm:$0xff]  }
 0x7a5   : > { %5568 = vmatprep.subr.bf16.mxu1 %v6503_v35  ;;  %5582 = vmatprep.subr.bf16.mxu0 %v6527_v43 }
 0x7a6   : > { %5548 = vmatprep.mubr.msk.bf16.mxu1 %vm1535_vm3, %v6078_v45  ;;  %5562 = vmatprep.mubr.msk.bf16.mxu0 %vm1535_vm3, %v6079_v59 }
 0x7a8   : > { %5569 = vmatpush3.bf16.msra.mxu1 %v6503_v35  ;;  %5583 = vmatpush3.bf16.msra.mxu0 %v6527_v43  ;;  %v2943_v35 = vsel %vm1548_vm4, %v2941_v19, 0 }
 0x7a9   : > { %5782 = vmatprep.subr.msk.bf16.mxu1 %vm1548_vm4, %v2870_v17  ;;  %5783 = vmatprep.subr.msk.bf16.mxu0 %vm1548_vm4, %v2941_v19 }
 0x7ab   : > { %5549 = vmatmul.mubr.msk.bf16.gmra.mrb[92].mxu1 %vm1535_vm3, %v6080_v22  ;;  %5563 = vmatmul.mubr.msk.bf16.gmra.mrb[100].mxu0 %vm1535_vm3, %v6081_v27 }
 0x7ac   : > { %5571 = vmatpush3.bf16.msra.mxu1 %v2872_v28  ;;  %5585 = vmatpush3.bf16.msra.mxu0 %v2943_v35 }
 0x7ad   : > { %5572 = vmatprep.mubr.msk.bf16.mxu1 %vm1535_vm3, %v6074_v46  ;;  %5586 = vmatprep.mubr.msk.bf16.mxu0 %vm1535_vm3, %v6075_v50 }
 0x7b3   : > { %5573 = vmatmul.mubr.msk.bf16.vlgmr.msra.gmra.mrb[96].mxu1 %vm1535_vm3, %v6076_v40  ;;  %5587 = vmatmul.mubr.msk.bf16.vlgmr.msra.gmra.mrb[104].mxu0 %vm1535_vm3, %v6077_v53 }
 0x7b4   : > { %5576 = vmatprep.mubr.msk.bf16.mxu1 %vm1535_vm3, %v6078_v45  ;;  %5590 = vmatprep.mubr.msk.bf16.mxu0 %vm1535_vm3, %v6079_v59 }
 0x7bb   : > { %5577 = vmatmul.mubr.msk.bf16.gmra.mrb[100].mxu1 %vm1535_vm3, %v6080_v22  ;;  %5591 = vmatmul.mubr.msk.bf16.gmra.mrb[108].mxu0 %vm1535_vm3, %v6081_v27 }
 0x856   : > { %v5490_v37 = vpop.f32.mrb[72].mxu1  ;;  %v5504_v58 = vpop.f32.mrb[80].mxu0 }
 0x857   : > { %v2562_v43 = vsub.f32 %v5490_v37, %v5504_v58  ;;  %v2418_v8 = vpop.f32.mrb[73].mxu1  ;;  %v2529_v5 = vpop.f32.mrb[81].mxu0 }
 0x858   : > { %v2560_v21 = vsub.f32 %v2418_v8, %v2529_v5  ;;  %v5491_v33 = vpop.f32.mrb[74].mxu1  ;;  %v5505_v6 = vpop.f32.mrb[82].mxu0 }
 0x859   : > { %v2563_v7 = vsub.f32 %v5491_v33, %v5505_v6  ;;  %v2421_v56 = vpop.f32.mrb[75].mxu1  ;;  %v2532_v3 = vpop.f32.mrb[83].mxu0 }
 0x85a   : > { %v2561_v1 = vsub.f32 %v2421_v56, %v2532_v3 }
 0x85b   : > { %v6947_v42 = vpack.c.bf16 %v2563_v7, %v2562_v43 }
 0x85c   : > { %v6949_v57 = vpack.c.bf16 %v2561_v1, %v2560_v21 }
 0x85e   : > { %v5494_v20 = vpop.f32.mrb[76].mxu1  ;;  %v5508_v0 = vpop.f32.mrb[84].mxu0 }
 0x85f   : > { %v2566_v15 = vsub.f32 %v5494_v20, %v5508_v0  ;;  %v2434_v24 = vpop.f32.mrb[77].mxu1  ;;  %v2545_v2 = vpop.f32.mrb[85].mxu0 }
 0x860   : > { %v2564_v11 = vsub.f32 %v2434_v24, %v2545_v2  ;;  %v5495_v4 = vpop.f32.mrb[78].mxu1  ;;  %v5509_v14 = vpop.f32.mrb[86].mxu0 }
 0x861   : > { %v2567_v30 = vsub.f32 %v5495_v4, %v5509_v14  ;;  %v2437_v23 = vpop.f32.mrb[79].mxu1  ;;  %v2548_v9 = vpop.f32.mrb[87].mxu0 }
 0x862   : > { %v2565_v47 = vsub.f32 %v2437_v23, %v2548_v9 }
 0x863   : > { %v6951_v25 = vpack.c.bf16 %v2567_v30, %v2566_v15 }
 0x864   : > { %v6953_v49 = vpack.c.bf16 %v2565_v47, %v2564_v11 }
 0x866   : > { %v5518_v26 = vpop.f32.mrb[80].mxu1  ;;  %v5532_v44 = vpop.f32.mrb[88].mxu0 }
 0x867   : > { %v6955_v54 = vsub.f32 %v5518_v26, %v5532_v44  ;;  %v2608_v29 = vpop.f32.mrb[81].mxu1  ;;  %v2679_v62 = vpop.f32.mrb[89].mxu0 }
 0x868   : > { %v6957_v60 = vsub.f32 %v2608_v29, %v2679_v62  ;;  %v5519_v32 = vpop.f32.mrb[82].mxu1  ;;  %v5533_v41 = vpop.f32.mrb[90].mxu0 }
 0x869   : > { %v6959_v61 = vsub.f32 %v5519_v32, %v5533_v41  ;;  %v2611_v18 = vpop.f32.mrb[83].mxu1  ;;  %v2682_v63 = vpop.f32.mrb[91].mxu0 }
 0x86a   : > { %v6961_v55 = vsub.f32 %v2611_v18, %v2682_v63 }
 0x86b   : > { %v5833_v36 = vpack.i.bf16 %v6959_v61, %v6955_v54  ;;  %v3051_v48 = vpack.c.bf16 %v6959_v61, %v6955_v54 }
 0x86c   : > { %v5828_v31 = vpack.i.bf16 %v6961_v55, %v6957_v60  ;;  %v3050_v52 = vpack.c.bf16 %v6961_v55, %v6957_v60 }
 0x86e   : > { %v5522_v34 = vpop.f32.mrb[84].mxu1  ;;  %v5536_v38 = vpop.f32.mrb[92].mxu0  ;;  %5610 = vmatprep.mubr.msk.bf16.mxu1 %vm3194_vm1, %v3050_v52 }
 0x86f   : > { %v6972_v51 = vsub.f32 %v5522_v34, %v5536_v38  ;;  %v2624_v39 = vpop.f32.mrb[85].mxu1  ;;  %v2695_v46 = vpop.f32.mrb[93].mxu0 }
 0x870   : > { %v6974_v50 = vsub.f32 %v2624_v39, %v2695_v46  ;;  %v5523_v12 = vpop.f32.mrb[86].mxu1  ;;  %v5537_v13 = vpop.f32.mrb[94].mxu0 }
 0x871   : > { %v6976_v10 = vsub.f32 %v5523_v12, %v5537_v13  ;;  %v2627_v16 = vpop.f32.mrb[87].mxu1  ;;  %v2698_v40 = vpop.f32.mrb[95].mxu0  ;;  %v7031_v13 = vld [vmem:[%s7014_s9 + $0x10] sm:$0xff] }
 0x872   : > { %v6978_v53 = vsub.f32 %v2627_v16, %v2698_v40  ;;  %v7034_v16 = vld [vmem:[%s7014_s9 + $0x18] sm:$0xff] }
 0x873   : > { %v5843_v45 = vpack.i.bf16 %v6976_v10, %v6972_v51  ;;  %v3053_v59 = vpack.c.bf16 %v6976_v10, %v6972_v51  ;;  %v3148_v10 = vsel %vm1075_vm2, %v7031_v13, -1e+09 }
 0x874   : > { %v5838_v17 = vpack.i.bf16 %v6978_v53, %v6974_v50  ;;  %v3052_v19 = vpack.c.bf16 %v6978_v53, %v6974_v50 }
 0x876   : > { %v5546_v22 = vpop.f32.mrb[88].mxu1  ;;  %v5560_v27 = vpop.f32.mrb[96].mxu0 }
 0x877   : > { %v2862_v28 = vsub.f32 %v5546_v22, %v5560_v27  ;;  %v2758_v35 = vpop.f32.mrb[89].mxu1  ;;  %v2829_v37 = vpop.f32.mrb[97].mxu0 }
 0x878   : > { %v2860_v58 = vsub.f32 %v2758_v35, %v2829_v37  ;;  %v5547_v43 = vpop.f32.mrb[90].mxu1  ;;  %v5561_v8 = vpop.f32.mrb[98].mxu0 }
 0x879   : > { %v2863_v5 = vsub.f32 %v5547_v43, %v5561_v8  ;;  %v2761_v21 = vpop.f32.mrb[91].mxu1  ;;  %v2832_v33 = vpop.f32.mrb[99].mxu0 }
 0x87a   : > { %v2861_v6 = vsub.f32 %v2761_v21, %v2832_v33 }
 0x87b   : > { %v5813_v7 = vpack.i.bf16 %v2863_v5, %v2862_v28  ;;  %v3091_v56 = vpack.c.bf16 %v2863_v5, %v2862_v28 }
 0x87c   : > { %v5808_v3 = vpack.i.bf16 %v2861_v6, %v2860_v58  ;;  %v3090_v1 = vpack.c.bf16 %v2861_v6, %v2860_v58 }
 0x87d   : > { %5814 = vrot.lane.b32.xlu0 %v5813_v7, %s6102_s6  ;;  %v3223_v41 = vsel %vm3194_vm1, %v3091_v56, 0 }
 0x87e   : > { %v5564_v20 = vpop.f32.mrb[100].mxu0  ;;  %5809 = vrot.lane.b32.xlu1 %v5808_v3, %s6102_s6  ;;  %v5550_v0 = vpop.f32.mrb[92].mxu1  ;;  %5784 = vmatprep.subr.msk.bf16.mxu1 %vm3194_vm1, %v3090_v1  ;;  %v3220_v15 = vsel %vm3194_vm1, %v3090_v1, 0  ;;  %v7060_v3 = vld [vmem:[%s7014_s9 + $0x28] sm:$0xff] }
 0x87f   : > { %v2866_v24 = vsub.f32 %v5550_v0, %v5564_v20  ;;  %v2774_v2 = vpop.f32.mrb[93].mxu1  ;;  %v2845_v11 = vpop.f32.mrb[101].mxu0  ;;  %5595 = vmatpush3.bf16.xpose.msra.mxu1 %v3220_v15 }
 0x880   : > { %v2864_v4 = vsub.f32 %v2774_v2, %v2845_v11  ;;  %v5551_v14 = vpop.f32.mrb[94].mxu1  ;;  %v5565_v30 = vpop.f32.mrb[102].mxu0  ;;  %5785 = vmatprep.subr.msk.bf16.mxu1 %vm3194_vm1, %v3091_v56  ;;  %v7057_v56 = vld [vmem:[%s7014_s9 + $0x20] sm:$0xff] }
 0x881   : > { %v2867_v23 = vsub.f32 %v5551_v14, %v5565_v30  ;;  %v2848_v9 = vpop.f32.mrb[103].mxu0  ;;  %v2777_v47 = vpop.f32.mrb[95].mxu1  ;;  %v7079_v14 = vld [vmem:[%s7014_s9 + $0x30] sm:$0xff]  ;;  %v7082_v30 = vld [vmem:[%s7014_s9 + $0x38] sm:$0xff] }
 0x882   : > { %v2865_v26 = vsub.f32 %v2777_v47, %v2848_v9 }
 0x883   : > { %v5823_v44 = vpack.i.bf16 %v2867_v23, %v2866_v24  ;;  %v3093_v29 = vpack.c.bf16 %v2867_v23, %v2866_v24 }
 0x884   : > { %v5818_v62 = vpack.i.bf16 %v2865_v26, %v2864_v4  ;;  %v3092_v32 = vpack.c.bf16 %v2865_v26, %v2864_v4 }
 0x885   : > { %5824 = vrot.lane.b32.xlu0 %v5823_v44, %s6102_s6  ;;  %v3229_v63 = vsel %vm3194_vm1, %v3093_v29, 0 }
 0x886   : > { %5819 = vrot.lane.b32.xlu1 %v5818_v62, %s6102_s6  ;;  %v3226_v18 = vsel %vm3194_vm1, %v3092_v32, 0  ;;  %v5574_v60 = vpop.f32.mrb[96].mxu1  ;;  %v5588_v55 = vpop.f32.mrb[104].mxu0 }
 0x887   : > { %5597 = vmatpush3.bf16.xpose.msra.mxu1 %v3223_v41  ;;  %v7022_v52 = vsub.f32 %v5574_v60, %v5588_v55  ;;  %v2908_v34 = vpop.f32.mrb[97].mxu1  ;;  %v2979_v38 = vpop.f32.mrb[105].mxu0 }
 0x888   : > { %5786 = vmatprep.subr.msk.bf16.mxu1 %vm3194_vm1, %v3092_v32  ;;  %v7028_v39 = vsub.f32 %v2908_v34, %v2979_v38  ;;  %v5575_v46 = vpop.f32.mrb[98].mxu1  ;;  %v5589_v12 = vpop.f32.mrb[106].mxu0 }
 0x889   : > { %5834 = vrot.lane.b32.xlu0 %v5833_v36, %s6102_s6  ;;  %v7017_v36 = vld [vmem:[%s7014_s9] sm:$0xff]  ;;  %v7036_v40 = vsub.f32 %v5575_v46, %v5589_v12 }
 0x88a   : > { %5829 = vrot.lane.b32.xlu1 %v5828_v31, %s6102_s6  ;;  %v7020_v31 = vld [vmem:[%s7014_s9 + $0x8] sm:$0xff] }
 0x88b   : > { %v5853_v35 = vpack.i.bf16 %v7036_v40, %v7022_v52  ;;  %v3131_v37 = vpack.c.bf16 %v7036_v40, %v7022_v52 }
 0x88d   : > { %5844 = vrot.lane.b32.xlu0 %v5843_v45, %s6102_s6  ;;  %v2911_v45 = vpop.f32.mrb[99].mxu1 }
 0x88e   : > { %5839 = vrot.lane.b32.xlu1 %v5838_v17, %s6102_s6  ;;  %v2982_v17 = vpop.f32.mrb[107].mxu0  ;;  %v5578_v27 = vpop.f32.mrb[100].mxu1 }
 0x88f   : > { %5599 = vmatpush3.bf16.xpose.msra.mxu1 %v3226_v18  ;;  %v7038_v22 = vsub.f32 %v2911_v45, %v2982_v17  ;;  %v5592_v28 = vpop.f32.mrb[108].mxu0  ;;  %v2924_v43 = vpop.f32.mrb[101].mxu1 }
 0x890   : > { %5787 = vmatprep.subr.msk.bf16.mxu1 %vm3194_vm1, %v3093_v29  ;;  %v7044_v58 = vsub.f32 %v5578_v27, %v5592_v28  ;;  %v2995_v8 = vpop.f32.mrb[109].mxu0  ;;  %v5579_v6 = vpop.f32.mrb[102].mxu1 }
 0x891   : > { %3164 = vrot.lane.b32.xlu0 %v7020_v31, %s6103_s0  ;;  %v5848_v5 = vpack.i.bf16 %v7038_v22, %v7028_v39  ;;  %v3130_v21 = vpack.c.bf16 %v7038_v22, %v7028_v39  ;;  %v7054_v33 = vsub.f32 %v2924_v43, %v2995_v8  ;;  %v5593_v7 = vpop.f32.mrb[110].mxu0  ;;  %v2927_v20 = vpop.f32.mrb[103].mxu1 }
 0x892   : > { %3162 = vrot.lane.b32.xlu1 %v7017_v36, %s6103_s0  ;;  %v7062_v1 = vsub.f32 %v5579_v6, %v5593_v7  ;;  %v2998_v0 = vpop.f32.mrb[111].mxu0 }
 0x893   : > { %5626 = vmatprep.subr.bf16.mxu0 %v3130_v21  ;;  %v7064_v15 = vsub.f32 %v2927_v20, %v2998_v0 }
 0x894   : > { %5627 = vmatpush3.bf16.msra.mxu0 %v3130_v21  ;;  %v5863_v24 = vpack.i.bf16 %v7062_v1, %v7044_v58  ;;  %v3133_v2 = vpack.c.bf16 %v7062_v1, %v7044_v58 }
 0x895   : > { %3168 = vrot.lane.b32.xlu0 %v7034_v16, %s6103_s0  ;;  %v5858_v11 = vpack.i.bf16 %v7064_v15, %v7054_v33  ;;  %v3132_v4 = vpack.c.bf16 %v7064_v15, %v7054_v33  ;;  %5628 = vmatprep.subr.bf16.mxu0 %v3131_v37 }
 0x896   : > { %3166 = vrot.lane.b32.xlu1 %v7031_v13, %s6103_s0  ;;  %v3149_v13 = vsel %vm1075_vm2, %v7034_v16, -1e+09  ;;  %v3153_v16 = vsel %vm1075_vm2, %v7082_v30, -1e+09 }
 0x897   : > { %5601 = vmatpush3.bf16.xpose.msra.mxu1 %v3229_v63 }
 0x898   : > { %5629 = vmatpush3.bf16.msra.mxu0 %v3131_v37 }
 0x899   : > { %3172 = vrot.lane.b32.xlu0 %v7060_v3, %s6103_s0  ;;  %5630 = vmatprep.subr.bf16.mxu0 %v3132_v4 }
 0x89a   : > { %3170 = vrot.lane.b32.xlu1 %v7057_v56, %s6103_s0 }
 0x89c   : > { %5631 = vmatpush3.bf16.msra.mxu0 %v3132_v4 }
 0x89d   : > { %3176 = vrot.lane.b32.xlu0 %v7082_v30, %s6103_s0  ;;  %5632 = vmatprep.subr.bf16.mxu0 %v3133_v2 }
 0x89e   : > { %3174 = vrot.lane.b32.xlu1 %v7079_v14, %s6103_s0 }
 0x8a0   : > { %5633 = vmatpush3.bf16.msra.mxu0 %v3133_v2 }
 0x8ef   : > { %v5815_v23 = vpop.permute.xlu0 %5814 }
 0x8f0   : > { %v5810_v9 = vpop.permute.xlu1 %5809  ;;  %v5817_v44 = vunpack.i.h.bf16 %v5815_v23  ;;  %v5816_v29 = vunpack.i.l.bf16 %v5815_v23  ;;  %v3146_v23 = vsel %vm1075_vm2, %v7017_v36, -1e+09 }
 0x8f1   : > { %v5812_v47 = vunpack.i.h.bf16 %v5810_v9  ;;  %v5811_v26 = vunpack.i.l.bf16 %v5810_v9 }
 0x8f2   : > { %v3095_v32 = vpack.c.bf16 %v5817_v44, %v5816_v29  ;;  %v3147_v29 = vsel %vm1075_vm2, %v7020_v31, -1e+09  ;;  %v3152_v31 = vsel %vm1075_vm2, %v7079_v14, -1e+09  ;;  %v3150_v14 = vsel %vm1075_vm2, %v7057_v56, -1e+09 }
 0x8f3   : > { %v3094_v62 = vpack.c.bf16 %v5812_v47, %v5811_v26 }
 0x8f4   : > { %v3235_v34 = vsel %vm3194_vm1, %v3095_v32, 0 }
 0x8f5   : > { %5788 = vmatprep.subr.msk.bf16.mxu1 %vm3194_vm1, %v3094_v62  ;;  %v3232_v41 = vsel %vm3194_vm1, %v3094_v62, 0 }
 0x8f6   : > { %5603 = vmatpush3.bf16.xpose.msra.mxu1 %v3232_v41 }
 0x8f7   : > { %5789 = vmatprep.subr.msk.bf16.mxu1 %vm3194_vm1, %v3095_v32  ;;  %v5825_v38 = vpop.permute.xlu0 %5824 }
 0x8f8   : > { %v5820_v18 = vpop.permute.xlu1 %5819  ;;  %v5827_v46 = vunpack.i.h.bf16 %v5825_v38  ;;  %v5826_v12 = vunpack.i.l.bf16 %v5825_v38 }
 0x8f9   : > { %v5822_v63 = vunpack.i.h.bf16 %v5820_v18  ;;  %v5821_v60 = vunpack.i.l.bf16 %v5820_v18 }
 0x8fa   : > { %v3097_v45 = vpack.c.bf16 %v5827_v46, %v5826_v12 }
 0x8fb   : > { %v3096_v55 = vpack.c.bf16 %v5822_v63, %v5821_v60  ;;  %v5835_v8 = vpop.permute.xlu0 %5834 }
 0x8fc   : > { %v3241_v27 = vsel %vm3194_vm1, %v3097_v45, 0  ;;  %v5830_v28 = vpop.permute.xlu1 %5829  ;;  %v5837_v54 = vunpack.i.h.bf16 %v5835_v8  ;;  %v5836_v61 = vunpack.i.l.bf16 %v5835_v8 }
 0x8fd   : > { %v3238_v17 = vsel %vm3194_vm1, %v3096_v55, 0  ;;  %v5832_v37 = vunpack.i.h.bf16 %v5830_v28  ;;  %v5831_v43 = vunpack.i.l.bf16 %v5830_v28 }
 0x8fe   : > { %5605 = vmatpush3.bf16.xpose.msra.mxu1 %v3235_v34  ;;  %v3055_v20 = vpack.c.bf16 %v5837_v54, %v5836_v61 }
 0x8ff   : > { %5790 = vmatprep.subr.msk.bf16.mxu1 %vm3194_vm1, %v3096_v55  ;;  %v3054_v21 = vpack.c.bf16 %v5832_v37, %v5831_v43  ;;  %v5845_v50 = vpop.permute.xlu0 %5844 }
 0x900   : > { %v5840_v6 = vpop.permute.xlu1 %5839  ;;  %v5846_v0 = vunpack.i.l.bf16 %v5845_v50 }
 0x901   : > { %v5841_v7 = vunpack.i.l.bf16 %v5840_v6 }
 0x903   : > { %v3165_v63 = vpop.permute.xlu0 %3164 }
 0x904   : > { %v3163_v62 = vpop.permute.xlu1 %3162 }
 0x906   : > { %5607 = vmatpush3.bf16.xpose.msra.mxu1 %v3238_v17 }
 0x907   : > { %5791 = vmatprep.subr.msk.bf16.mxu1 %vm3194_vm1, %v3097_v45  ;;  %v3169_v37 = vpop.permute.xlu0 %3168 }
 0x908   : > { %v3167_v46 = vpop.permute.xlu1 %3166 }
 0x909   : > { %v3188_v61 = vsel %vm1075_vm2, -1e+09, %v3167_v46 }
 0x90e   : > { %5609 = vmatpush3.bf16.xpose.msra.mxu1 %v3241_v27 }
 0x915   : > { %5611 = vmatmul.mubr.msk.bf16.vlgmr.msra.gmra.mrb[104].mxu1 %vm3194_vm1, %v3051_v48  ;;  %v5842_v48 = vunpack.i.h.bf16 %v5840_v6  ;;  %v3171_v6 = vpop.permute.xlu1 %3170 }
 0x916   : > { %5614 = vmatprep.mubr.msk.bf16.mxu1 %vm3194_vm1, %v3052_v19  ;;  %v5847_v19 = vunpack.i.h.bf16 %v5845_v50 }
 0x917   : > { %v3056_v53 = vpack.c.bf16 %v5842_v48, %v5841_v7 }
 0x918   : > { %v3057_v2 = vpack.c.bf16 %v5847_v19, %v5846_v0 }
 0x91d   : > { %5615 = vmatmul.mubr.msk.bf16.gmra.mrb[108].mxu1 %vm3194_vm1, %v3053_v59 }
 0x91e   : > { %5618 = vmatprep.mubr.msk.bf16.mxu1 %vm3194_vm1, %v3054_v21  ;;  %v3151_v21 = vsel %vm1075_vm2, %v7060_v3, -1e+09 }
 0x925   : > { %5619 = vmatmul.mubr.msk.bf16.gmra.mrb[112].mxu1 %vm3194_vm1, %v3055_v20  ;;  %v3173_v20 = vpop.permute.xlu0 %3172 }
 0x926   : > { %5622 = vmatprep.mubr.msk.bf16.mxu1 %vm3194_vm1, %v3056_v53  ;;  %v3189_v53 = vsel %vm1075_vm2, -1e+09, %v3169_v37 }
 0x92d   : > { %5623 = vmatmul.mubr.msk.bf16.gmra.mrb[116].mxu1 %vm3194_vm1, %v3057_v2 }
 0x9e8   : > { %v5612_v51 = vpop.f32.mrb[104].mxu1 }
 0x9e9   : > { %v3342_v59 = vmul.f32 0.25, %v5612_v51  ;;  %v3277_v4 = vpop.f32.mrb[105].mxu1 }
 0x9ea   : > { %v3340_v9 = vmul.f32 0.25, %v3277_v4  ;;  %v5613_v47 = vpop.f32.mrb[106].mxu1  ;;  %v3186_v4 = vsel %vm1075_vm2, -1e+09, %v3163_v62 }
 0x9eb   : > { %v3280_v26 = vpop.f32.mrb[107].mxu1  ;;  %v7116_v44 = vadd.f32 %v3342_v59, %v3148_v10  ;;  %v3343_v32 = vmul.f32 0.25, %v5613_v47  ;;  %v3175_v59 = vpop.permute.xlu1 %3174  ;;  %v3187_v47 = vsel %vm1075_vm2, -1e+09, %v3165_v63  ;;  %v3190_v63 = vsel %vm1075_vm2, -1e+09, %v3171_v6 }
 0x9ec   : > { %v3341_v41 = vmul.f32 0.25, %v3280_v26  ;;  %v7120_v18 = vadd.f32 %v3340_v9, %v3146_v23  ;;  %v3177_v9 = vpop.permute.xlu0 %3176 }
 0x9ed   : > { %3376 = vmax.xlane.f32.xlu0 %v7116_v44  ;;  %v7128_v55 = vadd.f32 %v3343_v32, %v3149_v13 }
 0x9ee   : > { %3372 = vmax.xlane.f32.xlu1 %v7120_v18  ;;  %v7126_v36 = vadd.f32 %v3341_v41, %v3147_v29  ;;  %v3192_v29 = vsel %vm1075_vm2, -1e+09, %v3175_v59 }
 0x9f0   : > { %v5616_v60 = vpop.f32.mrb[108].mxu1 }
 0x9f1   : > { %v3346_v34 = vmul.f32 0.25, %v5616_v60  ;;  %3374 = vmax.xlane.f32.xlu0 %v7126_v36  ;;  %v3293_v38 = vpop.f32.mrb[109].mxu1 }
 0x9f2   : > { %3378 = vmax.xlane.f32.xlu1 %v7128_v55  ;;  %v5617_v12 = vpop.f32.mrb[110].mxu1  ;;  %v3344_v45 = vmul.f32 0.25, %v3293_v38 }
 0x9f3   : > { %v3347_v17 = vmul.f32 0.25, %v5617_v12  ;;  %v3296_v27 = vpop.f32.mrb[111].mxu1  ;;  %v7136_v28 = vadd.f32 %v3346_v34, %v3152_v31  ;;  %v3193_v31 = vsel %vm1075_vm2, -1e+09, %v3177_v9 }
 0x9f4   : > { %v3345_v43 = vmul.f32 0.25, %v3296_v27  ;;  %v7146_v30 = vadd.f32 %v3344_v45, %v3150_v14  ;;  %v3191_v45 = vsel %vm1075_vm2, -1e+09, %v3173_v20  ;;  %vm7671_vm2 = vcmask 261120  }
 0x9f5   : > { %3384 = vmax.xlane.f32.xlu0 %v7136_v28  ;;  %v7141_v8 = vadd.f32 %v3347_v17, %v3153_v16  ;;  %vm7672_vm3 = vmmov %vm7671_vm2 }
 0x9f6   : > { %v7150_v7 = vadd.f32 %v3345_v43, %v3151_v21  ;;  %vm7673_vm4 = vmmov %vm7671_vm2 }
 0x9f7   : > { %3386 = vmax.xlane.f32.xlu1 %v7141_v8  ;;  %vm7674_vm6 = vmmov %vm7671_vm2 }
 0x9f8   : > { %v5620_v54 = vpop.f32.mrb[112].mxu1  ;;  %vm7675_vm7 = vmmov %vm7671_vm2 }
 0x9f9   : > { %v3350_v48 = vmul.f32 0.25, %v5620_v54  ;;  %3380 = vmax.xlane.f32.xlu0 %v7146_v30  ;;  %v3309_v56 = vpop.f32.mrb[113].mxu1  ;;  %vm7676_vm8 = vmmov %vm7671_vm2 }
 0x9fa   : > { %v5621_v50 = vpop.f32.mrb[114].mxu1  ;;  %v3348_v19 = vmul.f32 0.25, %v3309_v56  ;;  %vm7677_vm11 = vmmov %vm7671_vm2 }
 0x9fb   : > { %v3351_v3 = vmul.f32 0.25, %v5621_v50  ;;  %3382 = vmax.xlane.f32.xlu1 %v7150_v7  ;;  %v3312_v0 = vpop.f32.mrb[115].mxu1  ;;  %v7154_v2 = vadd.f32 %v3350_v48, %v3188_v61  ;;  %vm7678_vm12 = vmmov %vm7671_vm2 }
 0x9fc   : > { %v3349_v51 = vmul.f32 0.25, %v3312_v0  ;;  %v7161_v23 = vadd.f32 %v3348_v19, %v3186_v4  ;;  %vm7679_vm14 = vmmov %vm7671_vm2 }
 0x9fd   : > { %3392 = vmax.xlane.f32.xlu0 %v7154_v2  ;;  %v7157_v10 = vadd.f32 %v3351_v3, %v3189_v53  ;;  %vm7680_vm15 = vmmov %vm7671_vm2 }
 0x9fe   : > { %v7166_v13 = vadd.f32 %v3349_v51, %v3187_v47  ;;  %vm7681_vm9 = vmmov %vm7671_vm2 }
 0x9ff   : > { %3394 = vmax.xlane.f32.xlu1 %v7157_v10  ;;  %vm7682_vm10 = vmmov %vm7671_vm2 }
 0xa00   : > { %v5624_v26 = vpop.f32.mrb[116].mxu1  ;;  %vm7683_vm13 = vmmov %vm7671_vm2 }
 0xa01   : > { %v3354_v32 = vmul.f32 0.25, %v5624_v26  ;;  %3388 = vmax.xlane.f32.xlu0 %v7161_v23  ;;  %v3325_v41 = vpop.f32.mrb[117].mxu1  ;;  %vm7684_vm0 = vmmov %vm7671_vm2 }
 0xa02   : > { %v5625_v60 = vpop.f32.mrb[118].mxu1  ;;  %v3352_v62 = vmul.f32 0.25, %v3325_v41  ;;  %vm7685_vm5 = vmmov %vm7684_vm0 }
 0xa03   : > { %v3355_v34 = vmul.f32 0.25, %v5625_v60  ;;  %3390 = vmax.xlane.f32.xlu1 %v7166_v13  ;;  %v3328_v38 = vpop.f32.mrb[119].mxu1  ;;  %v7170_v46 = vadd.f32 %v3354_v32, %v3192_v29 }
 0xa04   : > { %v3353_v12 = vmul.f32 0.25, %v3328_v38  ;;  %v7178_v17 = vadd.f32 %v3352_v62, %v3190_v63 }
 0xa05   : > { %3400 = vmax.xlane.f32.xlu0 %v7170_v46  ;;  %v7174_v16 = vadd.f32 %v3355_v34, %v3193_v31 }
 0xa06   : > { %v7181_v27 = vadd.f32 %v3353_v12, %v3191_v45 }
 0xa07   : > { %3402 = vmax.xlane.f32.xlu1 %v7174_v16 }
 0xa09   : > { %3396 = vmax.xlane.f32.xlu0 %v7178_v17 }
 0xa0b   : > { %3398 = vmax.xlane.f32.xlu1 %v7181_v27 }
 0xa1c   : > { %5854 = vrot.lane.b32.xlu1 %v5853_v35, %s6102_s6 }
 0xa1f   : > { %5849 = vrot.lane.b32.xlu0 %v5848_v5, %s6102_s6 }
 0xa7a   : > { %v3377_v37 = vpop.xlane.xlu0 %3376 }
 0xa7b   : > { %v3406_v14 = vsub.f32 %v7116_v44, %v3377_v37  ;;  %v3373_v43 = vpop.xlane.xlu1 %3372 }
 0xa7c   : > { %v3404_v21 = vsub.f32 %v7120_v18, %v3373_v43 }
 0xa7d   : > { %v3424_v6 = vmul.f32 1.442695, %v3406_v14 }
 0xa7e   : > { %v3375_v54 = vpop.xlane.xlu0 %3374  ;;  %v3420_v61 = vmul.f32 1.442695, %v3404_v21 }
 0xa7f   : > { %5940 = vpow2.f32 %v3424_v6  ;;  %v3379_v48 = vpop.xlane.xlu1 %3378  ;;  %v3405_v56 = vsub.f32 %v7126_v36, %v3375_v54 }
 0xa80   : > { %v3407_v52 = vsub.f32 %v7128_v55, %v3379_v48  ;;  %5942 = vpow2.f32 %v3420_v61 }
 0xa81   : > { %v3422_v22 = vmul.f32 1.442695, %v3405_v56 }
 0xa82   : > { %v3426_v40 = vmul.f32 1.442695, %v3407_v52  ;;  %v3385_v35 = vpop.xlane.xlu0 %3384 }
 0xa83   : > { %v3410_v39 = vsub.f32 %v7136_v28, %v3385_v35 }
 0xa84   : > { %5944 = vpow2.f32 %v3426_v40  ;;  %v3387_v5 = vpop.xlane.xlu1 %3386 }
 0xa85   : > { %v3432_v44 = vmul.f32 1.442695, %v3410_v39  ;;  %v3411_v18 = vsub.f32 %v7141_v8, %v3387_v5 }
 0xa86   : > { %v3381_v20 = vpop.xlane.xlu0 %3380 }
 0xa87   : > { %5946 = vpow2.f32 %v3432_v44  ;;  %v3408_v50 = vsub.f32 %v7146_v30, %v3381_v20  ;;  %v3434_v53 = vmul.f32 1.442695, %v3411_v18 }
 0xa88   : > { %5948 = vpow2.f32 %v3422_v22  ;;  %v3383_v36 = vpop.xlane.xlu1 %3382 }
 0xa89   : > { %v7199_v19 = vpop.eup %5940  ;;  %v3428_v55 = vmul.f32 1.442695, %v3408_v50  ;;  %v3409_v3 = vsub.f32 %v7150_v7, %v3383_v36 }
 0xa8a   : > { %v3393_v0 = vpop.xlane.xlu0 %3392  ;;  %3456 = vadd.xlane.f32.xlu0 %v7199_v19  ;;  %v7204_v59 = vpop.eup %5942 }
 0xa8b   : > { %5950 = vpow2.f32 %v3428_v55  ;;  %v3414_v28 = vsub.f32 %v7154_v2, %v3393_v0  ;;  %v3430_v8 = vmul.f32 1.442695, %v3409_v3 }
 0xa8c   : > { %5952 = vpow2.f32 %v3434_v53  ;;  %v3395_v51 = vpop.xlane.xlu1 %3394 }
 0xa8d   : > { %v3440_v30 = vmul.f32 1.442695, %v3414_v28  ;;  %v3415_v47 = vsub.f32 %v7157_v10, %v3395_v51 }
 0xa8e   : > { %v7206_v4 = vpop.eup %5944  ;;  %v3389_v9 = vpop.xlane.xlu0 %3388  ;;  %3452 = vadd.xlane.f32.xlu0 %v7204_v59 }
 0xa8f   : > { %5954 = vpow2.f32 %v3440_v30  ;;  %v3412_v7 = vsub.f32 %v7161_v23, %v3389_v9  ;;  %3458 = vadd.xlane.f32.xlu1 %v7206_v4  ;;  %v3442_v23 = vmul.f32 1.442695, %v3415_v47 }
 0xa90   : > { %5956 = vpow2.f32 %v3430_v8  ;;  %v3391_v2 = vpop.xlane.xlu1 %3390 }
 0xa91   : > { %v7212_v26 = vpop.eup %5946  ;;  %v3436_v29 = vmul.f32 1.442695, %v3412_v7  ;;  %v3413_v32 = vsub.f32 %v7166_v13, %v3391_v2 }
 0xa92   : > { %v7215_v41 = vpop.eup %5948  ;;  %v3401_v60 = vpop.xlane.xlu0 %3400  ;;  %3464 = vadd.xlane.f32.xlu0 %v7212_v26 }
 0xa93   : > { %5958 = vpow2.f32 %v3436_v29  ;;  %v3438_v31 = vmul.f32 1.442695, %v3413_v32  ;;  %3454 = vadd.xlane.f32.xlu1 %v7215_v41  ;;  %v3418_v39 = vsub.f32 %v7170_v46, %v3401_v60 }
 0xa94   : > { %v3403_v62 = vpop.xlane.xlu1 %3402 }
 0xa95   : > { %v7219_v34 = vpop.eup %5950  ;;  %5960 = vpow2.f32 %v3438_v31  ;;  %v3419_v5 = vsub.f32 %v7174_v16, %v3403_v62  ;;  %v3448_v18 = vmul.f32 1.442695, %v3418_v39 }
 0xa96   : > { %v7221_v10 = vpop.eup %5952  ;;  %3460 = vadd.xlane.f32.xlu0 %v7219_v34  ;;  %v3397_v38 = vpop.xlane.xlu0 %3396  ;;  %5962 = vpow2.f32 %v3442_v23 }
 0xa97   : > { %3466 = vadd.xlane.f32.xlu1 %v7221_v10  ;;  %v3416_v35 = vsub.f32 %v7178_v17, %v3397_v38  ;;  %v3450_v20 = vmul.f32 1.442695, %v3419_v5 }
 0xa98   : > { %v3399_v13 = vpop.xlane.xlu1 %3398 }
 0xa99   : > { %v7225_v63 = vpop.eup %5954  ;;  %v3417_v40 = vsub.f32 %v7181_v27, %v3399_v13  ;;  %v3444_v44 = vmul.f32 1.442695, %v3416_v35 }
 0xa9a   : > { %v7227_v12 = vpop.eup %5956  ;;  %3472 = vadd.xlane.f32.xlu0 %v7225_v63  ;;  %v5850_v45 = vpop.permute.xlu0 %5849 }
 0xa9b   : > { %v5852_v37 = vunpack.i.h.bf16 %v5850_v45  ;;  %v5851_v14 = vunpack.i.l.bf16 %v5850_v45  ;;  %3462 = vadd.xlane.f32.xlu1 %v7227_v12  ;;  %v3446_v22 = vmul.f32 1.442695, %v3417_v40 }
 0xa9c   : > { %v5855_v43 = vpop.permute.xlu1 %5854 }
 0xa9d   : > { %v7231_v21 = vpop.eup %5958  ;;  %v3134_v6 = vpack.c.bf16 %v5852_v37, %v5851_v14  ;;  %v5857_v54 = vunpack.i.h.bf16 %v5855_v43  ;;  %v5856_v61 = vunpack.i.l.bf16 %v5855_v43  ;;  %5964 = vpow2.f32 %v3446_v22  ;;  %v5896_v37 = vld [vmem:[%s7628_s14] sm:$0xff]  }
 0xa9e   : > { %5966 = vpow2.f32 %v3444_v44 }
 0xa9f   : > { %v7233_v48 = vpop.eup %5960  ;;  %v3135_v56 = vpack.c.bf16 %v5857_v54, %v5856_v61  ;;  %5634 = vmatprep.subr.bf16.mxu0 %v3134_v6  ;;  %3468 = vadd.xlane.f32.xlu1 %v7231_v21  ;;  %5968 = vpow2.f32 %v3448_v18 }
 0xaa0   : > { %3470 = vadd.xlane.f32.xlu0 %v7233_v48  ;;  %5635 = vmatpush3.bf16.msra.mxu0 %v3134_v6  ;;  %v7237_v52 = vpop.eup %5962  ;;  %5970 = vpow2.f32 %v3450_v20 }
 0xaa1   : > { %5636 = vmatprep.subr.bf16.mxu0 %v3135_v56 }
 0xaa3   : > { %3474 = vadd.xlane.f32.xlu1 %v7237_v52 }
 0xaa4   : > { %5637 = vmatpush3.bf16.msra.mxu0 %v3135_v56 }
 0xaa7   : > { %v7252_v58 = vpop.eup %5964 }
 0xaa8   : > { %v7255_v33 = vpop.eup %5966 }
 0xaa9   : > { %v7257_v1 = vpop.eup %5968 }
 0xaaa   : > { %v7261_v15 = vpop.eup %5970 }
 0xab4   : > { %5864 = vrot.lane.b32.xlu1 %v5863_v24, %s6102_s6  ;;  %v7267_v24 = vld [vmem:[%s7628_s14 + $0x8] sm:$0xff]  }
 0xab5   : > { %5680 = vmatprep.subr.bf16.mxu1 %v7267_v24 }
 0xab6   : > { %5859 = vrot.lane.b32.xlu0 %v5858_v11, %s6102_s6  ;;  %5681 = vmatpush3.bf16.msra.mxu1 %v7267_v24 }
 0xad5   : > { %3478 = vadd.xlane.f32.xlu0 %v7252_v58 }
 0xad8   : > { %3476 = vadd.xlane.f32.xlu1 %v7255_v33 }
 0xad9   : > { %3480 = vadd.xlane.f32.xlu0 %v7257_v1 }
 0xadc   : > { %3482 = vadd.xlane.f32.xlu1 %v7261_v15 }
 0xb17   : > { %v3457_v11 = vpop.xlane.xlu0 %3456 }
 0xb1b   : > { %v3453_v46 = vpop.xlane.xlu0 %3452 }
 0xb1c   : > { %v3459_v16 = vpop.xlane.xlu1 %3458  ;;  %5972 = vrcp.f32 %v3453_v46 }
 0xb1f   : > { %v3465_v17 = vpop.xlane.xlu0 %3464 }
 0xb20   : > { %v3455_v27 = vpop.xlane.xlu1 %3454 }
 0xb21   : > { %5974 = vrcp.f32 %v3455_v27 }
 0xb22   : > { %5976 = vrcp.f32 %v3459_v16 }
 0xb23   : > { %v3461_v50 = vpop.xlane.xlu0 %3460 }
 0xb24   : > { %v3467_v53 = vpop.xlane.xlu1 %3466 }
 0xb26   : > { %v5973_v55 = vpop.eup %5972 }
 0xb27   : > { %v3473_v3 = vpop.xlane.xlu0 %3472  ;;  %v3500_v8 = vmul.f32 %v5973_v55, %v7204_v59 }
 0xb28   : > { %v3463_v36 = vpop.xlane.xlu1 %3462 }
 0xb29   : > { %5978 = vrcp.f32 %v3463_v36 }
 0xb2a   : > { %5980 = vrcp.f32 %v3457_v11 }
 0xb2b   : > { %v5975_v0 = vpop.eup %5974  ;;  %5982 = vrcp.f32 %v3461_v50 }
 0xb2c   : > { %v3469_v28 = vpop.xlane.xlu1 %3468  ;;  %v3501_v51 = vmul.f32 %v5975_v0, %v7215_v41  ;;  %5984 = vrcp.f32 %v3467_v53  ;;  %v5977_v31 = vpop.eup %5976 }
 0xb2d   : > { %v3471_v30 = vpop.xlane.xlu0 %3470  ;;  %5986 = vrcp.f32 %v3469_v28  ;;  %v3503_v45 = vmul.f32 %v5977_v31, %v7206_v4 }
 0xb2e   : > { %v3516_v9 = vpack.c.bf16 %v3501_v51, %v3500_v8  ;;  %5988 = vrcp.f32 %v3471_v30 }
 0xb2f   : > { %5990 = vrcp.f32 %v3465_v17 }
 0xb30   : > { %5642 = vmatprep.mubr.bf16.mxu0 %v3516_v9  ;;  %v3475_v7 = vpop.xlane.xlu1 %3474 }
 0xb31   : > { %v5860_v47 = vpop.permute.xlu0 %5859  ;;  %5992 = vrcp.f32 %v3475_v7 }
 0xb32   : > { %v5862_v2 = vunpack.i.h.bf16 %v5860_v47  ;;  %v5861_v29 = vunpack.i.l.bf16 %v5860_v47  ;;  %5994 = vrcp.f32 %v3473_v3 }
 0xb33   : > { %v5979_v62 = vpop.eup %5978 }
 0xb34   : > { %v3136_v32 = vpack.c.bf16 %v5862_v2, %v5861_v29  ;;  %v5865_v60 = vpop.permute.xlu1 %5864  ;;  %v5981_v41 = vpop.eup %5980  ;;  %v3505_v14 = vmul.f32 %v5979_v62, %v7227_v12 }
 0xb35   : > { %v5867_v23 = vunpack.i.h.bf16 %v5865_v60  ;;  %v5866_v59 = vunpack.i.l.bf16 %v5865_v60  ;;  %v5983_v13 = vpop.eup %5982  ;;  %v3502_v43 = vmul.f32 %v5981_v41, %v7199_v19 }
 0xb36   : > { %5638 = vmatprep.subr.bf16.mxu0 %v3136_v32  ;;  %v3504_v6 = vmul.f32 %v5983_v13, %v7219_v34  ;;  %v5985_v54 = vpop.eup %5984 }
 0xb37   : > { %v3137_v38 = vpack.c.bf16 %v5867_v23, %v5866_v59  ;;  %5639 = vmatpush3.bf16.msra.mxu0 %v3136_v32  ;;  %v3517_v61 = vpack.c.bf16 %v3503_v45, %v3502_v43  ;;  %v5987_v56 = vpop.eup %5986  ;;  %v3507_v39 = vmul.f32 %v5985_v54, %v7221_v10 }
 0xb38   : > { %v3518_v40 = vpack.c.bf16 %v3505_v14, %v3504_v6  ;;  %v5989_v4 = vpop.eup %5988  ;;  %v3508_v19 = vmul.f32 %v5987_v56, %v7231_v21 }
 0xb39   : > { %5640 = vmatprep.subr.bf16.mxu0 %v3137_v38  ;;  %v5991_v35 = vpop.eup %5990  ;;  %v3509_v12 = vmul.f32 %v5989_v4, %v7233_v48 }
 0xb3a   : > { %v3506_v34 = vmul.f32 %v5991_v35, %v7212_v26 }
 0xb3b   : > { %5641 = vmatpush3.bf16.msra.mxu0 %v3137_v38  ;;  %v5993_v5 = vpop.eup %5992  ;;  %v3520_v44 = vpack.c.bf16 %v3509_v12, %v3508_v19 }
 0xb3c   : > { %5658 = vmatprep.subr.bf16.mxu0 %v5896_v37  ;;  %v3519_v22 = vpack.c.bf16 %v3507_v39, %v3506_v34  ;;  %v5995_v18 = vpop.eup %5994  ;;  %v3511_v20 = vmul.f32 %v5993_v5, %v7237_v52 }
 0xb3d   : > { %v3510_v10 = vmul.f32 %v5995_v18, %v7225_v63 }
 0xb3e   : > { %5643 = vmatmul.mubr.bf16.vlgmr.msra.gmra.mrb[112].mxu0 %v3517_v61 }
 0xb3f   : > { %5646 = vmatprep.mubr.bf16.mxu0 %v3518_v40  ;;  %5659 = vmatpush3.bf16.msra.mxu0 %v5896_v37  ;;  %v3521_v11 = vpack.c.bf16 %v3511_v20, %v3510_v10 }
 0xb40   : > { %5660 = vmatprep.subr.bf16.mxu0 %v7267_v24 }
 0xb43   : > { %5661 = vmatpush3.bf16.msra.mxu0 %v7267_v24 }
 0xb44   : > { %5670 = vmatprep.subr.bf16.mxu0 %v5896_v37 }
 0xb46   : > { %5647 = vmatmul.mubr.bf16.gmra.mrb[116].mxu0 %v3519_v22 }
 0xb47   : > { %5650 = vmatprep.mubr.bf16.mxu0 %v3520_v44 }
 0xb4e   : > { %5651 = vmatmul.mubr.bf16.gmra.mrb[120].mxu0 %v3521_v11 }
 0xb62   : > { %v3479_v21 = vpop.xlane.xlu0 %3478 }
 0xb63   : > { %5996 = vrcp.f32 %v3479_v21 }
 0xb65   : > { %v3477_v48 = vpop.xlane.xlu1 %3476 }
 0xb66   : > { %5998 = vrcp.f32 %v3477_v48  ;;  %v3481_v26 = vpop.xlane.xlu0 %3480 }
 0xb67   : > { %6000 = vrcp.f32 %v3481_v26 }
 0xb69   : > { %v3483_v24 = vpop.xlane.xlu1 %3482 }
 0xb6a   : > { %6002 = vrcp.f32 %v3483_v24 }
 0xb6d   : > { %v5997_v46 = vpop.eup %5996 }
 0xb6e   : > { %v3513_v27 = vmul.f32 %v5997_v46, %v7252_v58 }
 0xb70   : > { %v5999_v16 = vpop.eup %5998 }
 0xb71   : > { %v3512_v17 = vmul.f32 %v5999_v16, %v7255_v33  ;;  %v6001_v50 = vpop.eup %6000 }
 0xb72   : > { %v3514_v63 = vmul.f32 %v6001_v50, %v7257_v1 }
 0xb73   : > { %v3522_v52 = vpack.c.bf16 %v3513_v27, %v3512_v17 }
 0xb74   : > { %v6003_v53 = vpop.eup %6002 }
 0xb75   : > { %5654 = vmatprep.mubr.bf16.mxu0 %v3522_v52  ;;  %v3515_v36 = vmul.f32 %v6003_v53, %v7261_v15 }
 0xb77   : > { %v3523_v55 = vpack.c.bf16 %v3515_v36, %v3514_v63 }
 0xb79   : > { %5655 = vmatmul.mubr.bf16.gmra.mrb[124].mxu0 %v3523_v55 }
 0xb7a   : > { %5662 = vmatprep.mubr.msk.bf16.mxu0 %vm7671_vm2, %v6949_v57  ;;  %vm7687_vm2 = vmmov %vm7684_vm0 }
 0xb81   : > { %5663 = vmatmul.mubr.msk.bf16.vlgmr.msra.gmra.mrb[128].mxu0 %vm7672_vm3, %v6947_v42  ;;  %vm7688_vm3 = vmmov %vm7684_vm0 }
 0xb82   : > { %5666 = vmatprep.mubr.msk.bf16.mxu0 %vm7673_vm4, %v6953_v49  ;;  %5671 = vmatpush3.bf16.msra.mxu0 %v5896_v37  ;;  %vm7689_vm4 = vmmov %vm7684_vm0 }
 0xb89   : > { %5667 = vmatmul.mubr.msk.bf16.gmra.mrb[132].mxu0 %vm7674_vm6, %v6951_v25  ;;  %vm7690_vm6 = vmmov %vm7684_vm0 }
 0xc11   : > { %v5644_v58 = vpop.f32.mrb[112].mxu0 }
 0xc12   : > { %v3558_v33 = vpop.f32.mrb[113].mxu0 }
 0xc13   : > { %v5645_v1 = vpop.f32.mrb[114].mxu0 }
 0xc14   : > { %v3727_v3 = vpack.c.bf16 %v5645_v1, %v5644_v58  ;;  %v3561_v15 = vpop.f32.mrb[115].mxu0 }
 0xc15   : > { %v3726_v0 = vpack.c.bf16 %v3561_v15, %v3558_v33 }
 0xc17   : > { %5672 = vmatprep.mubr.msk.bf16.mxu0 %vm3194_vm1, %v3726_v0 }
 0xc18   : > { %5673 = vmatmul.mubr.msk.bf16.vlgmr.msra.gmra.mrb[136].mxu0 %vm3194_vm1, %v3727_v3 }
 0xc19   : > { %v5648_v57 = vpop.f32.mrb[116].mxu0 }
 0xc1a   : > { %v3574_v28 = vpop.f32.mrb[117].mxu0 }
 0xc1b   : > { %v5649_v42 = vpop.f32.mrb[118].mxu0 }
 0xc1c   : > { %v3729_v8 = vpack.c.bf16 %v5649_v42, %v5648_v57  ;;  %v3577_v51 = vpop.f32.mrb[119].mxu0  ;;  %v4934_v42 = vld [vmem:[%s7629_s15] ss:$0 sm:$0xff] }
 0xc1d   : > { %v3728_v49 = vpack.c.bf16 %v3577_v51, %v3574_v28 }
 0xc1f   : > { %5676 = vmatprep.mubr.msk.bf16.mxu0 %vm3194_vm1, %v3728_v49 }
 0xc20   : > { %5677 = vmatmul.mubr.msk.bf16.gmra.mrb[140].mxu0 %vm3194_vm1, %v3729_v8 }
 0xc21   : > { %v5652_v25 = vpop.f32.mrb[120].mxu0 }
 0xc22   : > { %v3590_v30 = vpop.f32.mrb[121].mxu0 }
 0xc23   : > { %v5653_v9 = vpop.f32.mrb[122].mxu0 }
 0xc24   : > { %v3824_v7 = vpack.c.bf16 %v5653_v9, %v5652_v25  ;;  %v3593_v47 = vpop.f32.mrb[123].mxu0 }
 0xc25   : > { %v3823_v2 = vpack.c.bf16 %v3593_v47, %v3590_v30 }
 0xc27   : > { %5682 = vmatprep.mubr.msk.bf16.mxu1 %vm3194_vm1, %v3823_v2 }
 0xc28   : > { %5683 = vmatmul.mubr.msk.bf16.vlgmr.msra.gmra.mrb[120].mxu1 %vm3194_vm1, %v3824_v7  ;;  %v6082_v7 = vld [vmem:[%s6258_s2] sm:$0xff] }
 0xc4c   : > { %v5656_v29 = vpop.f32.mrb[124].mxu0 }
 0xc4d   : > { %v3606_v32 = vpop.f32.mrb[125].mxu0 }
 0xc4e   : > { %v5657_v60 = vpop.f32.mrb[126].mxu0 }
 0xc4f   : > { %v3826_v31 = vpack.c.bf16 %v5657_v60, %v5656_v29  ;;  %v3609_v23 = vpop.f32.mrb[127].mxu0  ;;  %v6083_v60 = vld [vmem:[%s6258_s2 + $0x8] sm:$0xff] }
 0xc50   : > { %v3825_v59 = vpack.c.bf16 %v3609_v23, %v3606_v32  ;;  %v6084_v23 = vld [vmem:[%s6258_s2 + $0x10] sm:$0xff] }
 0xc52   : > { %5686 = vmatprep.mubr.msk.bf16.mxu1 %vm3194_vm1, %v3825_v59 }
 0xc53   : > { %5687 = vmatmul.mubr.msk.bf16.gmra.mrb[124].mxu1 %vm3194_vm1, %v3826_v31  ;;  %vm7686_vm1 = vmmov %vm7684_vm0 }
 0xc54   : > { %v5664_v62 = vpop.f32.mrb[128].mxu0 }
 0xc55   : > { %v3687_v41 = vpop.f32.mrb[129].mxu0  ;;  %v3720_v54 = vmul.f32 0.5, %v5664_v62 }
 0xc56   : > { %v5665_v38 = vpop.f32.mrb[130].mxu0  ;;  %v3718_v40 = vmul.f32 0.5, %v3687_v41  ;;  %v6085_v41 = vld [vmem:[%s6258_s2 + $0x18] sm:$0xff] }
 0xc57   : > { %v3690_v13 = vpop.f32.mrb[131].mxu0  ;;  %v3721_v39 = vmul.f32 0.5, %v5665_v38 }
 0xc58   : > { %v3719_v22 = vmul.f32 0.5, %v3690_v13 }
 0xc5c   : > { %v5668_v45 = vpop.f32.mrb[132].mxu0 }
 0xc5d   : > { %v3703_v37 = vpop.f32.mrb[133].mxu0  ;;  %v3724_v11 = vmul.f32 0.5, %v5668_v45 }
 0xc5e   : > { %v5669_v14 = vpop.f32.mrb[134].mxu0  ;;  %v3722_v26 = vmul.f32 0.5, %v3703_v37 }
 0xc5f   : > { %v3706_v43 = vpop.f32.mrb[135].mxu0  ;;  %v3725_v16 = vmul.f32 0.5, %v5669_v14 }
 0xc60   : > { %v3723_v52 = vmul.f32 0.5, %v3706_v43 }
 0xceb   : > { %v5674_v6 = vpop.f32.mrb[136].mxu0 }
 0xcec   : > { %v3809_v61 = vmul.f32 0.5, %v5674_v6  ;;  %v3776_v56 = vpop.f32.mrb[137].mxu0 }
 0xced   : > { %v3807_v4 = vmul.f32 0.5, %v3776_v56  ;;  %v5675_v35 = vpop.f32.mrb[138].mxu0 }
 0xcee   : > { %v3817_v19 = vadd.f32 %v3809_v61, %v3720_v54  ;;  %v3810_v12 = vmul.f32 0.5, %v5675_v35  ;;  %v3779_v34 = vpop.f32.mrb[139].mxu0 }
 0xcef   : > { %v3815_v5 = vadd.f32 %v3807_v4, %v3718_v40  ;;  %v3808_v44 = vmul.f32 0.5, %v3779_v34 }
 0xcf0   : > { %v3818_v18 = vadd.f32 %v3810_v12, %v3721_v39 }
 0xcf1   : > { %v3816_v20 = vadd.f32 %v3808_v44, %v3719_v22 }
 0xcf3   : > { %v5678_v10 = vpop.f32.mrb[140].mxu0 }
 0xcf4   : > { %v3813_v21 = vmul.f32 0.5, %v5678_v10  ;;  %v3792_v48 = vpop.f32.mrb[141].mxu0  ;;  %v6087_v10 = vld [vmem:[%s6258_s2 + $0x28] sm:$0xff] }
 0xcf5   : > { %v3811_v24 = vmul.f32 0.5, %v3792_v48  ;;  %v5679_v46 = vpop.f32.mrb[142].mxu0 }
 0xcf6   : > { %v3821_v17 = vadd.f32 %v3813_v21, %v3724_v11  ;;  %v3814_v27 = vmul.f32 0.5, %v5679_v46  ;;  %v3795_v50 = vpop.f32.mrb[143].mxu0  ;;  %v6088_v21 = vld [vmem:[%s6258_s2 + $0x30] sm:$0xff] }
 0xcf7   : > { %v3819_v53 = vadd.f32 %v3811_v24, %v3722_v26  ;;  %v3812_v63 = vmul.f32 0.5, %v3795_v50  ;;  %v6089_v24 = vld [vmem:[%s6258_s2 + $0x38] sm:$0xff] }
 0xcf8   : > { %v3822_v36 = vadd.f32 %v3814_v27, %v3725_v16 }
 0xcf9   : > { %v3820_v55 = vadd.f32 %v3812_v63, %v3723_v52 }
 0xcfb   : > { %v5684_v58 = vpop.f32.mrb[120].mxu1 }
 0xcfc   : > { %v3906_v33 = vmul.f32 0.5, %v5684_v58  ;;  %v3873_v1 = vpop.f32.mrb[121].mxu1 }
 0xcfd   : > { %v3904_v3 = vmul.f32 0.5, %v3873_v1  ;;  %v5685_v15 = vpop.f32.mrb[122].mxu1 }
 0xcfe   : > { %v3914_v0 = vadd.f32 %v3906_v33, %v3817_v19  ;;  %v3907_v57 = vmul.f32 0.5, %v5685_v15  ;;  %v3876_v28 = vpop.f32.mrb[123].mxu1 }
 0xcff   : > { %v3912_v8 = vadd.f32 %v3904_v3, %v3815_v5  ;;  %v3905_v51 = vmul.f32 0.5, %v3876_v28  ;;  %v6086_v5 = vld [vmem:[%s6258_s2 + $0x20] sm:$0xff] }
 0xd00   : > { %v3915_v49 = vadd.f32 %v3907_v57, %v3818_v18  ;;  %v3929_v9 = vadd.f32 %v4934_v42, %v3914_v0 }
 0xd01   : > { %v3913_v25 = vadd.f32 %v3905_v51, %v3816_v20  ;;  %v3927_v30 = vadd.f32 %v4934_v42, %v3912_v8 }
 0xd02   : > { %v3930_v29 = vadd.f32 %v4934_v42, %v3915_v49  ;;  %v3937_v59 = vadd.f32 %v6084_v23, %v3929_v9 }
 0xd03   : > { %v3935_v47 = vadd.f32 %v6082_v7, %v3927_v30  ;;  %v3928_v2 = vadd.f32 %v4934_v42, %v3913_v25  ;;  %v5898_v30 = vld [vmem:[%s7632_s18] sm:$0xff]  }
 0xd04   : > { %v3938_v38 = vadd.f32 %v6085_v41, %v3930_v29  ;;  %v3951_v13 = vsel %vm7677_vm11, %v3937_v59, 0.0  ;;  %5690 = vmatprep.subr.bf16.mxu0 %v5898_v30  ;;  %vm7693_vm11 = vmmov %vm7684_vm0 }
 0xd05   : > { %v3945_v32 = vsel %vm7675_vm7, %v3935_v47, 0.0  ;;  %v3936_v31 = vadd.f32 %v6083_v60, %v3928_v2  ;;  %5691 = vmatpush3.bf16.msra.mxu0 %v5898_v30  ;;  %vm7691_vm7 = vmmov %vm7684_vm0 }
 0xd06   : > { %3946 = vadd.xlane.f32.xlu0 %v3945_v32  ;;  %v3954_v45 = vsel %vm7678_vm12, %v3938_v38, 0.0  ;;  %v5899_v32 = vld [vmem:[%s7632_s18 + $0x8] sm:$0xff]   ;;  %vm7694_vm12 = vmmov %vm7684_vm0 }
 0xd07   : > { %v3948_v62 = vsel %vm7676_vm8, %v3936_v31, 0.0  ;;  %5692 = vmatprep.subr.bf16.mxu0 %v5899_v32  ;;  %vm7692_vm8 = vmmov %vm7684_vm0 }
 0xd08   : > { %3949 = vadd.xlane.f32.xlu1 %v3948_v62 }
 0xd09   : > { %5693 = vmatpush3.bf16.msra.mxu0 %v5899_v32 }
 0xd0a   : > { %3952 = vadd.xlane.f32.xlu0 %v3951_v13 }
 0xd0c   : > { %3955 = vadd.xlane.f32.xlu1 %v3954_v45 }
 0xd26   : > { %v5688_v37 = vpop.f32.mrb[124].mxu1 }
 0xd27   : > { %v3910_v14 = vmul.f32 0.5, %v5688_v37  ;;  %v3889_v43 = vpop.f32.mrb[125].mxu1 }
 0xd28   : > { %v3908_v6 = vmul.f32 0.5, %v3889_v43  ;;  %v5689_v54 = vpop.f32.mrb[126].mxu1 }
 0xd29   : > { %v3918_v61 = vadd.f32 %v3910_v14, %v3821_v17  ;;  %v3911_v56 = vmul.f32 0.5, %v5689_v54  ;;  %v3892_v40 = vpop.f32.mrb[127].mxu1 }
 0xd2a   : > { %v3916_v4 = vadd.f32 %v3908_v6, %v3819_v53  ;;  %v3909_v35 = vmul.f32 0.5, %v3892_v40 }
 0xd2b   : > { %v3919_v39 = vadd.f32 %v3911_v56, %v3822_v36  ;;  %v3933_v34 = vadd.f32 %v4934_v42, %v3918_v61 }
 0xd2c   : > { %v3917_v19 = vadd.f32 %v3909_v35, %v3820_v55  ;;  %v3931_v12 = vadd.f32 %v4934_v42, %v3916_v4 }
 0xd2d   : > { %v3934_v22 = vadd.f32 %v4934_v42, %v3919_v39  ;;  %v3941_v48 = vadd.f32 %v6088_v21, %v3933_v34 }
 0xd2e   : > { %v3939_v44 = vadd.f32 %v6086_v5, %v3931_v12  ;;  %v3932_v18 = vadd.f32 %v4934_v42, %v3917_v19 }
 0xd2f   : > { %v3942_v46 = vadd.f32 %v6089_v24, %v3934_v22  ;;  %v3963_v16 = vsel %vm7681_vm9, %v3941_v48, 0.0 }
 0xd30   : > { %v3957_v20 = vsel %vm7679_vm14, %v3939_v44, 0.0  ;;  %v3940_v11 = vadd.f32 %v6087_v10, %v3932_v18  ;;  %v4935_v10 = vld [vmem:[%s7630_s16] ss:$0 sm:$0xff] }
 0xd31   : > { %3958 = vadd.xlane.f32.xlu0 %v3957_v20  ;;  %v3966_v17 = vsel %vm7682_vm10, %v3942_v46, 0.0 }
 0xd32   : > { %v3960_v26 = vsel %vm7680_vm15, %v3940_v11, 0.0 }
 0xd33   : > { %3961 = vadd.xlane.f32.xlu1 %v3960_v26 }
 0xd35   : > { %3964 = vadd.xlane.f32.xlu0 %v3963_v16 }
 0xd37   : > { %3967 = vadd.xlane.f32.xlu1 %v3966_v17 }
 0xd93   : > { %v3947_v27 = vpop.xlane.xlu0 %3946 }
 0xd94   : > { %v3969_v50 = vmul.f32 0.03125, %v3947_v27 }
 0xd95   : > { %v3950_v52 = vpop.xlane.xlu1 %3949 }
 0xd96   : > { %v7327_v53 = vsub.f32 %v3935_v47, %v3969_v50  ;;  %v3970_v63 = vmul.f32 0.03125, %v3950_v52 }
 0xd97   : > { %v3953_v36 = vpop.xlane.xlu0 %3952 }
 0xd98   : > { %v7329_v55 = vsub.f32 %v3936_v31, %v3970_v63  ;;  %v3971_v58 = vmul.f32 0.03125, %v3953_v36  ;;  %v3985_v33 = vmul.f32 %v7327_v53, %v7327_v53 }
 0xd99   : > { %v3956_v1 = vpop.xlane.xlu1 %3955 }
 0xd9a   : > { %v7333_v3 = vsub.f32 %v3937_v59, %v3971_v58  ;;  %v3972_v15 = vmul.f32 0.03125, %v3956_v1  ;;  %v3993_v0 = vsel %vm7683_vm13, %v3985_v33, 0.0  ;;  %v3986_v57 = vmul.f32 %v7329_v55, %v7329_v55 }
 0xd9b   : > { %3994 = vadd.xlane.f32.xlu0 %v3993_v0 }
 0xd9c   : > { %v7338_v28 = vsub.f32 %v3938_v38, %v3972_v15  ;;  %v3996_v42 = vsel %vm7684_vm0, %v3986_v57, 0.0  ;;  %v3987_v8 = vmul.f32 %v7333_v3, %v7333_v3 }
 0xd9d   : > { %3997 = vadd.xlane.f32.xlu1 %v3996_v42 }
 0xd9e   : > { %v3999_v51 = vsel %vm7685_vm5, %v3987_v8, 0.0  ;;  %v3988_v49 = vmul.f32 %v7338_v28, %v7338_v28 }
 0xd9f   : > { %4000 = vadd.xlane.f32.xlu0 %v3999_v51 }
 0xda0   : > { %v4002_v25 = vsel %vm7686_vm1, %v3988_v49, 0.0 }
 0xda1   : > { %4003 = vadd.xlane.f32.xlu1 %v4002_v25 }
 0xdbe   : > { %v3959_v9 = vpop.xlane.xlu0 %3958 }
 0xdbf   : > { %v3973_v7 = vmul.f32 0.03125, %v3959_v9 }
 0xdc0   : > { %v3962_v47 = vpop.xlane.xlu1 %3961 }
 0xdc1   : > { %v7350_v2 = vsub.f32 %v3939_v44, %v3973_v7  ;;  %v3974_v29 = vmul.f32 0.03125, %v3962_v47 }
 0xdc2   : > { %v3965_v60 = vpop.xlane.xlu0 %3964 }
 0xdc3   : > { %v7355_v31 = vsub.f32 %v3940_v11, %v3974_v29  ;;  %v3975_v23 = vmul.f32 0.03125, %v3965_v60  ;;  %v3989_v59 = vmul.f32 %v7350_v2, %v7350_v2 }
 0xdc4   : > { %v3968_v62 = vpop.xlane.xlu1 %3967 }
 0xdc5   : > { %v7359_v41 = vsub.f32 %v3941_v48, %v3975_v23  ;;  %v3976_v38 = vmul.f32 0.03125, %v3968_v62  ;;  %v4005_v13 = vsel %vm7687_vm2, %v3989_v59, 0.0  ;;  %v3990_v45 = vmul.f32 %v7355_v31, %v7355_v31 }
 0xdc6   : > { %4006 = vadd.xlane.f32.xlu0 %v4005_v13 }
 0xdc7   : > { %v7364_v37 = vsub.f32 %v3942_v46, %v3976_v38  ;;  %v4008_v14 = vsel %vm7688_vm3, %v3990_v45, 0.0  ;;  %v3991_v43 = vmul.f32 %v7359_v41, %v7359_v41  ;;  %v4936_v46 = vld [vmem:[%s7631_s17] ss:$0 sm:$0xff]  ;;  %vm7695_vm3 = vmmov %vm7687_vm2 }
 0xdc8   : > { %4009 = vadd.xlane.f32.xlu1 %v4008_v14 }
 0xdc9   : > { %v4011_v6 = vsel %vm7689_vm4, %v3991_v43, 0.0  ;;  %v3992_v54 = vmul.f32 %v7364_v37, %v7364_v37  ;;  %vm7696_vm4 = vmmov %vm7687_vm2 }
 0xdca   : > { %4012 = vadd.xlane.f32.xlu0 %v4011_v6 }
 0xdcb   : > { %v4014_v61 = vsel %vm7690_vm6, %v3992_v54, 0.0  ;;  %vm7697_vm6 = vmmov %vm7687_vm2 }
 0xdcc   : > { %4015 = vadd.xlane.f32.xlu1 %v4014_v61  ;;  %v5901_v61 = vld [vmem:[%s7634_s20 + $0x8] sm:$0xff]  }
 0xe28   : > { %v3995_v56 = vpop.xlane.xlu0 %3994 }
 0xe29   : > { %v4017_v40 = vmul.f32 0.03125, %v3995_v56  ;;  %v5902_v56 = vld [vmem:[%s7634_s20 + $0x10] sm:$0xff]  }
 0xe2a   : > { %v3998_v4 = vpop.xlane.xlu1 %3997 }
 0xe2b   : > { %v4025_v35 = vadd.f32 1e-12, %v4017_v40  ;;  %v4018_v39 = vmul.f32 0.03125, %v3998_v4  ;;  %v5903_v40 = vld [vmem:[%s7634_s20 + $0x18] sm:$0xff]   ;;  %v5904_v4 = vld [vmem:[%s7634_s20 + $0x20] sm:$0xff]  }
 0xe2c   : > { %v4001_v19 = vpop.xlane.xlu0 %4000 }
 0xe2d   : > { %6004 = vrsqrt.f32 %v4025_v35  ;;  %v4026_v12 = vadd.f32 1e-12, %v4018_v39  ;;  %v4019_v34 = vmul.f32 0.03125, %v4001_v19  ;;  %v5905_v35 = vld [vmem:[%s7634_s20 + $0x28] sm:$0xff]   ;;  %v5906_v39 = vld [vmem:[%s7634_s20 + $0x30] sm:$0xff]   ;;  %v5907_v19 = vld [vmem:[%s7634_s20 + $0x38] sm:$0xff]  }
 0xe2e   : > { %v4004_v22 = vpop.xlane.xlu1 %4003 }
 0xe2f   : > { %6006 = vrsqrt.f32 %v4026_v12  ;;  %v4027_v5 = vadd.f32 1e-12, %v4019_v34  ;;  %v4020_v44 = vmul.f32 0.03125, %v4004_v22  ;;  %v7442_v12 = vld [vmem:[%s7633_s19] ss:$0 sm:$0xff] }
 0xe31   : > { %6008 = vrsqrt.f32 %v4027_v5  ;;  %v4028_v18 = vadd.f32 1e-12, %v4020_v44 }
 0xe33   : > { %6010 = vrsqrt.f32 %v4028_v18 }
 0xe37   : > { %v6005_v20 = vpop.eup %6004 }
 0xe38   : > { %v4041_v11 = vmul.f32 %v6005_v20, %v7327_v53 }
 0xe39   : > { %v6007_v21 = vpop.eup %6006 }
 0xe3a   : > { %v4042_v48 = vmul.f32 %v6007_v21, %v7329_v55  ;;  %v4055_v26 = vmul.f32 %v4935_v10, %v4041_v11 }
 0xe3b   : > { %v6009_v24 = vpop.eup %6008 }
 0xe3c   : > { %v4043_v16 = vmul.f32 %v6009_v24, %v7333_v3  ;;  %v4056_v17 = vmul.f32 %v4935_v10, %v4042_v48  ;;  %v7383_v63 = vadd.f32 %v4936_v46, %v4055_v26 }
 0xe3d   : > { %v6011_v27 = vpop.eup %6010 }
 0xe3e   : > { %v4057_v50 = vmul.f32 %v4935_v10, %v4043_v16  ;;  %v4044_v52 = vmul.f32 %v6011_v27, %v7338_v28  ;;  %v7385_v36 = vadd.f32 %v4936_v46, %v4056_v17 }
 0xe40   : > { %v4058_v53 = vmul.f32 %v4935_v10, %v4044_v52  ;;  %v4077_v55 = vpack.c.bf16 %v7385_v36, %v7383_v63  ;;  %v7389_v58 = vadd.f32 %v4936_v46, %v4057_v50 }
 0xe42   : > { %v7391_v33 = vadd.f32 %v4936_v46, %v4058_v53  ;;  %5694 = vmatprep.mubr.msk.bf16.mxu0 %vm7691_vm7, %v4077_v55  ;;  %vm7698_vm7 = vmmov %vm7687_vm2 }
 0xe44   : > { %v4078_v1 = vpack.c.bf16 %v7391_v33, %v7389_v58 }
 0xe46   : > { %5695 = vmatmul.mubr.msk.bf16.vlgmr.msra.gmra.mrb[144].mxu0 %vm7692_vm8, %v4078_v1  ;;  %vm7699_vm8 = vmmov %vm7687_vm2 }
 0xe53   : > { %v4007_v3 = vpop.xlane.xlu0 %4006 }
 0xe54   : > { %v4021_v15 = vmul.f32 0.03125, %v4007_v3 }
 0xe55   : > { %v4010_v0 = vpop.xlane.xlu1 %4009 }
 0xe56   : > { %v4029_v57 = vadd.f32 1e-12, %v4021_v15  ;;  %v4022_v28 = vmul.f32 0.03125, %v4010_v0 }
 0xe57   : > { %v4013_v42 = vpop.xlane.xlu0 %4012 }
 0xe58   : > { %6012 = vrsqrt.f32 %v4029_v57  ;;  %v4030_v8 = vadd.f32 1e-12, %v4022_v28  ;;  %v4023_v51 = vmul.f32 0.03125, %v4013_v42 }
 0xe59   : > { %v4016_v49 = vpop.xlane.xlu1 %4015 }
 0xe5a   : > { %6014 = vrsqrt.f32 %v4030_v8  ;;  %v4031_v25 = vadd.f32 1e-12, %v4023_v51  ;;  %v4024_v30 = vmul.f32 0.03125, %v4016_v49 }
 0xe5c   : > { %6016 = vrsqrt.f32 %v4031_v25  ;;  %v4032_v9 = vadd.f32 1e-12, %v4024_v30 }
 0xe5e   : > { %6018 = vrsqrt.f32 %v4032_v9 }
 0xe62   : > { %v6013_v7 = vpop.eup %6012 }
 0xe63   : > { %v4045_v47 = vmul.f32 %v6013_v7, %v7350_v2 }
 0xe64   : > { %v6015_v29 = vpop.eup %6014 }
 0xe65   : > { %v4046_v32 = vmul.f32 %v6015_v29, %v7355_v31  ;;  %v4059_v60 = vmul.f32 %v4935_v10, %v4045_v47 }
 0xe66   : > { %v6017_v23 = vpop.eup %6016 }
 0xe67   : > { %v4047_v59 = vmul.f32 %v6017_v23, %v7359_v41  ;;  %v4060_v62 = vmul.f32 %v4935_v10, %v4046_v32  ;;  %v7401_v45 = vadd.f32 %v4936_v46, %v4059_v60 }
 0xe68   : > { %v6019_v38 = vpop.eup %6018 }
 0xe69   : > { %v4048_v13 = vmul.f32 %v6019_v38, %v7364_v37  ;;  %v7403_v14 = vadd.f32 %v4936_v46, %v4060_v62  ;;  %v4061_v43 = vmul.f32 %v4935_v10, %v4047_v59  ;;  %v5900_v37 = vld [vmem:[%s7634_s20] sm:$0xff]  }
 0xe6a   : > { %5702 = vmatprep.subr.bf16.mxu1 %v5900_v37 }
 0xe6b   : > { %v4079_v6 = vpack.c.bf16 %v7403_v14, %v7401_v45  ;;  %v4062_v2 = vmul.f32 %v4935_v10, %v4048_v13  ;;  %v7408_v31 = vadd.f32 %v4936_v46, %v4061_v43  ;;  %5703 = vmatpush3.bf16.msra.mxu1 %v5900_v37 }
 0xe6c   : > { %5704 = vmatprep.subr.bf16.mxu1 %v5901_v61 }
 0xe6d   : > { %5698 = vmatprep.mubr.msk.bf16.mxu0 %vm7693_vm11, %v4079_v6  ;;  %v7410_v54 = vadd.f32 %v4936_v46, %v4062_v2  ;;  %vm7700_vm11 = vmmov %vm7687_vm2 }
 0xe6f   : > { %v4080_v41 = vpack.c.bf16 %v7410_v54, %v7408_v31  ;;  %5705 = vmatpush3.bf16.msra.mxu1 %v5901_v61 }
 0xe70   : > { %5706 = vmatprep.subr.bf16.mxu1 %v5902_v56 }
 0xe71   : > { %5699 = vmatmul.mubr.msk.bf16.gmra.mrb[148].mxu0 %vm7694_vm12, %v4080_v41  ;;  %vm7701_vm12 = vmmov %vm7687_vm2 }
 0xe73   : > { %5707 = vmatpush3.bf16.msra.mxu1 %v5902_v56 }
 0xe74   : > { %5708 = vmatprep.subr.bf16.mxu1 %v5903_v40 }
 0xe77   : > { %5709 = vmatpush3.bf16.msra.mxu1 %v5903_v40 }
 0xe78   : > { %5710 = vmatprep.subr.bf16.mxu1 %v5904_v4 }
 0xe7b   : > { %5711 = vmatpush3.bf16.msra.mxu1 %v5904_v4 }
 0xe7c   : > { %5712 = vmatprep.subr.bf16.mxu1 %v5905_v35 }
 0xe7f   : > { %5713 = vmatpush3.bf16.msra.mxu1 %v5905_v35 }
 0xe80   : > { %5714 = vmatprep.subr.bf16.mxu1 %v5906_v39 }
 0xe83   : > { %5715 = vmatpush3.bf16.msra.mxu1 %v5906_v39 }
 0xe84   : > { %5716 = vmatprep.subr.bf16.mxu1 %v5907_v19 }
 0xe87   : > { %5717 = vmatpush3.bf16.msra.mxu1 %v5907_v19 }
 0xf19   : > { %v5696_v34 = vpop.f32.mrb[144].mxu0 }
 0xf1a   : > { %v7445_v22 = vadd.f32 %v5696_v34, %v7442_v12  ;;  %v4150_v5 = vpop.f32.mrb[145].mxu0 }
 0xf1b   : > { %v7448_v44 = vadd.f32 %v7442_v12, %v4150_v5  ;;  %v5697_v18 = vpop.f32.mrb[146].mxu0 }
 0xf1c   : > { %v7451_v20 = vmul.f32 0.70710677, %v7445_v22  ;;  %v7454_v10 = vadd.f32 %v5697_v18, %v7442_v12  ;;  %v4153_v11 = vpop.f32.mrb[147].mxu0 }
 0xf1d   : > { %v7457_v21 = vmul.f32 0.70710677, %v7448_v44  ;;  %v7460_v48 = vadd.f32 %v7442_v12, %v4153_v11 }
 0xf1e   : > { %v4199_v26 = vand.u32 2147483647, %v7451_v20  ;;  %v7464_v24 = vmul.f32 0.70710677, %v7454_v10  ;;  %vm4359_vm14 = vcmp.ge.f32.partialorder %v7451_v20, 0.0 }
 0xf1f   : > { %v4197_v46 = vand.u32 2147483647, %v7457_v21  ;;  %v7468_v16 = vmul.f32 0.70710677, %v7460_v48  ;;  %vm4357_vm15 = vcmp.ge.f32.partialorder %v7457_v21, 0.0 }
 0xf20   : > { %v4207_v17 = vmul.f32 0.3275911, %v4199_v26  ;;  %v4200_v27 = vand.u32 2147483647, %v7464_v24  ;;  %v4311_v57 = vsub.f32 0.0, %v4199_v26  ;;  %vm4360_vm9 = vcmp.ge.f32.partialorder %v7464_v24, 0.0 }
 0xf21   : > { %v4205_v50 = vmul.f32 0.3275911, %v4197_v46  ;;  %v4198_v52 = vand.u32 2147483647, %v7468_v16  ;;  %v4309_v28 = vsub.f32 0.0, %v4197_v46  ;;  %vm4358_vm10 = vcmp.ge.f32.partialorder %v7468_v16, 0.0 }
 0xf22   : > { %v4215_v53 = vadd.f32 1.0, %v4207_v17  ;;  %v4208_v55 = vmul.f32 0.3275911, %v4200_v27  ;;  %v4319_v8 = vmul.f32 %v4311_v57, %v4199_v26  ;;  %v4312_v51 = vsub.f32 0.0, %v4200_v27 }
 0xf23   : > { %v4213_v1 = vadd.f32 1.0, %v4205_v50  ;;  %v4206_v3 = vmul.f32 0.3275911, %v4198_v52  ;;  %v4317_v30 = vmul.f32 %v4309_v28, %v4197_v46  ;;  %v4310_v7 = vsub.f32 0.0, %v4198_v52 }
 0xf24   : > { %6020 = vrcp.f32 %v4215_v53  ;;  %v4216_v15 = vadd.f32 1.0, %v4208_v55  ;;  %v4329_v32 = vmul.f32 1.442695, %v4319_v8  ;;  %v4320_v23 = vmul.f32 %v4312_v51, %v4200_v27 }
 0xf25   : > { %6022 = vrcp.f32 %v4213_v1  ;;  %v4214_v0 = vadd.f32 1.0, %v4206_v3  ;;  %v4325_v62 = vmul.f32 1.442695, %v4317_v30  ;;  %v4318_v6 = vmul.f32 %v4310_v7, %v4198_v52 }
 0xf26   : > { %6024 = vrcp.f32 %v4216_v15  ;;  %v4331_v56 = vmul.f32 1.442695, %v4320_v23 }
 0xf27   : > { %6026 = vrcp.f32 %v4214_v0  ;;  %v4327_v19 = vmul.f32 1.442695, %v4318_v6 }
 0xf28   : > { %6028 = vpow2.f32 %v4329_v32 }
 0xf29   : > { %6030 = vpow2.f32 %v4325_v62 }
 0xf2a   : > { %6032 = vpow2.f32 %v4331_v56 }
 0xf2b   : > { %6034 = vpow2.f32 %v4327_v19 }
 0xf2e   : > { %v6021_v42 = vpop.eup %6020 }
 0xf2f   : > { %v6023_v49 = vpop.eup %6022  ;;  %v4239_v25 = vmul.f32 1.0614054, %v6021_v42 }
 0xf30   : > { %v4237_v9 = vmul.f32 1.0614054, %v6023_v49  ;;  %v6025_v29 = vpop.eup %6024 }
 0xf31   : > { %v4247_v47 = vadd.f32 -1.4531521, %v4239_v25  ;;  %v4240_v38 = vmul.f32 1.0614054, %v6025_v29  ;;  %v6027_v13 = vpop.eup %6026 }
 0xf32   : > { %v4245_v60 = vadd.f32 -1.4531521, %v4237_v9  ;;  %v4238_v37 = vmul.f32 1.0614054, %v6027_v13  ;;  %v6029_v0 = vpop.eup %6028 }
 0xf33   : > { %v4255_v59 = vmul.f32 %v6021_v42, %v4247_v47  ;;  %v4248_v41 = vadd.f32 -1.4531521, %v4240_v38  ;;  %v6031_v28 = vpop.eup %6030 }
 0xf34   : > { %v4253_v43 = vmul.f32 %v6023_v49, %v4245_v60  ;;  %v4246_v35 = vadd.f32 -1.4531521, %v4238_v37  ;;  %v6033_v32 = vpop.eup %6032 }
 0xf35   : > { %v4263_v2 = vadd.f32 1.4214138, %v4255_v59  ;;  %v4256_v4 = vmul.f32 %v6025_v29, %v4248_v41  ;;  %v6035_v6 = vpop.eup %6034 }
 0xf36   : > { %v4261_v61 = vadd.f32 1.4214138, %v4253_v43  ;;  %v4254_v18 = vmul.f32 %v6027_v13, %v4246_v35 }
 0xf37   : > { %v4271_v40 = vmul.f32 %v6021_v42, %v4263_v2  ;;  %v4264_v5 = vadd.f32 1.4214138, %v4256_v4 }
 0xf38   : > { %v4269_v39 = vmul.f32 %v6023_v49, %v4261_v61  ;;  %v4262_v17 = vadd.f32 1.4214138, %v4254_v18 }
 0xf39   : > { %v4279_v34 = vadd.f32 -0.28449672, %v4271_v40  ;;  %v4272_v46 = vmul.f32 %v6025_v29, %v4264_v5  ;;  %v4183_v40 = vmul.f32 0.5, %v7445_v22 }
 0xf3a   : > { %v4277_v11 = vadd.f32 -0.28449672, %v4269_v39  ;;  %v4270_v53 = vmul.f32 %v6027_v13, %v4262_v17 }
 0xf3b   : > { %v4287_v26 = vmul.f32 %v6021_v42, %v4279_v34  ;;  %v4280_v52 = vadd.f32 -0.28449672, %v4272_v46  ;;  %v4184_v34 = vmul.f32 0.5, %v7454_v10  ;;  %v4182_v10 = vmul.f32 0.5, %v7460_v48 }
 0xf3c   : > { %v4285_v27 = vmul.f32 %v6023_v49, %v4277_v11  ;;  %v4278_v15 = vadd.f32 -0.28449672, %v4270_v53 }
 0xf3d   : > { %v4295_v50 = vadd.f32 0.2548296, %v4287_v26  ;;  %v4288_v3 = vmul.f32 %v6025_v29, %v4280_v52 }
 0xf3e   : > { %v4293_v55 = vadd.f32 0.2548296, %v4285_v27  ;;  %v4286_v25 = vmul.f32 %v6027_v13, %v4278_v15  ;;  %v4181_v27 = vmul.f32 0.5, %v7448_v44 }
 0xf3f   : > { %v4303_v1 = vmul.f32 %v6021_v42, %v4295_v50  ;;  %v4296_v51 = vadd.f32 0.2548296, %v4288_v3 }
 0xf40   : > { %v4301_v57 = vmul.f32 %v6023_v49, %v4293_v55  ;;  %v4294_v47 = vadd.f32 0.2548296, %v4286_v25 }
 0xf41   : > { %v4343_v8 = vmul.f32 %v6029_v0, %v4303_v1  ;;  %v4304_v7 = vmul.f32 %v6025_v29, %v4296_v51 }
 0xf42   : > { %v4341_v30 = vmul.f32 %v6031_v28, %v4301_v57  ;;  %v4302_v38 = vmul.f32 %v6027_v13, %v4294_v47 }
 0xf43   : > { %v4351_v9 = vsub.f32 1.0, %v4343_v8  ;;  %v4344_v62 = vmul.f32 %v6033_v32, %v4304_v7 }
 0xf44   : > { %v4349_v60 = vsub.f32 1.0, %v4341_v30  ;;  %v5700_v23 = vpop.f32.mrb[148].mxu0  ;;  %v4342_v61 = vmul.f32 %v6035_v6, %v4302_v38 }
 0xf45   : > { %v4367_v59 = vsub.f32 0.0, %v4351_v9  ;;  %v7473_v42 = vadd.f32 %v5700_v23, %v7442_v12  ;;  %v4166_v43 = vpop.f32.mrb[149].mxu0  ;;  %v4352_v37 = vsub.f32 1.0, %v4344_v62 }
 0xf46   : > { %v4365_v49 = vsub.f32 0.0, %v4349_v60  ;;  %v7477_v2 = vadd.f32 %v7442_v12, %v4166_v43  ;;  %v5701_v41 = vpop.f32.mrb[150].mxu0  ;;  %v4350_v39 = vsub.f32 1.0, %v4342_v61 }
 0xf47   : > { %v4375_v29 = vsel %vm4359_vm14, %v4351_v9, %v4367_v59  ;;  %v4169_v56 = vpop.f32.mrb[151].mxu0  ;;  %v7482_v13 = vmul.f32 0.70710677, %v7473_v42  ;;  %v4368_v35 = vsub.f32 0.0, %v4352_v37  ;;  %v7492_v11 = vadd.f32 %v5701_v41, %v7442_v12  ;;  %vm7702_vm14 = vmmov %vm7687_vm2 }
 0xf48   : > { %v4373_v4 = vsel %vm4357_vm15, %v4349_v60, %v4365_v49  ;;  %v7485_v20 = vmul.f32 0.70710677, %v7477_v2  ;;  %v4383_v19 = vadd.f32 1.0, %v4375_v29  ;;  %v4366_v22 = vsub.f32 0.0, %v4350_v39  ;;  %vm7703_vm15 = vmmov %vm7687_vm2 }
 0xf49   : > { %v4203_v5 = vand.u32 2147483647, %v7482_v13  ;;  %v4376_v18 = vsel %vm4360_vm9, %v4352_v37, %v4368_v35  ;;  %v4381_v26 = vadd.f32 1.0, %v4373_v4  ;;  %v7498_v15 = vmul.f32 0.70710677, %v7492_v11  ;;  %vm7704_vm9 = vmmov %vm7687_vm2 }
 0xf4a   : > { %v4201_v21 = vand.u32 2147483647, %v7485_v20  ;;  %v4384_v46 = vadd.f32 1.0, %v4376_v18  ;;  %v4374_v50 = vsel %vm4358_vm10, %v4350_v39, %v4366_v22  ;;  %v4391_v52 = vmul.f32 %v4383_v19, %v4183_v40  ;;  %vm7705_vm10 = vmmov %vm7687_vm2 }
 0xf4b   : > { %v4211_v17 = vmul.f32 0.3275911, %v4203_v5  ;;  %v4382_v55 = vadd.f32 1.0, %v4374_v50  ;;  %v7501_v0 = vadd.f32 %v7442_v12, %v4169_v56  ;;  %v4389_v57 = vmul.f32 %v4381_v26, %v4181_v27 }
 0xf4c   : > { %v4209_v24 = vmul.f32 0.3275911, %v4201_v21  ;;  %v4392_v53 = vmul.f32 %v4384_v46, %v4184_v34  ;;  %v4204_v44 = vand.u32 2147483647, %v7498_v15  ;;  %v4315_v9 = vsub.f32 0.0, %v4203_v5 }
 0xf4d   : > { %v4219_v1 = vadd.f32 1.0, %v4211_v17  ;;  %v4390_v28 = vmul.f32 %v4382_v55, %v4182_v10  ;;  %v7505_v48 = vmul.f32 0.70710677, %v7501_v0  ;;  %v4313_v7 = vsub.f32 0.0, %v4201_v21 }
 0xf4e   : > { %v4217_v3 = vadd.f32 1.0, %v4209_v24  ;;  %v4398_v16 = vpack.c.bf16 %v4392_v53, %v4391_v52  ;;  %v4212_v51 = vmul.f32 0.3275911, %v4204_v44  ;;  %v4323_v60 = vmul.f32 %v4315_v9, %v4203_v5 }
 0xf4f   : > { %6036 = vrcp.f32 %v4219_v1  ;;  %v4397_v8 = vpack.c.bf16 %v4390_v28, %v4389_v57  ;;  %v4202_v25 = vand.u32 2147483647, %v7505_v48  ;;  %v4321_v62 = vmul.f32 %v4313_v7, %v4201_v21 }
 0xf50   : > { %6038 = vrcp.f32 %v4217_v3  ;;  %v4220_v30 = vadd.f32 1.0, %v4212_v51  ;;  %v4316_v6 = vsub.f32 0.0, %v4204_v44  ;;  %v4337_v49 = vmul.f32 1.442695, %v4323_v60 }
 0xf51   : > { %5718 = vmatprep.mubr.bf16.mxu1 %v4397_v8  ;;  %v4210_v12 = vmul.f32 0.3275911, %v4202_v25  ;;  %v4333_v37 = vmul.f32 1.442695, %v4321_v62  ;;  %v4314_v56 = vsub.f32 0.0, %v4202_v25  ;;  %vm4363_vm13 = vcmp.ge.f32.partialorder %v7482_v13, 0.0 }
 0xf52   : > { %5719 = vmatmul.mubr.bf16.vlgmr.msra.gmra.mrb[128].mxu1 %v4398_v16  ;;  %6040 = vrcp.f32 %v4220_v30  ;;  %v4324_v35 = vmul.f32 %v4316_v6, %v4204_v44  ;;  %vm4361_vm0 = vcmp.ge.f32.partialorder %v7485_v20, 0.0  ;;  %vm4364_vm5 = vcmp.ge.f32.partialorder %v7498_v15, 0.0 }
 0xf53   : > { %v4218_v47 = vadd.f32 1.0, %v4210_v12  ;;  %v4322_v21 = vmul.f32 %v4314_v56, %v4202_v25  ;;  %vm4362_vm1 = vcmp.ge.f32.partialorder %v7505_v48, 0.0  ;;  %v4185_v20 = vmul.f32 0.5, %v7477_v2 }
 0xf54   : > { %v4339_v46 = vmul.f32 1.442695, %v4324_v35 }
 0xf55   : > { %6042 = vrcp.f32 %v4218_v47  ;;  %v4335_v55 = vmul.f32 1.442695, %v4322_v21  ;;  %v4188_v21 = vmul.f32 0.5, %v7492_v11 }
 0xf56   : > { %6044 = vpow2.f32 %v4337_v49 }
 0xf57   : > { %6046 = vpow2.f32 %v4333_v37 }
 0xf58   : > { %6048 = vpow2.f32 %v4339_v46 }
 0xf59   : > { %v6037_v32 = vpop.eup %6036  ;;  %6050 = vpow2.f32 %v4335_v55 }
 0xf5a   : > { %v6039_v23 = vpop.eup %6038  ;;  %v4243_v59 = vmul.f32 1.0614054, %v6037_v32 }
 0xf5b   : > { %v4241_v38 = vmul.f32 1.0614054, %v6039_v23 }
 0xf5c   : > { %v4251_v43 = vadd.f32 -1.4531521, %v4243_v59  ;;  %v6041_v40 = vpop.eup %6040 }
 0xf5d   : > { %v4249_v41 = vadd.f32 -1.4531521, %v4241_v38  ;;  %v4244_v19 = vmul.f32 1.0614054, %v6041_v40 }
 0xf5e   : > { %v4259_v29 = vmul.f32 %v6037_v32, %v4251_v43 }
 0xf5f   : > { %v4257_v61 = vmul.f32 %v6039_v23, %v4249_v41  ;;  %v6043_v5 = vpop.eup %6042  ;;  %v4252_v22 = vadd.f32 -1.4531521, %v4244_v19 }
 0xf60   : > { %v4267_v4 = vadd.f32 1.4214138, %v4259_v29  ;;  %v4242_v17 = vmul.f32 1.0614054, %v6043_v5  ;;  %v6045_v8 = vpop.eup %6044 }
 0xf61   : > { %v4265_v39 = vadd.f32 1.4214138, %v4257_v61  ;;  %v4260_v10 = vmul.f32 %v6041_v40, %v4252_v22  ;;  %v6047_v30 = vpop.eup %6046  ;;  %v4187_v22 = vmul.f32 0.5, %v7473_v42  ;;  %v4944_v42 = vld [vmem:[%s7635_s21] ss:$0 sm:$0xff] }
 0xf62   : > { %v4275_v34 = vmul.f32 %v6037_v32, %v4267_v4  ;;  %v4250_v24 = vadd.f32 -1.4531521, %v4242_v17  ;;  %v6049_v41 = vpop.eup %6048 }
 0xf63   : > { %v4273_v18 = vmul.f32 %v6039_v23, %v4265_v39  ;;  %v4268_v53 = vadd.f32 1.4214138, %v4260_v10  ;;  %v6051_v61 = vpop.eup %6050  ;;  %v4186_v10 = vmul.f32 0.5, %v7501_v0 }
 0xf64   : > { %v4283_v26 = vadd.f32 -0.28449672, %v4275_v34  ;;  %v4258_v3 = vmul.f32 %v6043_v5, %v4250_v24 }
 0xf65   : > { %v4281_v27 = vadd.f32 -0.28449672, %v4273_v18  ;;  %v4276_v16 = vmul.f32 %v6041_v40, %v4268_v53 }
 0xf66   : > { %v4291_v50 = vmul.f32 %v6037_v32, %v4283_v26  ;;  %v4266_v44 = vadd.f32 1.4214138, %v4258_v3 }
 0xf67   : > { %v4289_v52 = vmul.f32 %v6039_v23, %v4281_v27  ;;  %v4284_v25 = vadd.f32 -0.28449672, %v4276_v16 }
 0xf68   : > { %v4299_v1 = vadd.f32 0.2548296, %v4291_v50  ;;  %v4274_v12 = vmul.f32 %v6043_v5, %v4266_v44 }
 0xf69   : > { %v4297_v57 = vadd.f32 0.2548296, %v4289_v52  ;;  %v4292_v47 = vmul.f32 %v6041_v40, %v4284_v25 }
 0xf6a   : > { %v4307_v28 = vmul.f32 %v6037_v32, %v4299_v1  ;;  %v4282_v59 = vadd.f32 -0.28449672, %v4274_v12 }
 0xf6b   : > { %v4305_v51 = vmul.f32 %v6039_v23, %v4297_v57  ;;  %v4300_v62 = vadd.f32 0.2548296, %v4292_v47 }
 0xf6c   : > { %v4347_v9 = vmul.f32 %v6045_v8, %v4307_v28  ;;  %v4290_v43 = vmul.f32 %v6043_v5, %v4282_v59 }
 0xf6d   : > { %v4345_v7 = vmul.f32 %v6047_v30, %v4305_v51  ;;  %v4308_v49 = vmul.f32 %v6041_v40, %v4300_v62 }
 0xf6e   : > { %v4355_v60 = vsub.f32 1.0, %v4347_v9  ;;  %v4298_v29 = vadd.f32 0.2548296, %v4290_v43 }
 0xf6f   : > { %v4353_v38 = vsub.f32 1.0, %v4345_v7  ;;  %v4348_v32 = vmul.f32 %v6049_v41, %v4308_v49 }
 0xf70   : > { %v4371_v6 = vsub.f32 0.0, %v4355_v60  ;;  %v4306_v37 = vmul.f32 %v6043_v5, %v4298_v29 }
 0xf71   : > { %v4369_v23 = vsub.f32 0.0, %v4353_v38  ;;  %v4356_v4 = vsub.f32 1.0, %v4348_v32 }
 0xf72   : > { %v4379_v56 = vsel %vm4363_vm13, %v4355_v60, %v4371_v6  ;;  %v4346_v35 = vmul.f32 %v6051_v61, %v4306_v37  ;;  %vm7706_vm13 = vmmov %vm7687_vm2 }
 0xf73   : > { %v4372_v39 = vsub.f32 0.0, %v4356_v4  ;;  %v4387_v19 = vadd.f32 1.0, %v4379_v56  ;;  %v4377_v34 = vsel %vm4361_vm0, %v4353_v38, %v4369_v23  ;;  %vm7707_vm0 = vmmov %vm7687_vm2 }
 0xf74   : > { %v4354_v18 = vsub.f32 1.0, %v4346_v35  ;;  %v4385_v5 = vadd.f32 1.0, %v4377_v34 }
 0xf75   : > { %v4380_v40 = vsel %vm4364_vm5, %v4356_v4, %v4372_v39  ;;  %v4395_v46 = vmul.f32 %v4387_v19, %v4187_v22  ;;  %vm7708_vm5 = vmmov %vm7707_vm0 }
 0xf76   : > { %v4388_v13 = vadd.f32 1.0, %v4380_v40  ;;  %v4370_v26 = vsub.f32 0.0, %v4354_v18  ;;  %v4393_v24 = vmul.f32 %v4385_v5, %v4185_v20 }
 0xf78   : > { %v4396_v17 = vmul.f32 %v4388_v13, %v4188_v21  ;;  %v4378_v27 = vsel %vm4362_vm1, %v4354_v18, %v4370_v26  ;;  %vm7709_vm1 = vmmov %vm7707_vm0 }
 0xf79   : > { %v4386_v50 = vadd.f32 1.0, %v4378_v27 }
 0xf7a   : > { %v4400_v15 = vpack.c.bf16 %v4396_v17, %v4395_v46 }
 0xf7b   : > { %v4394_v52 = vmul.f32 %v4386_v50, %v4186_v10 }
 0xf7d   : > { %v4399_v53 = vpack.c.bf16 %v4394_v52, %v4393_v24 }
 0xf7f   : > { %5722 = vmatprep.mubr.bf16.mxu1 %v4399_v53 }
 0xf80   : > { %5723 = vmatmul.mubr.bf16.gmra.mrb[132].mxu1 %v4400_v15 }
0x1025   : > { %v5720_v11 = vpop.f32.mrb[128].mxu1 }
0x1026   : > { %v4515_v48 = vadd.f32 %v5720_v11, %v4944_v42  ;;  %v4506_v55 = vpop.f32.mrb[129].mxu1 }
0x1027   : > { %v4507_v1 = vadd.f32 %v4944_v42, %v4506_v55  ;;  %v5721_v3 = vpop.f32.mrb[130].mxu1 }
0x1028   : > { %v4518_v57 = vadd.f32 %v5721_v3, %v4944_v42  ;;  %v4509_v2 = vpop.f32.mrb[131].mxu1  ;;  %v4539_v0 = vadd.f32 %v4515_v48, %v7389_v58 }
0x1029   : > { %v4510_v16 = vadd.f32 %v4944_v42, %v4509_v2  ;;  %v4537_v28 = vadd.f32 %v4507_v1, %v7383_v63 }
0x102a   : > { %v4540_v44 = vadd.f32 %v4518_v57, %v7391_v33  ;;  %v4553_v8 = vsel %vm7687_vm2, %v4539_v0, 0.0  ;;  %vm7710_vm2 = vmmov %vm7707_vm0 }
0x102b   : > { %4554 = vadd.xlane.f32.xlu0 %v4553_v8  ;;  %v4538_v51 = vadd.f32 %v4510_v16, %v7385_v36  ;;  %v4547_v30 = vsel %vm7696_vm4, %v4537_v28, 0.0  ;;  %vm7712_vm4 = vmmov %vm7707_vm0 }
0x102c   : > { %v4556_v25 = vsel %vm7695_vm3, %v4540_v44, 0.0  ;;  %vm7711_vm3 = vmmov %vm7707_vm0 }
0x102d   : > { %4557 = vadd.xlane.f32.xlu1 %v4556_v25  ;;  %v4550_v9 = vsel %vm7697_vm6, %v4538_v51, 0.0  ;;  %vm7713_vm6 = vmmov %vm7707_vm0 }
0x102f   : > { %4548 = vadd.xlane.f32.xlu0 %v4547_v30 }
0x1031   : > { %4551 = vadd.xlane.f32.xlu1 %v4550_v9 }
0x1053   : > { %v5724_v58 = vpop.f32.mrb[132].mxu1 }
0x1054   : > { %v4522_v12 = vpop.f32.mrb[133].mxu1  ;;  %v4531_v7 = vadd.f32 %v5724_v58, %v4944_v42 }
0x1055   : > { %v4523_v63 = vadd.f32 %v4944_v42, %v4522_v12  ;;  %v5725_v47 = vpop.f32.mrb[134].mxu1 }
0x1056   : > { %v4525_v33 = vpop.f32.mrb[135].mxu1  ;;  %v4534_v59 = vadd.f32 %v5725_v47, %v4944_v42  ;;  %v4543_v36 = vadd.f32 %v4531_v7, %v7408_v31 }
0x1057   : > { %v4541_v60 = vadd.f32 %v4523_v63, %v7401_v45  ;;  %v4526_v62 = vadd.f32 %v4944_v42, %v4525_v33  ;;  %v4953_v33 = vld [vmem:[%s7636_s22] ss:$0 sm:$0xff] }
0x1058   : > { %v4544_v6 = vadd.f32 %v4534_v59, %v7410_v54  ;;  %v4565_v41 = vsel %vm7700_vm11, %v4543_v36, 0.0  ;;  %vm7716_vm11 = vmmov %vm7707_vm0 }
0x1059   : > { %v4542_v38 = vadd.f32 %v4526_v62, %v7403_v14  ;;  %v4559_v43 = vsel %vm7698_vm7, %v4541_v60, 0.0  ;;  %v4954_v62 = vld [vmem:[%s7637_s23] ss:$0 sm:$0xff]  ;;  %vm7714_vm7 = vmmov %vm7707_vm0 }
0x105a   : > { %4560 = vadd.xlane.f32.xlu0 %v4559_v43  ;;  %v4568_v29 = vsel %vm7701_vm12, %v4544_v6, 0.0  ;;  %vm7717_vm12 = vmmov %vm7707_vm0 }
0x105b   : > { %v4562_v49 = vsel %vm7699_vm8, %v4542_v38, 0.0  ;;  %vm7715_vm8 = vmmov %vm7707_vm0 }
0x105c   : > { %4563 = vadd.xlane.f32.xlu1 %v4562_v49 }
0x105e   : > { %4566 = vadd.xlane.f32.xlu0 %v4565_v41 }
0x1060   : > { %4569 = vadd.xlane.f32.xlu1 %v4568_v29 }
0x10b8   : > { %v4555_v45 = vpop.xlane.xlu0 %4554 }
0x10b9   : > { %v4573_v32 = vmul.f32 0.03125, %v4555_v45 }
0x10ba   : > { %v4558_v23 = vpop.xlane.xlu1 %4557 }
0x10bb   : > { %v7535_v31 = vsub.f32 %v4539_v0, %v4573_v32  ;;  %v4574_v14 = vmul.f32 0.03125, %v4558_v23 }
0x10bc   : > { %v4549_v37 = vpop.xlane.xlu0 %4548 }
0x10bd   : > { %v7537_v61 = vsub.f32 %v4540_v44, %v4574_v14  ;;  %v4571_v56 = vmul.f32 0.03125, %v4549_v37  ;;  %v4589_v54 = vmul.f32 %v7535_v31, %v7535_v31 }
0x10be   : > { %v4552_v4 = vpop.xlane.xlu1 %4551 }
0x10bf   : > { %v7541_v35 = vsub.f32 %v4537_v28, %v4571_v56  ;;  %v4572_v39 = vmul.f32 0.03125, %v4552_v4  ;;  %v4601_v19 = vsel %vm7702_vm14, %v4589_v54, 0.0  ;;  %v4590_v34 = vmul.f32 %v7537_v61, %v7537_v61 }
0x10c0   : > { %4602 = vadd.xlane.f32.xlu0 %v4601_v19 }
0x10c1   : > { %v7546_v18 = vsub.f32 %v4538_v51, %v4572_v39  ;;  %v4604_v40 = vsel %vm7703_vm15, %v4590_v34, 0.0  ;;  %v4587_v22 = vmul.f32 %v7541_v35, %v7541_v35 }
0x10c2   : > { %4605 = vadd.xlane.f32.xlu1 %v4604_v40 }
0x10c3   : > { %v4595_v21 = vsel %vm7704_vm9, %v4587_v22, 0.0  ;;  %v4588_v13 = vmul.f32 %v7546_v18, %v7546_v18 }
0x10c4   : > { %4596 = vadd.xlane.f32.xlu0 %v4595_v21 }
0x10c5   : > { %v4598_v26 = vsel %vm7705_vm10, %v4588_v13, 0.0 }
0x10c6   : > { %4599 = vadd.xlane.f32.xlu1 %v4598_v26 }
0x10e7   : > { %v4561_v5 = vpop.xlane.xlu0 %4560 }
0x10e8   : > { %v4575_v46 = vmul.f32 0.03125, %v4561_v5 }
0x10e9   : > { %v4564_v17 = vpop.xlane.xlu1 %4563 }
0x10ea   : > { %v7555_v27 = vsub.f32 %v4541_v60, %v4575_v46  ;;  %v4576_v20 = vmul.f32 0.03125, %v4564_v17 }
0x10eb   : > { %v4567_v10 = vpop.xlane.xlu0 %4566 }
0x10ec   : > { %v7557_v50 = vsub.f32 %v4542_v38, %v4576_v20  ;;  %v4577_v15 = vmul.f32 0.03125, %v4567_v10  ;;  %v4591_v24 = vmul.f32 %v7555_v27, %v7555_v27 }
0x10ed   : > { %v4570_v52 = vpop.xlane.xlu1 %4569 }
0x10ee   : > { %v7561_v53 = vsub.f32 %v4543_v36, %v4577_v15  ;;  %v4578_v42 = vmul.f32 0.03125, %v4570_v52  ;;  %v4607_v11 = vsel %vm7706_vm13, %v4591_v24, 0.0  ;;  %v4592_v48 = vmul.f32 %v7557_v50, %v7557_v50 }
0x10ef   : > { %4608 = vadd.xlane.f32.xlu0 %v4607_v11 }
0x10f0   : > { %v7566_v55 = vsub.f32 %v4544_v6, %v4578_v42  ;;  %v4610_v1 = vsel %vm7707_vm0, %v4592_v48, 0.0  ;;  %v4593_v3 = vmul.f32 %v7561_v53, %v7561_v53 }
0x10f1   : > { %4611 = vadd.xlane.f32.xlu1 %v4610_v1 }
0x10f2   : > { %v4613_v57 = vsel %vm7708_vm5, %v4593_v3, 0.0  ;;  %v4594_v2 = vmul.f32 %v7566_v55, %v7566_v55 }
0x10f3   : > { %4614 = vadd.xlane.f32.xlu0 %v4613_v57 }
0x10f4   : > { %v4616_v0 = vsel %vm7709_vm1, %v4594_v2, 0.0 }
0x10f5   : > { %4617 = vadd.xlane.f32.xlu1 %v4616_v0 }
0x114d   : > { %v4603_v16 = vpop.xlane.xlu0 %4602 }
0x114e   : > { %v4621_v28 = vmul.f32 0.03125, %v4603_v16 }
0x114f   : > { %v4606_v44 = vpop.xlane.xlu1 %4605 }
0x1150   : > { %v4629_v8 = vadd.f32 1e-12, %v4621_v28  ;;  %v4622_v51 = vmul.f32 0.03125, %v4606_v44 }
0x1151   : > { %v4597_v25 = vpop.xlane.xlu0 %4596 }
0x1152   : > { %6052 = vrsqrt.f32 %v4629_v8  ;;  %v4630_v30 = vadd.f32 1e-12, %v4622_v51  ;;  %v4619_v9 = vmul.f32 0.03125, %v4597_v25 }
0x1153   : > { %v4600_v58 = vpop.xlane.xlu1 %4599 }
0x1154   : > { %6054 = vrsqrt.f32 %v4630_v30  ;;  %v4627_v12 = vadd.f32 1e-12, %v4619_v9  ;;  %v4620_v7 = vmul.f32 0.03125, %v4600_v58 }
0x1156   : > { %6056 = vrsqrt.f32 %v4627_v12  ;;  %v4628_v63 = vadd.f32 1e-12, %v4620_v7 }
0x1158   : > { %6058 = vrsqrt.f32 %v4628_v63 }
0x115c   : > { %v6053_v47 = vpop.eup %6052 }
0x115d   : > { %v4645_v60 = vmul.f32 %v6053_v47, %v7535_v31 }
0x115e   : > { %v6055_v59 = vpop.eup %6054 }
0x115f   : > { %v4659_v36 = vmul.f32 %v4953_v33, %v4645_v60  ;;  %v4646_v38 = vmul.f32 %v6055_v59, %v7537_v61 }
0x1160   : > { %v6057_v43 = vpop.eup %6056 }
0x1161   : > { %v4673_v6 = vadd.f32 %v4954_v62, %v4659_v36  ;;  %v4660_v49 = vmul.f32 %v4953_v33, %v4646_v38  ;;  %v4643_v41 = vmul.f32 %v6057_v43, %v7541_v35 }
0x1162   : > { %v6059_v29 = vpop.eup %6058 }
0x1163   : > { %4681 = vst.msk [vmem:[%s7587_s26 + $0x10] sm:$0xff] %vm7710_vm2, %v4673_v6  ;;  %v4674_v45 = vadd.f32 %v4954_v62, %v4660_v49  ;;  %v4657_v32 = vmul.f32 %v4953_v33, %v4643_v41  ;;  %v4644_v23 = vmul.f32 %v6059_v29, %v7546_v18 }
0x1165   : > { %4682 = vst.msk [vmem:[%s7587_s26 + $0x18] sm:$0xff] %vm7711_vm3, %v4674_v45  ;;  %v4671_v31 = vadd.f32 %v4954_v62, %v4657_v32  ;;  %v4658_v14 = vmul.f32 %v4953_v33, %v4644_v23 }
0x1167   : > { %4679 = vst.msk [vmem:[%s7587_s26] sm:$0xff] %vm7712_vm4, %v4671_v31  ;;  %v4672_v37 = vadd.f32 %v4954_v62, %v4658_v14 }
0x1169   : > { %4680 = vst.msk [vmem:[%s7587_s26 + $0x8] sm:$0xff] %vm7713_vm6, %v4672_v37 }
0x117c   : > { %v4609_v61 = vpop.xlane.xlu0 %4608 }
0x117d   : > { %v4623_v56 = vmul.f32 0.03125, %v4609_v61 }
0x117e   : > { %v4612_v54 = vpop.xlane.xlu1 %4611 }
0x117f   : > { %v4631_v4 = vadd.f32 1e-12, %v4623_v56  ;;  %v4624_v35 = vmul.f32 0.03125, %v4612_v54 }
0x1180   : > { %v4615_v39 = vpop.xlane.xlu0 %4614 }
0x1181   : > { %6060 = vrsqrt.f32 %v4631_v4  ;;  %v4632_v19 = vadd.f32 1e-12, %v4624_v35  ;;  %v4625_v34 = vmul.f32 0.03125, %v4615_v39 }
0x1182   : > { %v4618_v40 = vpop.xlane.xlu1 %4617 }
0x1183   : > { %6062 = vrsqrt.f32 %v4632_v19  ;;  %v4633_v18 = vadd.f32 1e-12, %v4625_v34  ;;  %v4626_v22 = vmul.f32 0.03125, %v4618_v40 }
0x1185   : > { %6064 = vrsqrt.f32 %v4633_v18  ;;  %v4634_v21 = vadd.f32 1e-12, %v4626_v22 }
0x1187   : > { %6066 = vrsqrt.f32 %v4634_v21 }
0x118b   : > { %v6061_v13 = vpop.eup %6060 }
0x118c   : > { %v4647_v26 = vmul.f32 %v6061_v13, %v7555_v27 }
0x118d   : > { %v6063_v5 = vpop.eup %6062 }
0x118e   : > { %v4661_v46 = vmul.f32 %v4953_v33, %v4647_v26  ;;  %v4648_v17 = vmul.f32 %v6063_v5, %v7557_v50 }
0x118f   : > { %v6065_v20 = vpop.eup %6064 }
0x1190   : > { %v4675_v10 = vadd.f32 %v4954_v62, %v4661_v46  ;;  %v4662_v15 = vmul.f32 %v4953_v33, %v4648_v17  ;;  %v4649_v24 = vmul.f32 %v6065_v20, %v7561_v53 }
0x1191   : > { %v6067_v52 = vpop.eup %6066 }
0x1192   : > { %4683 = vst.msk [vmem:[%s7587_s26 + $0x20] sm:$0xff] %vm7714_vm7, %v4675_v10  ;;  %v4676_v42 = vadd.f32 %v4954_v62, %v4662_v15  ;;  %v4663_v11 = vmul.f32 %v4953_v33, %v4649_v24  ;;  %v4650_v48 = vmul.f32 %v6067_v52, %v7566_v55 }
0x1194   : > { %4684 = vst.msk [vmem:[%s7587_s26 + $0x28] sm:$0xff] %vm7715_vm8, %v4676_v42  ;;  %v4677_v27 = vadd.f32 %v4954_v62, %v4663_v11  ;;  %v4664_v1 = vmul.f32 %v4953_v33, %v4650_v48 }
0x1196   : > { %4685 = vst.msk [vmem:[%s7587_s26 + $0x30] sm:$0xff] %vm7716_vm11, %v4677_v27  ;;  %v4678_v3 = vadd.f32 %v4954_v62, %v4664_v1 }
0x1198   : > { %4686 = vst.msk [vmem:[%s7587_s26 + $0x38] sm:$0xff] %vm7717_vm12, %v4678_v3 }
0x1199 PF: > { %s34_s5 = sadd.s32 1, %s6096_s5  }
0x119a   : > { %p31_p4 = scmp.ge.s32.totalorder %s34_s5, 4  }
0x119c   :  { %33 = sbr.rel (!%p31_p4) target bundleno = 11 (0xb), region = 149 }

</bundles_post_ra>
